<compile_context>
chip_gen: v5e
topology: v5e:2x2
jax: 0.10.0
libtpu: 0.0.40
codegen_flags: <defaults>
</compile_context>

<pallas_src>
import jax
import jax.numpy as jnp
from jax.experimental import pallas as pl
from jax.experimental.pallas import tpu as pltpu

LANE = 128
SUBLANE = 8

# packed gate slots (i, f, o, g)  <-  torch gate blocks (i=0, f=1, g=2, o=3)
GATE_SRC = (0, 1, 3, 2)


def _round_up(x, m):
    return (x + m - 1) // m * m


# ----------------------------------------------------------------------------
# Fused forward kernel (built per static config; all refs are whole-array VMEM)
# ----------------------------------------------------------------------------
def _build_fused_kernel(T, BP, num_layers, HP):
    """Ref order:
         x        (T*BP, Din)   bf16   time-major rows: row = t*BP + b
         h0       (L, BP, HP)   f32
         c0       (L, BP, HP)   f32
         w_omiga  (BP, HP)      f32
         per LSTM layer l: wih_t (feat_in, 4*HP) bf16, whh_t (HP, 4*HP) bf16,
                           bias  (1, 4*HP) f32   (gate-major i,f,o,g, 0-padded)
         wfc_t    (HP, f_out)   bf16   (folded FC chain)
         bfc      (1, f_out)    f32
         out      (BP, f_out)   f32
         scratch: seq (T*BP, HP) f32
    """

    def kernel(*refs):
        idx = 0
        x_ref = refs[idx]; idx += 1
        h0_ref = refs[idx]; idx += 1
        c0_ref = refs[idx]; idx += 1
        w_omiga_ref = refs[idx]; idx += 1
        lstm_refs = refs[idx:idx + 3 * num_layers]; idx += 3 * num_layers
        wfc_ref = refs[idx]; idx += 1
        bfc_ref = refs[idx]; idx += 1
        out_ref = refs[idx]; idx += 1
        seq_ref = refs[idx]                              # (T*BP, HP) f32 scratch

        def sigmoid(v):
            # single native EUP tanh push instead of exp + reciprocal
            return 0.5 * jnp.tanh(0.5 * v) + 0.5

        seq_in = x_ref[...]                              # bf16 (T*BP, feat_in)
        for layer in range(num_layers):
            wih_ref = lstm_refs[3 * layer]               # (feat_in, 4*HP) bf16
            whh_ref = lstm_refs[3 * layer + 1]           # (HP, 4*HP)      bf16
            b_ref = lstm_refs[3 * layer + 2]             # (1, 4*HP)       f32

            # Hoisted input projection: one MXU pass over the whole sequence.
            xproj = (jnp.dot(seq_in, wih_ref[...],
                             preferred_element_type=jnp.float32)
                     + b_ref[...])                       # (T*BP, 4*HP) f32

            h = h0_ref[layer]                            # (BP, HP) f32
            c = c0_ref[layer]                            # (BP, HP) f32
            # Serial recurrence (static unroll). W_hh staging in MXU weight
            # registers (matmul_push_rhs/acc_lhs/pop) deliberately not used.
            for t in range(T):
                gates = xproj[t * BP:(t + 1) * BP, :] + jnp.dot(
                    h.astype(jnp.bfloat16), whh_ref[...],
                    preferred_element_type=jnp.float32)  # (BP, 4*HP) f32
                sig = sigmoid(gates[:, :3 * HP])         # contiguous i,f,o block
                ig = sig[:, 0 * HP:1 * HP]
                fg = sig[:, 1 * HP:2 * HP]
                og = sig[:, 2 * HP:3 * HP]
                gg = jnp.tanh(gates[:, 3 * HP:4 * HP])
                c = fg * c + ig * gg
                h = og * jnp.tanh(c)
                # 8-row aligned store into the persistent sequence scratch
                seq_ref[t * BP:(t + 1) * BP, :] = h
            if layer + 1 < num_layers:
                # one batched cast; next layer's hoisted projection input
                seq_in = seq_ref[...].astype(jnp.bfloat16)

        # ---- attention pooling (batched: 1 tanh, 1 exp, vreg-dense) ---------
        seq3 = seq_ref[...].reshape(T, BP, HP)           # layout-preserving split
        Ht = jnp.tanh(seq3)                              # one EUP pass
        w_omiga = w_omiga_ref[...]                       # (BP, HP) f32
        scores = jnp.sum(Ht * w_omiga[None, :, :], axis=-1,
                         keepdims=True)                  # (T, BP, 1)
        m = jnp.max(scores, axis=0, keepdims=True)       # (1, BP, 1)
        e = jnp.exp(scores - m)                          # one EUP pass
        denom = jnp.sum(e, axis=0, keepdims=True)        # (1, BP, 1)
        wts = e * pl.reciprocal(denom, approx=True)      # (T, BP, 1)
        atten = jnp.sum(seq3 * wts, axis=0)              # (BP, HP) f32

        # ---- folded FC chain: single matmul + bias ---------------------------
        y = (jnp.dot(atten.astype(jnp.bfloat16), wfc_ref[...],
                     preferred_element_type=jnp.float32)
             + bfc_ref[...])
        out_ref[...] = y

    return kernel


# ----------------------------------------------------------------------------
# Parameter init (deterministic, torch-like uniform(-1/sqrt(H), 1/sqrt(H)))
# ----------------------------------------------------------------------------
def init_params(key, input_size, hidden_size, num_layers, fc_layer_param):
    params = {"lstm": [], "fc": []}
    k = 1.0 / jnp.sqrt(jnp.float32(hidden_size))

    def unif(key, shape, bound):
        return jax.random.uniform(key, shape, jnp.float32, -bound, bound)

    for layer in range(num_layers):
        din = input_size if layer == 0 else hidden_size
        key, k1, k2, k3, k4 = jax.random.split(key, 5)
        params["lstm"].append(dict(
            w_ih=unif(k1, (4 * hidden_size, din), k),
            w_hh=unif(k2, (4 * hidden_size, hidden_size), k),
            b_ih=unif(k3, (4 * hidden_size,), k),
            b_hh=unif(k4, (4 * hidden_size,), k),
        ))

    fan_in = hidden_size
    for dout in fc_layer_param:
        key, k1, k2 = jax.random.split(key, 3)
        kb = 1.0 / jnp.sqrt(jnp.float32(fan_in))
        params["fc"].append(dict(w=unif(k1, (dout, fan_in), kb),
                                 b=unif(k2, (dout,), kb)))
        fan_in = dout
    return params


# ----------------------------------------------------------------------------
# One-time packing: transpose, gate-major (i,f,o,g), pad H -> 128, bf16,
# fold the activation-free FC chain into a single affine map.
# ----------------------------------------------------------------------------
def pack_params(params, input_size, hidden_size):
    H = hidden_size
    HP = _round_up(H, LANE)
    packed = {"lstm": []}
    for layer, lp in enumerate(params["lstm"]):
        din = input_size if layer == 0 else H
        din_p = input_size if layer == 0 else HP
        wih_t = jnp.zeros((din_p, 4 * HP), jnp.float32)
        whh_t = jnp.zeros((HP, 4 * HP), jnp.float32)
        bias = jnp.zeros((1, 4 * HP), jnp.float32)
        b_sum = lp["b_ih"] + lp["b_hh"]
        for s, g in enumerate(GATE_SRC):
            wih_t = wih_t.at[:din, s * HP:s * HP + H].set(
                jnp.transpose(lp["w_ih"][g * H:(g + 1) * H, :]))
            whh_t = whh_t.at[:H, s * HP:s * HP + H].set(
                jnp.transpose(lp["w_hh"][g * H:(g + 1) * H, :]))
            bias = bias.at[0, s * HP:s * HP + H].set(b_sum[g * H:(g + 1) * H])
        packed["lstm"].append(dict(wih_t=wih_t.astype(jnp.bfloat16),
                                   whh_t=whh_t.astype(jnp.bfloat16),
                                   bias=bias))

    # Fold FC chain (no activations between layers) in f32:
    #   y = x @ W1^T + b1 ; y = y @ W2^T + b2  ==>  y = x @ Wf + bf
    wt = jnp.transpose(params["fc"][0]["w"])            # (H, f1)
    b = params["fc"][0]["b"]
    for fp in params["fc"][1:]:
        wt = wt @ jnp.transpose(fp["w"])
        b = b @ jnp.transpose(fp["w"]) + fp["b"]
    f_last = wt.shape[1]
    wfc = jnp.zeros((HP, f_last), jnp.float32).at[:H, :].set(wt)
    packed["fc_w"] = wfc.astype(jnp.bfloat16)
    packed["fc_b"] = b.reshape(1, f_last).astype(jnp.float32)
    return packed


# ----------------------------------------------------------------------------
# Full forward pass (single fused pallas_call)
# ----------------------------------------------------------------------------
@jax.jit
def lstm_model_forward(packed, x, h0, c0, w_omiga):
    """x: (B, T, input_size) batch_first; h0/c0: (L, B, H); w_omiga: (B, H)."""
    B, T, Din = x.shape
    num_layers = len(packed["lstm"])
    HP = packed["lstm"][0]["whh_t"].shape[0]
    H = h0.shape[-1]
    f_last = packed["fc_w"].shape[1]
    BP = _round_up(B, SUBLANE)                            # pad batch to sublane tile

    # batch_first -> time-major rows (row = t*BP + b), padded & bf16 for the MXU
    x_p = jnp.zeros((BP, T, Din), jnp.float32).at[:B].set(x.astype(jnp.float32))
    x2d = jnp.transpose(x_p, (1, 0, 2)).reshape(T * BP, Din).astype(jnp.bfloat16)
    h0p = jnp.zeros((num_layers, BP, HP), jnp.float32).at[:, :B, :H].set(
        h0.astype(jnp.float32))
    c0p = jnp.zeros((num_layers, BP, HP), jnp.float32).at[:, :B, :H].set(
        c0.astype(jnp.float32))
    wom = jnp.zeros((BP, HP), jnp.float32).at[:B, :H].set(
        w_omiga.astype(jnp.float32))

    args = [x2d, h0p, c0p, wom]
    for lp in packed["lstm"]:
        args += [lp["wih_t"], lp["whh_t"], lp["bias"]]
    args += [packed["fc_w"], packed["fc_b"]]

    kernel = _build_fused_kernel(T, BP, num_layers, HP)
    # Grid-less: every operand is a whole-array VMEM ref (total < 1 MiB, fits
    # v5e/v6e/v7x easily).  On v7x this runs on one TensorCore; add a batch
    # grid axis with dimension_semantics=("parallel",) only if B grows.
    out = pl.pallas_call(
        kernel,
        out_shape=jax.ShapeDtypeStruct((BP, f_last), jnp.float32),
        scratch_shapes=[pltpu.VMEM((T * BP, HP), jnp.float32)],
    )(*args)
    return out[:B]


# ----------------------------------------------------------------------------
# Pure-JAX f32 reference (original layout / gate order) for a sanity check
# ----------------------------------------------------------------------------
def _reference_forward(params, x, h0, c0, w_omiga):
    B, T, _ = x.shape
    seq = x
    for layer, lp in enumerate(params["lstm"]):
        H = lp["w_hh"].shape[1]
        h, c = h0[layer], c0[layer]
        outs = []
        for t in range(T):
            gates = (seq[:, t, :] @ lp["w_ih"].T + h @ lp["w_hh"].T
                     + lp["b_ih"] + lp["b_hh"])
            ig = jax.nn.sigmoid(gates[:, 0 * H:1 * H])
            fg = jax.nn.sigmoid(gates[:, 1 * H:2 * H])
            gg = jnp.tanh(gates[:, 2 * H:3 * H])
            og = jax.nn.sigmoid(gates[:, 3 * H:4 * H])
            c = fg * c + ig * gg
            h = og * jnp.tanh(c)
            outs.append(h)
        seq = jnp.stack(outs, axis=1)                    # (B, T, H)
    scores = jnp.einsum("bth,bh->bt", jnp.tanh(seq), w_omiga)
    weights = jax.nn.softmax(scores, axis=-1)
    atten = jnp.sum(seq * weights[:, :, None], axis=1)   # (B, H)
    out = atten
    for fp in params["fc"]:
        out = out @ fp["w"].T + fp["b"]
    return out


if __name__ == "__main__":
    B, T = 2, 8
    input_size, hidden_size, num_layers = 16, 32, 2
    fc_layer_num, fc_layer_param = 2, (16, 8)

    key = jax.random.PRNGKey(0)
    key, kp, kx, kh, kc, kw = jax.random.split(key, 6)

    params = init_params(kp, input_size, hidden_size, num_layers, fc_layer_param)
    packed = pack_params(params, input_size, hidden_size)

    x = jax.random.normal(kx, (B, T, input_size), jnp.float32)
    # torch.randn(...) at forward time in the original -> deterministic draws here.
    h0 = jax.random.normal(kh, (num_layers, B, hidden_size), jnp.float32)
    c0 = jax.random.normal(kc, (num_layers, B, hidden_size), jnp.float32)
    w_omiga = jax.random.normal(kw, (B, hidden_size), jnp.float32)  # (B,H,1) squeezed

    out = lstm_model_forward(packed, x, h0, c0, w_omiga)
    jax.block_until_ready(out)
    assert out.shape == (B, fc_layer_param[-1])

    # loose tolerance: kernel uses bf16 MXU operands, reference is f32
    ref = _reference_forward(params, x, h0, c0, w_omiga)
    assert float(jnp.max(jnp.abs(out - ref))) < 0.15, "kernel/reference mismatch"
    print("KERNEL_OK")
</pallas_src>

<mosaic_0001>
module attributes {stable_mosaic.version = 11 : i64} {
  func.func @kernel(%arg0: memref<64x16xbf16, #tpu.memory_space<vmem>>, %arg1: memref<2x8x128xf32, #tpu.memory_space<vmem>>, %arg2: memref<2x8x128xf32, #tpu.memory_space<vmem>>, %arg3: memref<8x128xf32, #tpu.memory_space<vmem>>, %arg4: memref<16x512xbf16, #tpu.memory_space<vmem>>, %arg5: memref<128x512xbf16, #tpu.memory_space<vmem>>, %arg6: memref<1x512xf32, #tpu.memory_space<vmem>>, %arg7: memref<128x512xbf16, #tpu.memory_space<vmem>>, %arg8: memref<128x512xbf16, #tpu.memory_space<vmem>>, %arg9: memref<1x512xf32, #tpu.memory_space<vmem>>, %arg10: memref<128x8xbf16, #tpu.memory_space<vmem>>, %arg11: memref<1x8xf32, #tpu.memory_space<vmem>>, %arg12: memref<8x8xf32, #tpu.memory_space<vmem>>, %arg13: memref<64x128xf32, #tpu.memory_space<vmem>>) attributes {dimension_semantics = [], scalar_prefetch = 0 : i64, scratch_operands = 1 : i64, tpu.core_type = #tpu.core_type<tc>} {
    %c0 = arith.constant 0 : index
    %c0_0 = arith.constant 0 : index
    %0 = vector.load %arg0[%c0, %c0_0] : memref<64x16xbf16, #tpu.memory_space<vmem>>, vector<64x16xbf16>
    %c0_1 = arith.constant 0 : index
    %c0_2 = arith.constant 0 : index
    %1 = vector.load %arg4[%c0_1, %c0_2] : memref<16x512xbf16, #tpu.memory_space<vmem>>, vector<16x512xbf16>
    %cst = arith.constant dense<0.000000e+00> : vector<64x512xf32>
    %2 = tpu.matmul %0, %1, %cst {dimension_numbers = #tpu.dot_dimension_numbers<[1], [0], [0], [1], [0, 0, 1, 1], [], []>} : vector<64x16xbf16>, vector<16x512xbf16>, vector<64x512xf32> -> vector<64x512xf32>
    %c0_3 = arith.constant 0 : index
    %c0_4 = arith.constant 0 : index
    %3 = vector.load %arg6[%c0_3, %c0_4] : memref<1x512xf32, #tpu.memory_space<vmem>>, vector<1x512xf32>
    %4 = vector.broadcast %3 : vector<1x512xf32> to vector<64x512xf32>
    %5 = arith.addf %2, %4 : vector<64x512xf32>
    %c0_5 = arith.constant 0 : index
    %c0_6 = arith.constant 0 : index
    %c0_7 = arith.constant 0 : index
    %6 = vector.load %arg1[%c0_5, %c0_6, %c0_7] : memref<2x8x128xf32, #tpu.memory_space<vmem>>, vector<1x8x128xf32>
    %7 = vector.shape_cast %6 : vector<1x8x128xf32> to vector<8x128xf32>
    %c0_8 = arith.constant 0 : index
    %c0_9 = arith.constant 0 : index
    %c0_10 = arith.constant 0 : index
    %8 = vector.load %arg2[%c0_8, %c0_9, %c0_10] : memref<2x8x128xf32, #tpu.memory_space<vmem>>, vector<1x8x128xf32>
    %9 = vector.shape_cast %8 : vector<1x8x128xf32> to vector<8x128xf32>
    %10 = vector.extract_strided_slice %5 {offsets = [0, 0], sizes = [8, 512], strides = [1, 1]} : vector<64x512xf32> to vector<8x512xf32>
    %11 = arith.truncf %7 : vector<8x128xf32> to vector<8x128xbf16>
    %c0_11 = arith.constant 0 : index
    %c0_12 = arith.constant 0 : index
    %12 = vector.load %arg5[%c0_11, %c0_12] : memref<128x512xbf16, #tpu.memory_space<vmem>>, vector<128x512xbf16>
    %cst_13 = arith.constant dense<0.000000e+00> : vector<8x512xf32>
    %13 = tpu.matmul %11, %12, %cst_13 {dimension_numbers = #tpu.dot_dimension_numbers<[1], [0], [0], [1], [0, 0, 1, 1], [], []>} : vector<8x128xbf16>, vector<128x512xbf16>, vector<8x512xf32> -> vector<8x512xf32>
    %14 = arith.addf %10, %13 : vector<8x512xf32>
    %15 = vector.extract_strided_slice %14 {offsets = [0, 0], sizes = [8, 384], strides = [1, 1]} : vector<8x512xf32> to vector<8x384xf32>
    %cst_14 = arith.constant 5.000000e-01 : f32
    %16 = vector.broadcast %cst_14 : f32 to vector<8x384xf32>
    %17 = arith.mulf %16, %15 : vector<8x384xf32>
    %18 = math.tanh %17 : vector<8x384xf32>
    %cst_15 = arith.constant 5.000000e-01 : f32
    %19 = vector.broadcast %cst_15 : f32 to vector<8x384xf32>
    %20 = arith.mulf %19, %18 : vector<8x384xf32>
    %cst_16 = arith.constant 5.000000e-01 : f32
    %21 = vector.broadcast %cst_16 : f32 to vector<8x384xf32>
    %22 = arith.addf %20, %21 : vector<8x384xf32>
    %23 = vector.extract_strided_slice %22 {offsets = [0, 0], sizes = [8, 128], strides = [1, 1]} : vector<8x384xf32> to vector<8x128xf32>
    %24 = vector.extract_strided_slice %22 {offsets = [0, 128], sizes = [8, 128], strides = [1, 1]} : vector<8x384xf32> to vector<8x128xf32>
    %25 = vector.extract_strided_slice %22 {offsets = [0, 256], sizes = [8, 128], strides = [1, 1]} : vector<8x384xf32> to vector<8x128xf32>
    %26 = vector.extract_strided_slice %14 {offsets = [0, 384], sizes = [8, 128], strides = [1, 1]} : vector<8x512xf32> to vector<8x128xf32>
    %27 = math.tanh %26 : vector<8x128xf32>
    %28 = arith.mulf %24, %9 : vector<8x128xf32>
    %29 = arith.mulf %23, %27 : vector<8x128xf32>
    %30 = arith.addf %28, %29 : vector<8x128xf32>
    %31 = math.tanh %30 : vector<8x128xf32>
    %32 = arith.mulf %25, %31 : vector<8x128xf32>
    %c0_17 = arith.constant 0 : index
    %c0_18 = arith.constant 0 : index
    %33 = vector.load %arg13[%c0_17, %c0_18] : memref<64x128xf32, #tpu.memory_space<vmem>>, vector<8x128xf32>
    tpu.vector_store %arg13[%c0_17, %c0_18], %32 {strides = array<i32>} : memref<64x128xf32, #tpu.memory_space<vmem>>, vector<8x128xf32>,
    %34 = vector.extract_strided_slice %5 {offsets = [8, 0], sizes = [8, 512], strides = [1, 1]} : vector<64x512xf32> to vector<8x512xf32>
    %35 = arith.truncf %32 : vector<8x128xf32> to vector<8x128xbf16>
    %c0_19 = arith.constant 0 : index
    %c0_20 = arith.constant 0 : index
    %36 = vector.load %arg5[%c0_19, %c0_20] : memref<128x512xbf16, #tpu.memory_space<vmem>>, vector<128x512xbf16>
    %cst_21 = arith.constant dense<0.000000e+00> : vector<8x512xf32>
    %37 = tpu.matmul %35, %36, %cst_21 {dimension_numbers = #tpu.dot_dimension_numbers<[1], [0], [0], [1], [0, 0, 1, 1], [], []>} : vector<8x128xbf16>, vector<128x512xbf16>, vector<8x512xf32> -> vector<8x512xf32>
    %38 = arith.addf %34, %37 : vector<8x512xf32>
    %39 = vector.extract_strided_slice %38 {offsets = [0, 0], sizes = [8, 384], strides = [1, 1]} : vector<8x512xf32> to vector<8x384xf32>
    %cst_22 = arith.constant 5.000000e-01 : f32
    %40 = vector.broadcast %cst_22 : f32 to vector<8x384xf32>
    %41 = arith.mulf %40, %39 : vector<8x384xf32>
    %42 = math.tanh %41 : vector<8x384xf32>
    %cst_23 = arith.constant 5.000000e-01 : f32
    %43 = vector.broadcast %cst_23 : f32 to vector<8x384xf32>
    %44 = arith.mulf %43, %42 : vector<8x384xf32>
    %cst_24 = arith.constant 5.000000e-01 : f32
    %45 = vector.broadcast %cst_24 : f32 to vector<8x384xf32>
    %46 = arith.addf %44, %45 : vector<8x384xf32>
    %47 = vector.extract_strided_slice %46 {offsets = [0, 0], sizes = [8, 128], strides = [1, 1]} : vector<8x384xf32> to vector<8x128xf32>
    %48 = vector.extract_strided_slice %46 {offsets = [0, 128], sizes = [8, 128], strides = [1, 1]} : vector<8x384xf32> to vector<8x128xf32>
    %49 = vector.extract_strided_slice %46 {offsets = [0, 256], sizes = [8, 128], strides = [1, 1]} : vector<8x384xf32> to vector<8x128xf32>
    %50 = vector.extract_strided_slice %38 {offsets = [0, 384], sizes = [8, 128], strides = [1, 1]} : vector<8x512xf32> to vector<8x128xf32>
    %51 = math.tanh %50 : vector<8x128xf32>
    %52 = arith.mulf %48, %30 : vector<8x128xf32>
    %53 = arith.mulf %47, %51 : vector<8x128xf32>
    %54 = arith.addf %52, %53 : vector<8x128xf32>
    %55 = math.tanh %54 : vector<8x128xf32>
    %56 = arith.mulf %49, %55 : vector<8x128xf32>
    %c8 = arith.constant 8 : index
    %c0_25 = arith.constant 0 : index
    %57 = vector.load %arg13[%c8, %c0_25] : memref<64x128xf32, #tpu.memory_space<vmem>>, vector<8x128xf32>
    tpu.vector_store %arg13[%c8, %c0_25], %56 {strides = array<i32>} : memref<64x128xf32, #tpu.memory_space<vmem>>, vector<8x128xf32>,
    %58 = vector.extract_strided_slice %5 {offsets = [16, 0], sizes = [8, 512], strides = [1, 1]} : vector<64x512xf32> to vector<8x512xf32>
    %59 = arith.truncf %56 : vector<8x128xf32> to vector<8x128xbf16>
    %c0_26 = arith.constant 0 : index
    %c0_27 = arith.constant 0 : index
    %60 = vector.load %arg5[%c0_26, %c0_27] : memref<128x512xbf16, #tpu.memory_space<vmem>>, vector<128x512xbf16>
    %cst_28 = arith.constant dense<0.000000e+00> : vector<8x512xf32>
    %61 = tpu.matmul %59, %60, %cst_28 {dimension_numbers = #tpu.dot_dimension_numbers<[1], [0], [0], [1], [0, 0, 1, 1], [], []>} : vector<8x128xbf16>, vector<128x512xbf16>, vector<8x512xf32> -> vector<8x512xf32>
    %62 = arith.addf %58, %61 : vector<8x512xf32>
    %63 = vector.extract_strided_slice %62 {offsets = [0, 0], sizes = [8, 384], strides = [1, 1]} : vector<8x512xf32> to vector<8x384xf32>
    %cst_29 = arith.constant 5.000000e-01 : f32
    %64 = vector.broadcast %cst_29 : f32 to vector<8x384xf32>
    %65 = arith.mulf %64, %63 : vector<8x384xf32>
    %66 = math.tanh %65 : vector<8x384xf32>
    %cst_30 = arith.constant 5.000000e-01 : f32
    %67 = vector.broadcast %cst_30 : f32 to vector<8x384xf32>
    %68 = arith.mulf %67, %66 : vector<8x384xf32>
    %cst_31 = arith.constant 5.000000e-01 : f32
    %69 = vector.broadcast %cst_31 : f32 to vector<8x384xf32>
    %70 = arith.addf %68, %69 : vector<8x384xf32>
    %71 = vector.extract_strided_slice %70 {offsets = [0, 0], sizes = [8, 128], strides = [1, 1]} : vector<8x384xf32> to vector<8x128xf32>
    %72 = vector.extract_strided_slice %70 {offsets = [0, 128], sizes = [8, 128], strides = [1, 1]} : vector<8x384xf32> to vector<8x128xf32>
    %73 = vector.extract_strided_slice %70 {offsets = [0, 256], sizes = [8, 128], strides = [1, 1]} : vector<8x384xf32> to vector<8x128xf32>
    %74 = vector.extract_strided_slice %62 {offsets = [0, 384], sizes = [8, 128], strides = [1, 1]} : vector<8x512xf32> to vector<8x128xf32>
    %75 = math.tanh %74 : vector<8x128xf32>
    %76 = arith.mulf %72, %54 : vector<8x128xf32>
    %77 = arith.mulf %71, %75 : vector<8x128xf32>
    %78 = arith.addf %76, %77 : vector<8x128xf32>
    %79 = math.tanh %78 : vector<8x128xf32>
    %80 = arith.mulf %73, %79 : vector<8x128xf32>
    %c16 = arith.constant 16 : index
    %c0_32 = arith.constant 0 : index
    %81 = vector.load %arg13[%c16, %c0_32] : memref<64x128xf32, #tpu.memory_space<vmem>>, vector<8x128xf32>
    tpu.vector_store %arg13[%c16, %c0_32], %80 {strides = array<i32>} : memref<64x128xf32, #tpu.memory_space<vmem>>, vector<8x128xf32>,
    %82 = vector.extract_strided_slice %5 {offsets = [24, 0], sizes = [8, 512], strides = [1, 1]} : vector<64x512xf32> to vector<8x512xf32>
    %83 = arith.truncf %80 : vector<8x128xf32> to vector<8x128xbf16>
    %c0_33 = arith.constant 0 : index
    %c0_34 = arith.constant 0 : index
    %84 = vector.load %arg5[%c0_33, %c0_34] : memref<128x512xbf16, #tpu.memory_space<vmem>>, vector<128x512xbf16>
    %cst_35 = arith.constant dense<0.000000e+00> : vector<8x512xf32>
    %85 = tpu.matmul %83, %84, %cst_35 {dimension_numbers = #tpu.dot_dimension_numbers<[1], [0], [0], [1], [0, 0, 1, 1], [], []>} : vector<8x128xbf16>, vector<128x512xbf16>, vector<8x512xf32> -> vector<8x512xf32>
    %86 = arith.addf %82, %85 : vector<8x512xf32>
    %87 = vector.extract_strided_slice %86 {offsets = [0, 0], sizes = [8, 384], strides = [1, 1]} : vector<8x512xf32> to vector<8x384xf32>
    %cst_36 = arith.constant 5.000000e-01 : f32
    %88 = vector.broadcast %cst_36 : f32 to vector<8x384xf32>
    %89 = arith.mulf %88, %87 : vector<8x384xf32>
    %90 = math.tanh %89 : vector<8x384xf32>
    %cst_37 = arith.constant 5.000000e-01 : f32
    %91 = vector.broadcast %cst_37 : f32 to vector<8x384xf32>
    %92 = arith.mulf %91, %90 : vector<8x384xf32>
    %cst_38 = arith.constant 5.000000e-01 : f32
    %93 = vector.broadcast %cst_38 : f32 to vector<8x384xf32>
    %94 = arith.addf %92, %93 : vector<8x384xf32>
    %95 = vector.extract_strided_slice %94 {offsets = [0, 0], sizes = [8, 128], strides = [1, 1]} : vector<8x384xf32> to vector<8x128xf32>
    %96 = vector.extract_strided_slice %94 {offsets = [0, 128], sizes = [8, 128], strides = [1, 1]} : vector<8x384xf32> to vector<8x128xf32>
    %97 = vector.extract_strided_slice %94 {offsets = [0, 256], sizes = [8, 128], strides = [1, 1]} : vector<8x384xf32> to vector<8x128xf32>
    %98 = vector.extract_strided_slice %86 {offsets = [0, 384], sizes = [8, 128], strides = [1, 1]} : vector<8x512xf32> to vector<8x128xf32>
    %99 = math.tanh %98 : vector<8x128xf32>
    %100 = arith.mulf %96, %78 : vector<8x128xf32>
    %101 = arith.mulf %95, %99 : vector<8x128xf32>
    %102 = arith.addf %100, %101 : vector<8x128xf32>
    %103 = math.tanh %102 : vector<8x128xf32>
    %104 = arith.mulf %97, %103 : vector<8x128xf32>
    %c24 = arith.constant 24 : index
    %c0_39 = arith.constant 0 : index
    %105 = vector.load %arg13[%c24, %c0_39] : memref<64x128xf32, #tpu.memory_space<vmem>>, vector<8x128xf32>
    tpu.vector_store %arg13[%c24, %c0_39], %104 {strides = array<i32>} : memref<64x128xf32, #tpu.memory_space<vmem>>, vector<8x128xf32>,
    %106 = vector.extract_strided_slice %5 {offsets = [32, 0], sizes = [8, 512], strides = [1, 1]} : vector<64x512xf32> to vector<8x512xf32>
    %107 = arith.truncf %104 : vector<8x128xf32> to vector<8x128xbf16>
    %c0_40 = arith.constant 0 : index
    %c0_41 = arith.constant 0 : index
    %108 = vector.load %arg5[%c0_40, %c0_41] : memref<128x512xbf16, #tpu.memory_space<vmem>>, vector<128x512xbf16>
    %cst_42 = arith.constant dense<0.000000e+00> : vector<8x512xf32>
    %109 = tpu.matmul %107, %108, %cst_42 {dimension_numbers = #tpu.dot_dimension_numbers<[1], [0], [0], [1], [0, 0, 1, 1], [], []>} : vector<8x128xbf16>, vector<128x512xbf16>, vector<8x512xf32> -> vector<8x512xf32>
    %110 = arith.addf %106, %109 : vector<8x512xf32>
    %111 = vector.extract_strided_slice %110 {offsets = [0, 0], sizes = [8, 384], strides = [1, 1]} : vector<8x512xf32> to vector<8x384xf32>
    %cst_43 = arith.constant 5.000000e-01 : f32
    %112 = vector.broadcast %cst_43 : f32 to vector<8x384xf32>
    %113 = arith.mulf %112, %111 : vector<8x384xf32>
    %114 = math.tanh %113 : vector<8x384xf32>
    %cst_44 = arith.constant 5.000000e-01 : f32
    %115 = vector.broadcast %cst_44 : f32 to vector<8x384xf32>
    %116 = arith.mulf %115, %114 : vector<8x384xf32>
    %cst_45 = arith.constant 5.000000e-01 : f32
    %117 = vector.broadcast %cst_45 : f32 to vector<8x384xf32>
    %118 = arith.addf %116, %117 : vector<8x384xf32>
    %119 = vector.extract_strided_slice %118 {offsets = [0, 0], sizes = [8, 128], strides = [1, 1]} : vector<8x384xf32> to vector<8x128xf32>
    %120 = vector.extract_strided_slice %118 {offsets = [0, 128], sizes = [8, 128], strides = [1, 1]} : vector<8x384xf32> to vector<8x128xf32>
    %121 = vector.extract_strided_slice %118 {offsets = [0, 256], sizes = [8, 128], strides = [1, 1]} : vector<8x384xf32> to vector<8x128xf32>
    %122 = vector.extract_strided_slice %110 {offsets = [0, 384], sizes = [8, 128], strides = [1, 1]} : vector<8x512xf32> to vector<8x128xf32>
    %123 = math.tanh %122 : vector<8x128xf32>
    %124 = arith.mulf %120, %102 : vector<8x128xf32>
    %125 = arith.mulf %119, %123 : vector<8x128xf32>
    %126 = arith.addf %124, %125 : vector<8x128xf32>
    %127 = math.tanh %126 : vector<8x128xf32>
    %128 = arith.mulf %121, %127 : vector<8x128xf32>
    %c32 = arith.constant 32 : index
    %c0_46 = arith.constant 0 : index
    %129 = vector.load %arg13[%c32, %c0_46] : memref<64x128xf32, #tpu.memory_space<vmem>>, vector<8x128xf32>
    tpu.vector_store %arg13[%c32, %c0_46], %128 {strides = array<i32>} : memref<64x128xf32, #tpu.memory_space<vmem>>, vector<8x128xf32>,
    %130 = vector.extract_strided_slice %5 {offsets = [40, 0], sizes = [8, 512], strides = [1, 1]} : vector<64x512xf32> to vector<8x512xf32>
    %131 = arith.truncf %128 : vector<8x128xf32> to vector<8x128xbf16>
    %c0_47 = arith.constant 0 : index
    %c0_48 = arith.constant 0 : index
    %132 = vector.load %arg5[%c0_47, %c0_48] : memref<128x512xbf16, #tpu.memory_space<vmem>>, vector<128x512xbf16>
    %cst_49 = arith.constant dense<0.000000e+00> : vector<8x512xf32>
    %133 = tpu.matmul %131, %132, %cst_49 {dimension_numbers = #tpu.dot_dimension_numbers<[1], [0], [0], [1], [0, 0, 1, 1], [], []>} : vector<8x128xbf16>, vector<128x512xbf16>, vector<8x512xf32> -> vector<8x512xf32>
    %134 = arith.addf %130, %133 : vector<8x512xf32>
    %135 = vector.extract_strided_slice %134 {offsets = [0, 0], sizes = [8, 384], strides = [1, 1]} : vector<8x512xf32> to vector<8x384xf32>
    %cst_50 = arith.constant 5.000000e-01 : f32
    %136 = vector.broadcast %cst_50 : f32 to vector<8x384xf32>
    %137 = arith.mulf %136, %135 : vector<8x384xf32>
    %138 = math.tanh %137 : vector<8x384xf32>
    %cst_51 = arith.constant 5.000000e-01 : f32
    %139 = vector.broadcast %cst_51 : f32 to vector<8x384xf32>
    %140 = arith.mulf %139, %138 : vector<8x384xf32>
    %cst_52 = arith.constant 5.000000e-01 : f32
    %141 = vector.broadcast %cst_52 : f32 to vector<8x384xf32>
    %142 = arith.addf %140, %141 : vector<8x384xf32>
    %143 = vector.extract_strided_slice %142 {offsets = [0, 0], sizes = [8, 128], strides = [1, 1]} : vector<8x384xf32> to vector<8x128xf32>
    %144 = vector.extract_strided_slice %142 {offsets = [0, 128], sizes = [8, 128], strides = [1, 1]} : vector<8x384xf32> to vector<8x128xf32>
    %145 = vector.extract_strided_slice %142 {offsets = [0, 256], sizes = [8, 128], strides = [1, 1]} : vector<8x384xf32> to vector<8x128xf32>
    %146 = vector.extract_strided_slice %134 {offsets = [0, 384], sizes = [8, 128], strides = [1, 1]} : vector<8x512xf32> to vector<8x128xf32>
    %147 = math.tanh %146 : vector<8x128xf32>
    %148 = arith.mulf %144, %126 : vector<8x128xf32>
    %149 = arith.mulf %143, %147 : vector<8x128xf32>
    %150 = arith.addf %148, %149 : vector<8x128xf32>
    %151 = math.tanh %150 : vector<8x128xf32>
    %152 = arith.mulf %145, %151 : vector<8x128xf32>
    %c40 = arith.constant 40 : index
    %c0_53 = arith.constant 0 : index
    %153 = vector.load %arg13[%c40, %c0_53] : memref<64x128xf32, #tpu.memory_space<vmem>>, vector<8x128xf32>
    tpu.vector_store %arg13[%c40, %c0_53], %152 {strides = array<i32>} : memref<64x128xf32, #tpu.memory_space<vmem>>, vector<8x128xf32>,
    %154 = vector.extract_strided_slice %5 {offsets = [48, 0], sizes = [8, 512], strides = [1, 1]} : vector<64x512xf32> to vector<8x512xf32>
    %155 = arith.truncf %152 : vector<8x128xf32> to vector<8x128xbf16>
    %c0_54 = arith.constant 0 : index
    %c0_55 = arith.constant 0 : index
    %156 = vector.load %arg5[%c0_54, %c0_55] : memref<128x512xbf16, #tpu.memory_space<vmem>>, vector<128x512xbf16>
    %cst_56 = arith.constant dense<0.000000e+00> : vector<8x512xf32>
    %157 = tpu.matmul %155, %156, %cst_56 {dimension_numbers = #tpu.dot_dimension_numbers<[1], [0], [0], [1], [0, 0, 1, 1], [], []>} : vector<8x128xbf16>, vector<128x512xbf16>, vector<8x512xf32> -> vector<8x512xf32>
    %158 = arith.addf %154, %157 : vector<8x512xf32>
    %159 = vector.extract_strided_slice %158 {offsets = [0, 0], sizes = [8, 384], strides = [1, 1]} : vector<8x512xf32> to vector<8x384xf32>
    %cst_57 = arith.constant 5.000000e-01 : f32
    %160 = vector.broadcast %cst_57 : f32 to vector<8x384xf32>
    %161 = arith.mulf %160, %159 : vector<8x384xf32>
    %162 = math.tanh %161 : vector<8x384xf32>
    %cst_58 = arith.constant 5.000000e-01 : f32
    %163 = vector.broadcast %cst_58 : f32 to vector<8x384xf32>
    %164 = arith.mulf %163, %162 : vector<8x384xf32>
    %cst_59 = arith.constant 5.000000e-01 : f32
    %165 = vector.broadcast %cst_59 : f32 to vector<8x384xf32>
    %166 = arith.addf %164, %165 : vector<8x384xf32>
    %167 = vector.extract_strided_slice %166 {offsets = [0, 0], sizes = [8, 128], strides = [1, 1]} : vector<8x384xf32> to vector<8x128xf32>
    %168 = vector.extract_strided_slice %166 {offsets = [0, 128], sizes = [8, 128], strides = [1, 1]} : vector<8x384xf32> to vector<8x128xf32>
    %169 = vector.extract_strided_slice %166 {offsets = [0, 256], sizes = [8, 128], strides = [1, 1]} : vector<8x384xf32> to vector<8x128xf32>
    %170 = vector.extract_strided_slice %158 {offsets = [0, 384], sizes = [8, 128], strides = [1, 1]} : vector<8x512xf32> to vector<8x128xf32>
    %171 = math.tanh %170 : vector<8x128xf32>
    %172 = arith.mulf %168, %150 : vector<8x128xf32>
    %173 = arith.mulf %167, %171 : vector<8x128xf32>
    %174 = arith.addf %172, %173 : vector<8x128xf32>
    %175 = math.tanh %174 : vector<8x128xf32>
    %176 = arith.mulf %169, %175 : vector<8x128xf32>
    %c48 = arith.constant 48 : index
    %c0_60 = arith.constant 0 : index
    %177 = vector.load %arg13[%c48, %c0_60] : memref<64x128xf32, #tpu.memory_space<vmem>>, vector<8x128xf32>
    tpu.vector_store %arg13[%c48, %c0_60], %176 {strides = array<i32>} : memref<64x128xf32, #tpu.memory_space<vmem>>, vector<8x128xf32>,
    %178 = vector.extract_strided_slice %5 {offsets = [56, 0], sizes = [8, 512], strides = [1, 1]} : vector<64x512xf32> to vector<8x512xf32>
    %179 = arith.truncf %176 : vector<8x128xf32> to vector<8x128xbf16>
    %c0_61 = arith.constant 0 : index
    %c0_62 = arith.constant 0 : index
    %180 = vector.load %arg5[%c0_61, %c0_62] : memref<128x512xbf16, #tpu.memory_space<vmem>>, vector<128x512xbf16>
    %cst_63 = arith.constant dense<0.000000e+00> : vector<8x512xf32>
    %181 = tpu.matmul %179, %180, %cst_63 {dimension_numbers = #tpu.dot_dimension_numbers<[1], [0], [0], [1], [0, 0, 1, 1], [], []>} : vector<8x128xbf16>, vector<128x512xbf16>, vector<8x512xf32> -> vector<8x512xf32>
    %182 = arith.addf %178, %181 : vector<8x512xf32>
    %183 = vector.extract_strided_slice %182 {offsets = [0, 0], sizes = [8, 384], strides = [1, 1]} : vector<8x512xf32> to vector<8x384xf32>
    %cst_64 = arith.constant 5.000000e-01 : f32
    %184 = vector.broadcast %cst_64 : f32 to vector<8x384xf32>
    %185 = arith.mulf %184, %183 : vector<8x384xf32>
    %186 = math.tanh %185 : vector<8x384xf32>
    %cst_65 = arith.constant 5.000000e-01 : f32
    %187 = vector.broadcast %cst_65 : f32 to vector<8x384xf32>
    %188 = arith.mulf %187, %186 : vector<8x384xf32>
    %cst_66 = arith.constant 5.000000e-01 : f32
    %189 = vector.broadcast %cst_66 : f32 to vector<8x384xf32>
    %190 = arith.addf %188, %189 : vector<8x384xf32>
    %191 = vector.extract_strided_slice %190 {offsets = [0, 0], sizes = [8, 128], strides = [1, 1]} : vector<8x384xf32> to vector<8x128xf32>
    %192 = vector.extract_strided_slice %190 {offsets = [0, 128], sizes = [8, 128], strides = [1, 1]} : vector<8x384xf32> to vector<8x128xf32>
    %193 = vector.extract_strided_slice %190 {offsets = [0, 256], sizes = [8, 128], strides = [1, 1]} : vector<8x384xf32> to vector<8x128xf32>
    %194 = vector.extract_strided_slice %182 {offsets = [0, 384], sizes = [8, 128], strides = [1, 1]} : vector<8x512xf32> to vector<8x128xf32>
    %195 = math.tanh %194 : vector<8x128xf32>
    %196 = arith.mulf %192, %174 : vector<8x128xf32>
    %197 = arith.mulf %191, %195 : vector<8x128xf32>
    %198 = arith.addf %196, %197 : vector<8x128xf32>
    %199 = math.tanh %198 : vector<8x128xf32>
    %200 = arith.mulf %193, %199 : vector<8x128xf32>
    %c56 = arith.constant 56 : index
    %c0_67 = arith.constant 0 : index
    %201 = vector.load %arg13[%c56, %c0_67] : memref<64x128xf32, #tpu.memory_space<vmem>>, vector<8x128xf32>
    tpu.vector_store %arg13[%c56, %c0_67], %200 {strides = array<i32>} : memref<64x128xf32, #tpu.memory_space<vmem>>, vector<8x128xf32>,
    %c0_68 = arith.constant 0 : index
    %c0_69 = arith.constant 0 : index
    %202 = vector.load %arg13[%c0_68, %c0_69] : memref<64x128xf32, #tpu.memory_space<vmem>>, vector<64x128xf32>
    %203 = arith.truncf %202 : vector<64x128xf32> to vector<64x128xbf16>
    %c0_70 = arith.constant 0 : index
    %c0_71 = arith.constant 0 : index
    %204 = vector.load %arg7[%c0_70, %c0_71] : memref<128x512xbf16, #tpu.memory_space<vmem>>, vector<128x512xbf16>
    %cst_72 = arith.constant dense<0.000000e+00> : vector<64x512xf32>
    %205 = tpu.matmul %203, %204, %cst_72 {dimension_numbers = #tpu.dot_dimension_numbers<[1], [0], [0], [1], [0, 0, 1, 1], [], []>} : vector<64x128xbf16>, vector<128x512xbf16>, vector<64x512xf32> -> vector<64x512xf32>
    %c0_73 = arith.constant 0 : index
    %c0_74 = arith.constant 0 : index
    %206 = vector.load %arg9[%c0_73, %c0_74] : memref<1x512xf32, #tpu.memory_space<vmem>>, vector<1x512xf32>
    %207 = vector.broadcast %206 : vector<1x512xf32> to vector<64x512xf32>
    %208 = arith.addf %205, %207 : vector<64x512xf32>
    %c1 = arith.constant 1 : index
    %c0_75 = arith.constant 0 : index
    %c0_76 = arith.constant 0 : index
    %209 = vector.load %arg1[%c1, %c0_75, %c0_76] : memref<2x8x128xf32, #tpu.memory_space<vmem>>, vector<1x8x128xf32>
    %210 = vector.shape_cast %209 : vector<1x8x128xf32> to vector<8x128xf32>
    %c1_77 = arith.constant 1 : index
    %c0_78 = arith.constant 0 : index
    %c0_79 = arith.constant 0 : index
    %211 = vector.load %arg2[%c1_77, %c0_78, %c0_79] : memref<2x8x128xf32, #tpu.memory_space<vmem>>, vector<1x8x128xf32>
    %212 = vector.shape_cast %211 : vector<1x8x128xf32> to vector<8x128xf32>
    %213 = vector.extract_strided_slice %208 {offsets = [0, 0], sizes = [8, 512], strides = [1, 1]} : vector<64x512xf32> to vector<8x512xf32>
    %214 = arith.truncf %210 : vector<8x128xf32> to vector<8x128xbf16>
    %c0_80 = arith.constant 0 : index
    %c0_81 = arith.constant 0 : index
    %215 = vector.load %arg8[%c0_80, %c0_81] : memref<128x512xbf16, #tpu.memory_space<vmem>>, vector<128x512xbf16>
    %cst_82 = arith.constant dense<0.000000e+00> : vector<8x512xf32>
    %216 = tpu.matmul %214, %215, %cst_82 {dimension_numbers = #tpu.dot_dimension_numbers<[1], [0], [0], [1], [0, 0, 1, 1], [], []>} : vector<8x128xbf16>, vector<128x512xbf16>, vector<8x512xf32> -> vector<8x512xf32>
    %217 = arith.addf %213, %216 : vector<8x512xf32>
    %218 = vector.extract_strided_slice %217 {offsets = [0, 0], sizes = [8, 384], strides = [1, 1]} : vector<8x512xf32> to vector<8x384xf32>
    %cst_83 = arith.constant 5.000000e-01 : f32
    %219 = vector.broadcast %cst_83 : f32 to vector<8x384xf32>
    %220 = arith.mulf %219, %218 : vector<8x384xf32>
    %221 = math.tanh %220 : vector<8x384xf32>
    %cst_84 = arith.constant 5.000000e-01 : f32
    %222 = vector.broadcast %cst_84 : f32 to vector<8x384xf32>
    %223 = arith.mulf %222, %221 : vector<8x384xf32>
    %cst_85 = arith.constant 5.000000e-01 : f32
    %224 = vector.broadcast %cst_85 : f32 to vector<8x384xf32>
    %225 = arith.addf %223, %224 : vector<8x384xf32>
    %226 = vector.extract_strided_slice %225 {offsets = [0, 0], sizes = [8, 128], strides = [1, 1]} : vector<8x384xf32> to vector<8x128xf32>
    %227 = vector.extract_strided_slice %225 {offsets = [0, 128], sizes = [8, 128], strides = [1, 1]} : vector<8x384xf32> to vector<8x128xf32>
    %228 = vector.extract_strided_slice %225 {offsets = [0, 256], sizes = [8, 128], strides = [1, 1]} : vector<8x384xf32> to vector<8x128xf32>
    %229 = vector.extract_strided_slice %217 {offsets = [0, 384], sizes = [8, 128], strides = [1, 1]} : vector<8x512xf32> to vector<8x128xf32>
    %230 = math.tanh %229 : vector<8x128xf32>
    %231 = arith.mulf %227, %212 : vector<8x128xf32>
    %232 = arith.mulf %226, %230 : vector<8x128xf32>
    %233 = arith.addf %231, %232 : vector<8x128xf32>
    %234 = math.tanh %233 : vector<8x128xf32>
    %235 = arith.mulf %228, %234 : vector<8x128xf32>
    %c0_86 = arith.constant 0 : index
    %c0_87 = arith.constant 0 : index
    %236 = vector.load %arg13[%c0_86, %c0_87] : memref<64x128xf32, #tpu.memory_space<vmem>>, vector<8x128xf32>
    tpu.vector_store %arg13[%c0_86, %c0_87], %235 {strides = array<i32>} : memref<64x128xf32, #tpu.memory_space<vmem>>, vector<8x128xf32>,
    %237 = vector.extract_strided_slice %208 {offsets = [8, 0], sizes = [8, 512], strides = [1, 1]} : vector<64x512xf32> to vector<8x512xf32>
    %238 = arith.truncf %235 : vector<8x128xf32> to vector<8x128xbf16>
    %c0_88 = arith.constant 0 : index
    %c0_89 = arith.constant 0 : index
    %239 = vector.load %arg8[%c0_88, %c0_89] : memref<128x512xbf16, #tpu.memory_space<vmem>>, vector<128x512xbf16>
    %cst_90 = arith.constant dense<0.000000e+00> : vector<8x512xf32>
    %240 = tpu.matmul %238, %239, %cst_90 {dimension_numbers = #tpu.dot_dimension_numbers<[1], [0], [0], [1], [0, 0, 1, 1], [], []>} : vector<8x128xbf16>, vector<128x512xbf16>, vector<8x512xf32> -> vector<8x512xf32>
    %241 = arith.addf %237, %240 : vector<8x512xf32>
    %242 = vector.extract_strided_slice %241 {offsets = [0, 0], sizes = [8, 384], strides = [1, 1]} : vector<8x512xf32> to vector<8x384xf32>
    %cst_91 = arith.constant 5.000000e-01 : f32
    %243 = vector.broadcast %cst_91 : f32 to vector<8x384xf32>
    %244 = arith.mulf %243, %242 : vector<8x384xf32>
    %245 = math.tanh %244 : vector<8x384xf32>
    %cst_92 = arith.constant 5.000000e-01 : f32
    %246 = vector.broadcast %cst_92 : f32 to vector<8x384xf32>
    %247 = arith.mulf %246, %245 : vector<8x384xf32>
    %cst_93 = arith.constant 5.000000e-01 : f32
    %248 = vector.broadcast %cst_93 : f32 to vector<8x384xf32>
    %249 = arith.addf %247, %248 : vector<8x384xf32>
    %250 = vector.extract_strided_slice %249 {offsets = [0, 0], sizes = [8, 128], strides = [1, 1]} : vector<8x384xf32> to vector<8x128xf32>
    %251 = vector.extract_strided_slice %249 {offsets = [0, 128], sizes = [8, 128], strides = [1, 1]} : vector<8x384xf32> to vector<8x128xf32>
    %252 = vector.extract_strided_slice %249 {offsets = [0, 256], sizes = [8, 128], strides = [1, 1]} : vector<8x384xf32> to vector<8x128xf32>
    %253 = vector.extract_strided_slice %241 {offsets = [0, 384], sizes = [8, 128], strides = [1, 1]} : vector<8x512xf32> to vector<8x128xf32>
    %254 = math.tanh %253 : vector<8x128xf32>
    %255 = arith.mulf %251, %233 : vector<8x128xf32>
    %256 = arith.mulf %250, %254 : vector<8x128xf32>
    %257 = arith.addf %255, %256 : vector<8x128xf32>
    %258 = math.tanh %257 : vector<8x128xf32>
    %259 = arith.mulf %252, %258 : vector<8x128xf32>
    %c8_94 = arith.constant 8 : index
    %c0_95 = arith.constant 0 : index
    %260 = vector.load %arg13[%c8_94, %c0_95] : memref<64x128xf32, #tpu.memory_space<vmem>>, vector<8x128xf32>
    tpu.vector_store %arg13[%c8_94, %c0_95], %259 {strides = array<i32>} : memref<64x128xf32, #tpu.memory_space<vmem>>, vector<8x128xf32>,
    %261 = vector.extract_strided_slice %208 {offsets = [16, 0], sizes = [8, 512], strides = [1, 1]} : vector<64x512xf32> to vector<8x512xf32>
    %262 = arith.truncf %259 : vector<8x128xf32> to vector<8x128xbf16>
    %c0_96 = arith.constant 0 : index
    %c0_97 = arith.constant 0 : index
    %263 = vector.load %arg8[%c0_96, %c0_97] : memref<128x512xbf16, #tpu.memory_space<vmem>>, vector<128x512xbf16>
    %cst_98 = arith.constant dense<0.000000e+00> : vector<8x512xf32>
    %264 = tpu.matmul %262, %263, %cst_98 {dimension_numbers = #tpu.dot_dimension_numbers<[1], [0], [0], [1], [0, 0, 1, 1], [], []>} : vector<8x128xbf16>, vector<128x512xbf16>, vector<8x512xf32> -> vector<8x512xf32>
    %265 = arith.addf %261, %264 : vector<8x512xf32>
    %266 = vector.extract_strided_slice %265 {offsets = [0, 0], sizes = [8, 384], strides = [1, 1]} : vector<8x512xf32> to vector<8x384xf32>
    %cst_99 = arith.constant 5.000000e-01 : f32
    %267 = vector.broadcast %cst_99 : f32 to vector<8x384xf32>
    %268 = arith.mulf %267, %266 : vector<8x384xf32>
    %269 = math.tanh %268 : vector<8x384xf32>
    %cst_100 = arith.constant 5.000000e-01 : f32
    %270 = vector.broadcast %cst_100 : f32 to vector<8x384xf32>
    %271 = arith.mulf %270, %269 : vector<8x384xf32>
    %cst_101 = arith.constant 5.000000e-01 : f32
    %272 = vector.broadcast %cst_101 : f32 to vector<8x384xf32>
    %273 = arith.addf %271, %272 : vector<8x384xf32>
    %274 = vector.extract_strided_slice %273 {offsets = [0, 0], sizes = [8, 128], strides = [1, 1]} : vector<8x384xf32> to vector<8x128xf32>
    %275 = vector.extract_strided_slice %273 {offsets = [0, 128], sizes = [8, 128], strides = [1, 1]} : vector<8x384xf32> to vector<8x128xf32>
    %276 = vector.extract_strided_slice %273 {offsets = [0, 256], sizes = [8, 128], strides = [1, 1]} : vector<8x384xf32> to vector<8x128xf32>
    %277 = vector.extract_strided_slice %265 {offsets = [0, 384], sizes = [8, 128], strides = [1, 1]} : vector<8x512xf32> to vector<8x128xf32>
    %278 = math.tanh %277 : vector<8x128xf32>
    %279 = arith.mulf %275, %257 : vector<8x128xf32>
    %280 = arith.mulf %274, %278 : vector<8x128xf32>
    %281 = arith.addf %279, %280 : vector<8x128xf32>
    %282 = math.tanh %281 : vector<8x128xf32>
    %283 = arith.mulf %276, %282 : vector<8x128xf32>
    %c16_102 = arith.constant 16 : index
    %c0_103 = arith.constant 0 : index
    %284 = vector.load %arg13[%c16_102, %c0_103] : memref<64x128xf32, #tpu.memory_space<vmem>>, vector<8x128xf32>
    tpu.vector_store %arg13[%c16_102, %c0_103], %283 {strides = array<i32>} : memref<64x128xf32, #tpu.memory_space<vmem>>, vector<8x128xf32>,
    %285 = vector.extract_strided_slice %208 {offsets = [24, 0], sizes = [8, 512], strides = [1, 1]} : vector<64x512xf32> to vector<8x512xf32>
    %286 = arith.truncf %283 : vector<8x128xf32> to vector<8x128xbf16>
    %c0_104 = arith.constant 0 : index
    %c0_105 = arith.constant 0 : index
    %287 = vector.load %arg8[%c0_104, %c0_105] : memref<128x512xbf16, #tpu.memory_space<vmem>>, vector<128x512xbf16>
    %cst_106 = arith.constant dense<0.000000e+00> : vector<8x512xf32>
    %288 = tpu.matmul %286, %287, %cst_106 {dimension_numbers = #tpu.dot_dimension_numbers<[1], [0], [0], [1], [0, 0, 1, 1], [], []>} : vector<8x128xbf16>, vector<128x512xbf16>, vector<8x512xf32> -> vector<8x512xf32>
    %289 = arith.addf %285, %288 : vector<8x512xf32>
    %290 = vector.extract_strided_slice %289 {offsets = [0, 0], sizes = [8, 384], strides = [1, 1]} : vector<8x512xf32> to vector<8x384xf32>
    %cst_107 = arith.constant 5.000000e-01 : f32
    %291 = vector.broadcast %cst_107 : f32 to vector<8x384xf32>
    %292 = arith.mulf %291, %290 : vector<8x384xf32>
    %293 = math.tanh %292 : vector<8x384xf32>
    %cst_108 = arith.constant 5.000000e-01 : f32
    %294 = vector.broadcast %cst_108 : f32 to vector<8x384xf32>
    %295 = arith.mulf %294, %293 : vector<8x384xf32>
    %cst_109 = arith.constant 5.000000e-01 : f32
    %296 = vector.broadcast %cst_109 : f32 to vector<8x384xf32>
    %297 = arith.addf %295, %296 : vector<8x384xf32>
    %298 = vector.extract_strided_slice %297 {offsets = [0, 0], sizes = [8, 128], strides = [1, 1]} : vector<8x384xf32> to vector<8x128xf32>
    %299 = vector.extract_strided_slice %297 {offsets = [0, 128], sizes = [8, 128], strides = [1, 1]} : vector<8x384xf32> to vector<8x128xf32>
    %300 = vector.extract_strided_slice %297 {offsets = [0, 256], sizes = [8, 128], strides = [1, 1]} : vector<8x384xf32> to vector<8x128xf32>
    %301 = vector.extract_strided_slice %289 {offsets = [0, 384], sizes = [8, 128], strides = [1, 1]} : vector<8x512xf32> to vector<8x128xf32>
    %302 = math.tanh %301 : vector<8x128xf32>
    %303 = arith.mulf %299, %281 : vector<8x128xf32>
    %304 = arith.mulf %298, %302 : vector<8x128xf32>
    %305 = arith.addf %303, %304 : vector<8x128xf32>
    %306 = math.tanh %305 : vector<8x128xf32>
    %307 = arith.mulf %300, %306 : vector<8x128xf32>
    %c24_110 = arith.constant 24 : index
    %c0_111 = arith.constant 0 : index
    %308 = vector.load %arg13[%c24_110, %c0_111] : memref<64x128xf32, #tpu.memory_space<vmem>>, vector<8x128xf32>
    tpu.vector_store %arg13[%c24_110, %c0_111], %307 {strides = array<i32>} : memref<64x128xf32, #tpu.memory_space<vmem>>, vector<8x128xf32>,
    %309 = vector.extract_strided_slice %208 {offsets = [32, 0], sizes = [8, 512], strides = [1, 1]} : vector<64x512xf32> to vector<8x512xf32>
    %310 = arith.truncf %307 : vector<8x128xf32> to vector<8x128xbf16>
    %c0_112 = arith.constant 0 : index
    %c0_113 = arith.constant 0 : index
    %311 = vector.load %arg8[%c0_112, %c0_113] : memref<128x512xbf16, #tpu.memory_space<vmem>>, vector<128x512xbf16>
    %cst_114 = arith.constant dense<0.000000e+00> : vector<8x512xf32>
    %312 = tpu.matmul %310, %311, %cst_114 {dimension_numbers = #tpu.dot_dimension_numbers<[1], [0], [0], [1], [0, 0, 1, 1], [], []>} : vector<8x128xbf16>, vector<128x512xbf16>, vector<8x512xf32> -> vector<8x512xf32>
    %313 = arith.addf %309, %312 : vector<8x512xf32>
    %314 = vector.extract_strided_slice %313 {offsets = [0, 0], sizes = [8, 384], strides = [1, 1]} : vector<8x512xf32> to vector<8x384xf32>
    %cst_115 = arith.constant 5.000000e-01 : f32
    %315 = vector.broadcast %cst_115 : f32 to vector<8x384xf32>
    %316 = arith.mulf %315, %314 : vector<8x384xf32>
    %317 = math.tanh %316 : vector<8x384xf32>
    %cst_116 = arith.constant 5.000000e-01 : f32
    %318 = vector.broadcast %cst_116 : f32 to vector<8x384xf32>
    %319 = arith.mulf %318, %317 : vector<8x384xf32>
    %cst_117 = arith.constant 5.000000e-01 : f32
    %320 = vector.broadcast %cst_117 : f32 to vector<8x384xf32>
    %321 = arith.addf %319, %320 : vector<8x384xf32>
    %322 = vector.extract_strided_slice %321 {offsets = [0, 0], sizes = [8, 128], strides = [1, 1]} : vector<8x384xf32> to vector<8x128xf32>
    %323 = vector.extract_strided_slice %321 {offsets = [0, 128], sizes = [8, 128], strides = [1, 1]} : vector<8x384xf32> to vector<8x128xf32>
    %324 = vector.extract_strided_slice %321 {offsets = [0, 256], sizes = [8, 128], strides = [1, 1]} : vector<8x384xf32> to vector<8x128xf32>
    %325 = vector.extract_strided_slice %313 {offsets = [0, 384], sizes = [8, 128], strides = [1, 1]} : vector<8x512xf32> to vector<8x128xf32>
    %326 = math.tanh %325 : vector<8x128xf32>
    %327 = arith.mulf %323, %305 : vector<8x128xf32>
    %328 = arith.mulf %322, %326 : vector<8x128xf32>
    %329 = arith.addf %327, %328 : vector<8x128xf32>
    %330 = math.tanh %329 : vector<8x128xf32>
    %331 = arith.mulf %324, %330 : vector<8x128xf32>
    %c32_118 = arith.constant 32 : index
    %c0_119 = arith.constant 0 : index
    %332 = vector.load %arg13[%c32_118, %c0_119] : memref<64x128xf32, #tpu.memory_space<vmem>>, vector<8x128xf32>
    tpu.vector_store %arg13[%c32_118, %c0_119], %331 {strides = array<i32>} : memref<64x128xf32, #tpu.memory_space<vmem>>, vector<8x128xf32>,
    %333 = vector.extract_strided_slice %208 {offsets = [40, 0], sizes = [8, 512], strides = [1, 1]} : vector<64x512xf32> to vector<8x512xf32>
    %334 = arith.truncf %331 : vector<8x128xf32> to vector<8x128xbf16>
    %c0_120 = arith.constant 0 : index
    %c0_121 = arith.constant 0 : index
    %335 = vector.load %arg8[%c0_120, %c0_121] : memref<128x512xbf16, #tpu.memory_space<vmem>>, vector<128x512xbf16>
    %cst_122 = arith.constant dense<0.000000e+00> : vector<8x512xf32>
    %336 = tpu.matmul %334, %335, %cst_122 {dimension_numbers = #tpu.dot_dimension_numbers<[1], [0], [0], [1], [0, 0, 1, 1], [], []>} : vector<8x128xbf16>, vector<128x512xbf16>, vector<8x512xf32> -> vector<8x512xf32>
    %337 = arith.addf %333, %336 : vector<8x512xf32>
    %338 = vector.extract_strided_slice %337 {offsets = [0, 0], sizes = [8, 384], strides = [1, 1]} : vector<8x512xf32> to vector<8x384xf32>
    %cst_123 = arith.constant 5.000000e-01 : f32
    %339 = vector.broadcast %cst_123 : f32 to vector<8x384xf32>
    %340 = arith.mulf %339, %338 : vector<8x384xf32>
    %341 = math.tanh %340 : vector<8x384xf32>
    %cst_124 = arith.constant 5.000000e-01 : f32
    %342 = vector.broadcast %cst_124 : f32 to vector<8x384xf32>
    %343 = arith.mulf %342, %341 : vector<8x384xf32>
    %cst_125 = arith.constant 5.000000e-01 : f32
    %344 = vector.broadcast %cst_125 : f32 to vector<8x384xf32>
    %345 = arith.addf %343, %344 : vector<8x384xf32>
    %346 = vector.extract_strided_slice %345 {offsets = [0, 0], sizes = [8, 128], strides = [1, 1]} : vector<8x384xf32> to vector<8x128xf32>
    %347 = vector.extract_strided_slice %345 {offsets = [0, 128], sizes = [8, 128], strides = [1, 1]} : vector<8x384xf32> to vector<8x128xf32>
    %348 = vector.extract_strided_slice %345 {offsets = [0, 256], sizes = [8, 128], strides = [1, 1]} : vector<8x384xf32> to vector<8x128xf32>
    %349 = vector.extract_strided_slice %337 {offsets = [0, 384], sizes = [8, 128], strides = [1, 1]} : vector<8x512xf32> to vector<8x128xf32>
    %350 = math.tanh %349 : vector<8x128xf32>
    %351 = arith.mulf %347, %329 : vector<8x128xf32>
    %352 = arith.mulf %346, %350 : vector<8x128xf32>
    %353 = arith.addf %351, %352 : vector<8x128xf32>
    %354 = math.tanh %353 : vector<8x128xf32>
    %355 = arith.mulf %348, %354 : vector<8x128xf32>
    %c40_126 = arith.constant 40 : index
    %c0_127 = arith.constant 0 : index
    %356 = vector.load %arg13[%c40_126, %c0_127] : memref<64x128xf32, #tpu.memory_space<vmem>>, vector<8x128xf32>
    tpu.vector_store %arg13[%c40_126, %c0_127], %355 {strides = array<i32>} : memref<64x128xf32, #tpu.memory_space<vmem>>, vector<8x128xf32>,
    %357 = vector.extract_strided_slice %208 {offsets = [48, 0], sizes = [8, 512], strides = [1, 1]} : vector<64x512xf32> to vector<8x512xf32>
    %358 = arith.truncf %355 : vector<8x128xf32> to vector<8x128xbf16>
    %c0_128 = arith.constant 0 : index
    %c0_129 = arith.constant 0 : index
    %359 = vector.load %arg8[%c0_128, %c0_129] : memref<128x512xbf16, #tpu.memory_space<vmem>>, vector<128x512xbf16>
    %cst_130 = arith.constant dense<0.000000e+00> : vector<8x512xf32>
    %360 = tpu.matmul %358, %359, %cst_130 {dimension_numbers = #tpu.dot_dimension_numbers<[1], [0], [0], [1], [0, 0, 1, 1], [], []>} : vector<8x128xbf16>, vector<128x512xbf16>, vector<8x512xf32> -> vector<8x512xf32>
    %361 = arith.addf %357, %360 : vector<8x512xf32>
    %362 = vector.extract_strided_slice %361 {offsets = [0, 0], sizes = [8, 384], strides = [1, 1]} : vector<8x512xf32> to vector<8x384xf32>
    %cst_131 = arith.constant 5.000000e-01 : f32
    %363 = vector.broadcast %cst_131 : f32 to vector<8x384xf32>
    %364 = arith.mulf %363, %362 : vector<8x384xf32>
    %365 = math.tanh %364 : vector<8x384xf32>
    %cst_132 = arith.constant 5.000000e-01 : f32
    %366 = vector.broadcast %cst_132 : f32 to vector<8x384xf32>
    %367 = arith.mulf %366, %365 : vector<8x384xf32>
    %cst_133 = arith.constant 5.000000e-01 : f32
    %368 = vector.broadcast %cst_133 : f32 to vector<8x384xf32>
    %369 = arith.addf %367, %368 : vector<8x384xf32>
    %370 = vector.extract_strided_slice %369 {offsets = [0, 0], sizes = [8, 128], strides = [1, 1]} : vector<8x384xf32> to vector<8x128xf32>
    %371 = vector.extract_strided_slice %369 {offsets = [0, 128], sizes = [8, 128], strides = [1, 1]} : vector<8x384xf32> to vector<8x128xf32>
    %372 = vector.extract_strided_slice %369 {offsets = [0, 256], sizes = [8, 128], strides = [1, 1]} : vector<8x384xf32> to vector<8x128xf32>
    %373 = vector.extract_strided_slice %361 {offsets = [0, 384], sizes = [8, 128], strides = [1, 1]} : vector<8x512xf32> to vector<8x128xf32>
    %374 = math.tanh %373 : vector<8x128xf32>
    %375 = arith.mulf %371, %353 : vector<8x128xf32>
    %376 = arith.mulf %370, %374 : vector<8x128xf32>
    %377 = arith.addf %375, %376 : vector<8x128xf32>
    %378 = math.tanh %377 : vector<8x128xf32>
    %379 = arith.mulf %372, %378 : vector<8x128xf32>
    %c48_134 = arith.constant 48 : index
    %c0_135 = arith.constant 0 : index
    %380 = vector.load %arg13[%c48_134, %c0_135] : memref<64x128xf32, #tpu.memory_space<vmem>>, vector<8x128xf32>
    tpu.vector_store %arg13[%c48_134, %c0_135], %379 {strides = array<i32>} : memref<64x128xf32, #tpu.memory_space<vmem>>, vector<8x128xf32>,
    %381 = vector.extract_strided_slice %208 {offsets = [56, 0], sizes = [8, 512], strides = [1, 1]} : vector<64x512xf32> to vector<8x512xf32>
    %382 = arith.truncf %379 : vector<8x128xf32> to vector<8x128xbf16>
    %c0_136 = arith.constant 0 : index
    %c0_137 = arith.constant 0 : index
    %383 = vector.load %arg8[%c0_136, %c0_137] : memref<128x512xbf16, #tpu.memory_space<vmem>>, vector<128x512xbf16>
    %cst_138 = arith.constant dense<0.000000e+00> : vector<8x512xf32>
    %384 = tpu.matmul %382, %383, %cst_138 {dimension_numbers = #tpu.dot_dimension_numbers<[1], [0], [0], [1], [0, 0, 1, 1], [], []>} : vector<8x128xbf16>, vector<128x512xbf16>, vector<8x512xf32> -> vector<8x512xf32>
    %385 = arith.addf %381, %384 : vector<8x512xf32>
    %386 = vector.extract_strided_slice %385 {offsets = [0, 0], sizes = [8, 384], strides = [1, 1]} : vector<8x512xf32> to vector<8x384xf32>
    %cst_139 = arith.constant 5.000000e-01 : f32
    %387 = vector.broadcast %cst_139 : f32 to vector<8x384xf32>
    %388 = arith.mulf %387, %386 : vector<8x384xf32>
    %389 = math.tanh %388 : vector<8x384xf32>
    %cst_140 = arith.constant 5.000000e-01 : f32
    %390 = vector.broadcast %cst_140 : f32 to vector<8x384xf32>
    %391 = arith.mulf %390, %389 : vector<8x384xf32>
    %cst_141 = arith.constant 5.000000e-01 : f32
    %392 = vector.broadcast %cst_141 : f32 to vector<8x384xf32>
    %393 = arith.addf %391, %392 : vector<8x384xf32>
    %394 = vector.extract_strided_slice %393 {offsets = [0, 0], sizes = [8, 128], strides = [1, 1]} : vector<8x384xf32> to vector<8x128xf32>
    %395 = vector.extract_strided_slice %393 {offsets = [0, 128], sizes = [8, 128], strides = [1, 1]} : vector<8x384xf32> to vector<8x128xf32>
    %396 = vector.extract_strided_slice %393 {offsets = [0, 256], sizes = [8, 128], strides = [1, 1]} : vector<8x384xf32> to vector<8x128xf32>
    %397 = vector.extract_strided_slice %385 {offsets = [0, 384], sizes = [8, 128], strides = [1, 1]} : vector<8x512xf32> to vector<8x128xf32>
    %398 = math.tanh %397 : vector<8x128xf32>
    %399 = arith.mulf %395, %377 : vector<8x128xf32>
    %400 = arith.mulf %394, %398 : vector<8x128xf32>
    %401 = arith.addf %399, %400 : vector<8x128xf32>
    %402 = math.tanh %401 : vector<8x128xf32>
    %403 = arith.mulf %396, %402 : vector<8x128xf32>
    %c56_142 = arith.constant 56 : index
    %c0_143 = arith.constant 0 : index
    %404 = vector.load %arg13[%c56_142, %c0_143] : memref<64x128xf32, #tpu.memory_space<vmem>>, vector<8x128xf32>
    tpu.vector_store %arg13[%c56_142, %c0_143], %403 {strides = array<i32>} : memref<64x128xf32, #tpu.memory_space<vmem>>, vector<8x128xf32>,
    %c0_144 = arith.constant 0 : index
    %c0_145 = arith.constant 0 : index
    %405 = vector.load %arg13[%c0_144, %c0_145] : memref<64x128xf32, #tpu.memory_space<vmem>>, vector<64x128xf32>
    %406 = vector.shape_cast %405 : vector<64x128xf32> to vector<8x8x128xf32>
    %407 = math.tanh %406 : vector<8x8x128xf32>
    %c0_146 = arith.constant 0 : index
    %c0_147 = arith.constant 0 : index
    %408 = vector.load %arg3[%c0_146, %c0_147] : memref<8x128xf32, #tpu.memory_space<vmem>>, vector<8x128xf32>
    %409 = vector.shape_cast %408 : vector<8x128xf32> to vector<1x8x128xf32>
    %410 = vector.broadcast %409 : vector<1x8x128xf32> to vector<8x8x128xf32>
    %411 = arith.mulf %407, %410 : vector<8x8x128xf32>
    %cst_148 = arith.constant dense<0.000000e+00> : vector<8x8xf32>
    %412 = vector.multi_reduction <add>, %411, %cst_148 [2] : vector<8x8x128xf32> to vector<8x8xf32>
    %413 = vector.shape_cast %412 : vector<8x8xf32> to vector<8x8x1xf32>
    %cst_149 = arith.constant dense<0xFF800000> : vector<8x1xf32>
    %414 = vector.multi_reduction <maximumf>, %413, %cst_149 [0] : vector<8x8x1xf32> to vector<8x1xf32>
    %415 = vector.shape_cast %414 : vector<8x1xf32> to vector<1x8x1xf32>
    %416 = vector.broadcast %415 : vector<1x8x1xf32> to vector<8x8x1xf32>
    %417 = arith.subf %413, %416 : vector<8x8x1xf32>
    %418 = math.exp %417 : vector<8x8x1xf32>
    %cst_150 = arith.constant dense<0.000000e+00> : vector<8x1xf32>
    %419 = vector.multi_reduction <add>, %418, %cst_150 [0] : vector<8x8x1xf32> to vector<8x1xf32>
    %420 = vector.shape_cast %419 : vector<8x1xf32> to vector<1x8x1xf32>
    %421 = tpu.reciprocal %420 {approx = true} : vector<1x8x1xf32> -> vector<1x8x1xf32>
    %422 = vector.broadcast %421 : vector<1x8x1xf32> to vector<8x8x1xf32>
    %423 = arith.mulf %418, %422 : vector<8x8x1xf32>
    %424 = vector.broadcast %423 : vector<8x8x1xf32> to vector<8x8x128xf32>
    %425 = arith.mulf %406, %424 : vector<8x8x128xf32>
    %cst_151 = arith.constant dense<0.000000e+00> : vector<8x128xf32>
    %426 = vector.multi_reduction <add>, %425, %cst_151 [0] : vector<8x8x128xf32> to vector<8x128xf32>
    %427 = arith.truncf %426 : vector<8x128xf32> to vector<8x128xbf16>
    %c0_152 = arith.constant 0 : index
    %c0_153 = arith.constant 0 : index
    %428 = vector.load %arg10[%c0_152, %c0_153] : memref<128x8xbf16, #tpu.memory_space<vmem>>, vector<128x8xbf16>
    %cst_154 = arith.constant dense<0.000000e+00> : vector<8x8xf32>
    %429 = tpu.matmul %427, %428, %cst_154 {dimension_numbers = #tpu.dot_dimension_numbers<[1], [0], [0], [1], [0, 0, 1, 1], [], []>} : vector<8x128xbf16>, vector<128x8xbf16>, vector<8x8xf32> -> vector<8x8xf32>
    %c0_155 = arith.constant 0 : index
    %c0_156 = arith.constant 0 : index
    %430 = vector.load %arg11[%c0_155, %c0_156] : memref<1x8xf32, #tpu.memory_space<vmem>>, vector<1x8xf32>
    %431 = vector.broadcast %430 : vector<1x8xf32> to vector<8x8xf32>
    %432 = arith.addf %429, %431 : vector<8x8xf32>
    %c0_157 = arith.constant 0 : index
    %c0_158 = arith.constant 0 : index
    %433 = vector.load %arg12[%c0_157, %c0_158] : memref<8x8xf32, #tpu.memory_space<vmem>>, vector<8x8xf32>
    tpu.vector_store %arg12[%c0_157, %c0_158], %432 {strides = array<i32>} : memref<8x8xf32, #tpu.memory_space<vmem>>, vector<8x8xf32>,
    return
  }
}

</mosaic_0001>

<bundles_post_ra>
// kernel: lstm_model_forward.1
= control target key start
LH: loop header
LB: loop body
LE: loop exit
PB: predicated region body
PF: predicated region fallthrough
CT: control target
= control target key end

     0   :  { %17 = vsyncpa [#allocation4], 0  ;;  %s8815_s0 = inlined_call_operand.vmem [shape: bf16[64,16], index: 0, kind: input, shape index: {}]   ;;  %s8816_s1 = inlined_call_operand.vmem [shape: f32[2,8,128], index: 1, kind: input, shape index: {}]   ;;  %s8817_s2 = inlined_call_operand.vmem [shape: f32[2,8,128], index: 2, kind: input, shape index: {}]   ;;  %s8818_s3 = inlined_call_operand.vmem [shape: f32[8,128], index: 3, kind: input, shape index: {}]   ;;  %s8819_s4 = inlined_call_operand.vmem [shape: bf16[16,512], index: 4, kind: input, shape index: {}]   ;;  %s8820_s5 = inlined_call_operand.hbm [shape: bf16[128,512], index: 5, kind: input, shape index: {}]   ;;  %s8821_s6 = inlined_call_operand.vmem [shape: f32[1,512], index: 6, kind: input, shape index: {}]   ;;  %s8822_s7 = inlined_call_operand.hbm [shape: bf16[128,512], index: 7, kind: input, shape index: {}]   ;;  %s8823_s8 = inlined_call_operand.hbm [shape: bf16[128,512], index: 8, kind: input, shape index: {}]   ;;  %s8824_s9 = inlined_call_operand.vmem [shape: f32[1,512], index: 9, kind: input, shape index: {}]   ;;  %s8825_s10 = inlined_call_operand.vmem [shape: bf16[128,8], index: 10, kind: input, shape index: {}]   ;;  %s8826_s11 = inlined_call_operand.vmem [shape: f32[1,8], index: 11, kind: input, shape index: {}]   ;;  %s8827_s12 = inlined_call_operand.vmem [shape: f32[8,8], index: 12, kind: output, shape index: {}]  }
   0x1   :  { %18 = vsyncpa [#allocation6], 0  ;;  %s48_s23 = sshll.u32 %s8822_s7, 4  ;;  %s8194_s24 = smov [#allocation5]   ;;  %s49_s23 = int_to_ptr.hbm [resolvable:$true] %s48_s23 }
   0x2   :  { %s50_s25 = sshll.u32 %s8194_s24, 4  ;;  %s33_s28 = sshll.u32 %s8820_s5, 4  ;;  %s51_s25 = int_to_ptr.vmem [resolvable:$true] %s50_s25  ;;  %s34_s28 = int_to_ptr.hbm [resolvable:$true] %s33_s28 }
   0x3   :  { %s8195_s29 = smov 256   ;;  %s8196_s30 = smov 16  }
   0x4   :  { %56 = dma.hbm_to_vmem [thread:$0]  %s49_s23, 4096, %s51_s25, [#allocation6], %s8195_s29, %s8195_s29, %s8196_s30  }
   0x5   :  { %s8197_s13 = smov [#allocation3]   ;;  %s61_s17 = sshll.u32 %s8823_s8, 4  ;;  %s62_s17 = int_to_ptr.hbm [resolvable:$true] %s61_s17 }
   0x6   :  { %s35_s14 = sshll.u32 %s8197_s13, 4  ;;  %s8198_s7 = smov [#allocation7]   ;;  %s36_s14 = int_to_ptr.vmem [resolvable:$true] %s35_s14 }
   0x7   :  { %41 = dma.hbm_to_vmem [thread:$0]  %s34_s28, 4096, %s36_s14, [#allocation4], %s8195_s29, %s8195_s29, %s8196_s30  }
   0x8   :  { %s63_s18 = sshll.u32 %s8198_s7, 4  ;;  %s64_s18 = int_to_ptr.vmem [resolvable:$true] %s63_s18 }
   0x9   :  { %69 = dma.hbm_to_vmem [thread:$0]  %s62_s17, 4096, %s64_s18, [#allocation6], %s8195_s29, %s8195_s29, %s8196_s30  }
   0xa   :  { %8190 = dma.done.wait [#allocation4], 4096  }
   0xb   :  { %8191 = vsyncadd [#allocation4], 4294963200 }
   0xc   :  { %8192 = dma.done.wait [#allocation6], 8192  }
   0xd   :  { %8193 = vsyncadd [#allocation6], 4294959104  ;;  %v5115_v0 = vld [vmem:[%s8819_s4] sm:$0xf]  ;;  %v7361_v1 = vld [vmem:[%s8819_s4 + $0xc] sm:$0xf0] }
   0xe   :  { %v5123_v2 = vld [vmem:[%s8819_s4 + $0x8] sm:$0xf]  ;;  %v5116_v3 = vor.u32 %v7361_v1, %v5115_v0  ;;  %v7362_v4 = vld [vmem:[%s8819_s4 + $0x14] sm:$0xf0]  ;;  %v7360_v5 = vld [vmem:[%s8819_s4 + $0xc] sm:$0xf] }
   0xf   :  { %v5125_v6 = vld [vmem:[%s8819_s4 + $0x18] sm:$0xf0]  ;;  %v5124_v7 = vor.u32 %v7362_v4, %v5123_v2  ;;  %v8294_v9 = vld [vmem:[%s8815_s0] sm:$0xff]  ;;  %vm151_vm0 = vcmask 130048   ;;  %v5117_v12 = vld [vmem:[%s8819_s4 + $0x10] sm:$0xf0] }
  0x10   :  { %v5128_v8 = vor.u32 %v7360_v5, %v5125_v6  ;;  %v8299_v10 = vld [vmem:[%s8815_s0 + $0x18] sm:$0xff]  ;;  %v7359_v11 = vld [vmem:[%s8819_s4 + $0x4] sm:$0xf]  ;;  %171 = vmatpush.bf16.msra.mxu0 %v5116_v3  ;;  %7915 = vmatpush.bf16.msra.mxu1 %v5116_v3  ;;  %v5261_v15 = vld [vmem:[#allocation3 + $0xf0] sm:$0xf0]  ;;  %vm5089_vm1 = vcmask 64512  }
  0x11   :  { %v7391_v13 = vld [vmem:[#allocation3 + $0xe4] sm:$0xf]  ;;  %229 = vmatpush.bf16.msra.mxu2 %v5124_v7  ;;  %v5120_v14 = vor.u32 %v7359_v11, %v5117_v12  ;;  %v7392_v16 = vld [vmem:[#allocation3 + $0xec] sm:$0xf]  ;;  %v5269_v17 = vld [vmem:[#allocation3 + $0xf8] sm:$0xf0] }
  0x12   :  { %258 = vmatpush.bf16.msra.mxu3 %v5128_v8  ;;  %v5264_v18 = vor.u32 %v7391_v13, %v5261_v15  ;;  %v5272_v19 = vor.u32 %v7392_v16, %v5269_v17  ;;  %v5259_v20 = vld [vmem:[#allocation3 + $0xe0] sm:$0xf]  ;;  %v7393_v21 = vld [vmem:[#allocation3 + $0xec] sm:$0xf0]  ;;  %v5267_v25 = vld [vmem:[#allocation3 + $0xe8] sm:$0xf] }
  0x13   :  { %v5243_v22 = vld [vmem:[#allocation3 + $0xc0] sm:$0xf]  ;;  %5129 = vmatmul.msk.bf16.vlgmr.msra.gmra.mxu0 %vm151_vm0, %v8294_v9  ;;  %5132 = vmatmul.msk.bf16.vlgmr.msra.gmra.mxu1 %vm151_vm0, %v8299_v10  ;;  %v5260_v23 = vor.u32 %v7393_v21, %v5259_v20  ;;  %v7389_v24 = vld [vmem:[#allocation3 + $0xcc] sm:$0xf0]  ;;  %v7394_v26 = vld [vmem:[#allocation3 + $0xf4] sm:$0xf0] }
  0x14   :  { %200 = vmatpush.bf16.msrb.mxu1 %v5120_v14  ;;  %5137 = vmatmul.msk.bf16.vlgmr.msra.gmra.mxu2 %vm151_vm0, %v8294_v9  ;;  %v5268_v27 = vor.u32 %v7394_v26, %v5267_v25  ;;  %v7387_v28 = vld [vmem:[#allocation3 + $0xc4] sm:$0xf]  ;;  %v5245_v29 = vld [vmem:[#allocation3 + $0xd0] sm:$0xf0]  ;;  %v7388_v30 = vld [vmem:[#allocation3 + $0xcc] sm:$0xf]  ;;  %v5244_v33 = vor.u32 %v7389_v24, %v5243_v22 }
  0x15   :  { %5141 = vmatmul.msk.bf16.vlgmr.msra.gmra.mxu3 %vm151_vm0, %v8294_v9  ;;  %v5248_v31 = vor.u32 %v7387_v28, %v5245_v29  ;;  %v5253_v32 = vld [vmem:[#allocation3 + $0xd8] sm:$0xf0]  ;;  %475 = vmatpush.bf16.msrb.mxu0 %v5260_v23  ;;  %v5227_v35 = vld [vmem:[#allocation3 + $0xa0] sm:$0xf]  ;;  %v5251_v36 = vld [vmem:[#allocation3 + $0xc8] sm:$0xf] }
  0x16   :  { %514 = vmatpush.bf16.msrb.mxu3 %v5272_v19  ;;  %v5256_v34 = vor.u32 %v7388_v30, %v5253_v32  ;;  %501 = vmatpush.bf16.msrb.mxu2 %v5268_v27  ;;  %v7385_v37 = vld [vmem:[#allocation3 + $0xac] sm:$0xf0]  ;;  %v7390_v38 = vld [vmem:[#allocation3 + $0xd4] sm:$0xf0]  ;;  %v7383_v39 = vld [vmem:[#allocation3 + $0xa4] sm:$0xf] }
  0x17   :  { %v5252_v40 = vor.u32 %v7390_v38, %v5251_v36  ;;  %v5229_v41 = vld [vmem:[#allocation3 + $0xb0] sm:$0xf0]  ;;  %v7384_v42 = vld [vmem:[#allocation3 + $0xac] sm:$0xf]  ;;  %v5237_v43 = vld [vmem:[#allocation3 + $0xb8] sm:$0xf0]  ;;  %v5228_v46 = vor.u32 %v7385_v37, %v5227_v35 }
  0x18   :  { %488 = vmatpush.bf16.msra.mxu1 %v5264_v18  ;;  %v5211_v44 = vld [vmem:[#allocation3 + $0x80] sm:$0xf]  ;;  %v5232_v45 = vor.u32 %v7383_v39, %v5229_v41  ;;  %v7381_v47 = vld [vmem:[#allocation3 + $0x8c] sm:$0xf0]  ;;  %v5240_v48 = vor.u32 %v7384_v42, %v5237_v43  ;;  %v5235_v49 = vld [vmem:[#allocation3 + $0xa8] sm:$0xf] }
  0x19   :  { %476 = vmatpush.bf16.msrb.mxu0 %v5244_v33  ;;  %v7386_v50 = vld [vmem:[#allocation3 + $0xb4] sm:$0xf0]  ;;  %v7379_v52 = vld [vmem:[#allocation3 + $0x84] sm:$0xf]  ;;  %v5213_v53 = vld [vmem:[#allocation3 + $0x90] sm:$0xf0]  ;;  %v5212_v57 = vor.u32 %v7381_v47, %v5211_v44 }
  0x1a   :  { %515 = vmatpush.bf16.msrb.mxu3 %v5256_v34  ;;  %502 = vmatpush.bf16.msrb.mxu2 %v5252_v40  ;;  %v5236_v51 = vor.u32 %v7386_v50, %v5235_v49  ;;  %v7380_v54 = vld [vmem:[#allocation3 + $0x8c] sm:$0xf]  ;;  %v5221_v55 = vld [vmem:[#allocation3 + $0x98] sm:$0xf0]  ;;  %v5216_v56 = vor.u32 %v7379_v52, %v5213_v53  ;;  %v5219_v59 = vld [vmem:[#allocation3 + $0x88] sm:$0xf] }
  0x1b   :  { %v5224_v58 = vor.u32 %v7380_v54, %v5221_v55  ;;  %v7382_v60 = vld [vmem:[#allocation3 + $0x94] sm:$0xf0]  ;;  %v8318_v61 = vld [vmem:[%s8815_s0 + $0x8] sm:$0xff]  ;;  %v5195_v62 = vld [vmem:[#allocation3 + $0x60] sm:$0xf] }
  0x1c   :  { %489 = vmatpush.bf16.msra.mxu1 %v5248_v31  ;;  %v7377_v63 = vld [vmem:[#allocation3 + $0x6c] sm:$0xf0]  ;;  %v5220_v0 = vor.u32 %v7382_v60, %v5219_v59  ;;  %v5179_v2 = vld [vmem:[#allocation3 + $0x40] sm:$0xf]  ;;  %v7376_v4 = vld [vmem:[#allocation3 + $0x6c] sm:$0xf] }
  0x1d   :  { %477 = vmatpush.bf16.msrb.mxu0 %v5228_v46  ;;  %v5196_v1 = vor.u32 %v7377_v63, %v5195_v62  ;;  %v7373_v3 = vld [vmem:[#allocation3 + $0x4c] sm:$0xf0]  ;;  %v5205_v5 = vld [vmem:[#allocation3 + $0x78] sm:$0xf0]  ;;  %v5203_v6 = vld [vmem:[#allocation3 + $0x68] sm:$0xf] }
  0x1e   :  { %516 = vmatpush.bf16.msrb.mxu3 %v5240_v48  ;;  %503 = vmatpush.bf16.msrb.mxu2 %v5236_v51  ;;  %v5208_v7 = vor.u32 %v7376_v4, %v5205_v5  ;;  %v7378_v8 = vld [vmem:[#allocation3 + $0x74] sm:$0xf0]  ;;  %v5163_v11 = vld [vmem:[#allocation3 + $0x20] sm:$0xf]  ;;  %v7375_v12 = vld [vmem:[#allocation3 + $0x64] sm:$0xf]  ;;  %v5180_v16 = vor.u32 %v7373_v3, %v5179_v2 }
  0x1f   :  { %v5197_v13 = vld [vmem:[#allocation3 + $0x70] sm:$0xf0]  ;;  %v5204_v14 = vor.u32 %v7378_v8, %v5203_v6  ;;  %v5187_v15 = vld [vmem:[#allocation3 + $0x48] sm:$0xf]  ;;  %v7374_v17 = vld [vmem:[#allocation3 + $0x54] sm:$0xf0] }
  0x20   :  { %490 = vmatpush.bf16.msra.mxu1 %v5232_v45  ;;  %v7372_v18 = vld [vmem:[#allocation3 + $0x4c] sm:$0xf]  ;;  %v5189_v19 = vld [vmem:[#allocation3 + $0x58] sm:$0xf0]  ;;  %v7369_v20 = vld [vmem:[#allocation3 + $0x2c] sm:$0xf0]  ;;  %v5188_v27 = vor.u32 %v7374_v17, %v5187_v15 }
  0x21   :  { %478 = vmatpush.bf16.msrb.mxu0 %v5212_v57  ;;  %v5192_v21 = vor.u32 %v7372_v18, %v5189_v19  ;;  %v7371_v22 = vld [vmem:[#allocation3 + $0x44] sm:$0xf]  ;;  %v5181_v23 = vld [vmem:[#allocation3 + $0x50] sm:$0xf0]  ;;  %v7368_v25 = vld [vmem:[#allocation3 + $0x2c] sm:$0xf]  ;;  %v5164_v28 = vor.u32 %v7369_v20, %v5163_v11 }
  0x22   :  { %517 = vmatpush.bf16.msrb.mxu3 %v5224_v58  ;;  %504 = vmatpush.bf16.msrb.mxu2 %v5220_v0  ;;  %v5184_v24 = vor.u32 %v7371_v22, %v5181_v23  ;;  %v5173_v26 = vld [vmem:[#allocation3 + $0x38] sm:$0xf0]  ;;  %v5147_v29 = vld [vmem:[#allocation3] sm:$0xf]  ;;  %v5171_v30 = vld [vmem:[#allocation3 + $0x28] sm:$0xf] }
  0x23   :  { %5130 = vmatmul.msk.bf16.gmra.mxu0 %vm151_vm0, %v8318_v61  ;;  %5133 = vmatmul.msk.bf16.vlgmr.msrb.gmra.mxu1 %vm151_vm0, %v8294_v9  ;;  %v5200_v9 = vor.u32 %v7375_v12, %v5197_v13  ;;  %v7370_v31 = vld [vmem:[#allocation3 + $0x34] sm:$0xf0]  ;;  %v5176_v32 = vor.u32 %v7368_v25, %v5173_v26  ;;  %v7365_v33 = vld [vmem:[#allocation3 + $0xc] sm:$0xf0]  ;;  %v7364_v34 = vld [vmem:[#allocation3 + $0xc] sm:$0xf] }
  0x24   :  { %491 = vmatpush.bf16.msra.mxu1 %v5216_v56  ;;  %5138 = vmatmul.msk.bf16.gmra.mxu2 %vm151_vm0, %v8318_v61  ;;  %v5157_v35 = vld [vmem:[#allocation3 + $0x18] sm:$0xf0]  ;;  %v5172_v36 = vor.u32 %v7370_v31, %v5171_v30  ;;  %v5148_v37 = vor.u32 %v7365_v33, %v5147_v29  ;;  %v5155_v38 = vld [vmem:[#allocation3 + $0x8] sm:$0xf]  ;;  %v7366_v39 = vld [vmem:[#allocation3 + $0x14] sm:$0xf0] }
  0x25   :  { %5142 = vmatmul.msk.bf16.gmra.mxu3 %vm151_vm0, %v8318_v61  ;;  %479 = vmatpush.bf16.msrb.mxu0 %v5196_v1  ;;  %v5160_v40 = vor.u32 %v7364_v34, %v5157_v35  ;;  %v7357_v41 = vld [vmem:[%s8815_s0 + $0x10] sm:$0xff]  ;;  %v5156_v42 = vor.u32 %v7366_v39, %v5155_v38  ;;  %v7367_v43 = vld [vmem:[#allocation3 + $0x24] sm:$0xf]  ;;  %v101_v51 = vld [vmem:[%s8821_s6] sm:$0xf] }
  0x26   :  { %518 = vmatpush.bf16.msrb.mxu3 %v5208_v7  ;;  %505 = vmatpush.bf16.msrb.mxu2 %v5204_v14  ;;  %v5165_v44 = vld [vmem:[#allocation3 + $0x30] sm:$0xf0]  ;;  %v7363_v46 = vld [vmem:[#allocation3 + $0x4] sm:$0xf]  ;;  %v8349_v52 = vperm.slane %v101_v51, 0  ;;  %v8373_v0 = vperm.slane %v101_v51, 2 }
  0x27   :  { %v5168_v45 = vor.u32 %v7367_v43, %v5165_v44  ;;  %v5149_v47 = vld [vmem:[#allocation3 + $0x10] sm:$0xf0]  ;;  %v280_v49 = vld [vmem:[%s8816_s1] sm:$0xff]  ;;  %v8375_v1 = vperm.slane %v101_v51, 3  ;;  %v8389_v11 = vperm.slane %v101_v51, 1 }
  0x28   :  { %492 = vmatpush.bf16.msra.mxu1 %v5200_v9  ;;  %v5152_v48 = vor.u32 %v7363_v46, %v5149_v47  ;;  %v282_v50 = vpack.c.bf16 %v280_v49, %v280_v49  ;;  %v5387_v23 = vld [vmem:[#allocation3 + $0xe0] sm:$0xf]  ;;  %v7423_v25 = vld [vmem:[#allocation3 + $0xe4] sm:$0xf]  ;;  %v5389_v29 = vld [vmem:[#allocation3 + $0xf0] sm:$0xf0] }
  0x29   :  { %480 = vmatpush.bf16.msrb.mxu0 %v5180_v16  ;;  %v5395_v30 = vld [vmem:[#allocation3 + $0xe8] sm:$0xf]  ;;  %v7426_v31 = vld [vmem:[#allocation3 + $0xf4] sm:$0xf0]  ;;  %v5392_v33 = vor.u32 %v7423_v25, %v5389_v29  ;;  %v7424_v35 = vld [vmem:[#allocation3 + $0xec] sm:$0xf] }
  0x2a   :  { %519 = vmatpush.bf16.msrb.mxu3 %v5192_v21  ;;  %506 = vmatpush.bf16.msrb.mxu2 %v5188_v27  ;;  %v5396_v34 = vor.u32 %v7426_v31, %v5395_v30  ;;  %v5371_v39 = vld [vmem:[#allocation3 + $0xc0] sm:$0xf]  ;;  %v5373_v43 = vld [vmem:[#allocation3 + $0xd0] sm:$0xf0]  ;;  %v5379_v44 = vld [vmem:[#allocation3 + $0xc8] sm:$0xf] }
  0x2b   :  { %v7422_v46 = vld [vmem:[#allocation3 + $0xd4] sm:$0xf0]  ;;  %v7420_v47 = vld [vmem:[#allocation3 + $0xcc] sm:$0xf]  ;;  %v5381_v49 = vld [vmem:[#allocation3 + $0xd8] sm:$0xf0] }
  0x2c   :  { %493 = vmatpush.bf16.msra.mxu1 %v5184_v24  ;;  %v7425_v24 = vld [vmem:[#allocation3 + $0xec] sm:$0xf0]  ;;  %v5384_v51 = vor.u32 %v7420_v47, %v5381_v49  ;;  %v7418_v25 = vld [vmem:[#allocation3 + $0xb4] sm:$0xf0]  ;;  %v5323_v49 = vld [vmem:[#allocation3 + $0x60] sm:$0xf] }
  0x2d   :  { %481 = vmatpush.bf16.msrb.mxu0 %v5164_v28  ;;  %v5388_v28 = vor.u32 %v7425_v24, %v5387_v23  ;;  %v5357_v23 = vld [vmem:[#allocation3 + $0xb0] sm:$0xf0]  ;;  %v5363_v24 = vld [vmem:[#allocation3 + $0xa8] sm:$0xf] }
  0x2e   :  { %520 = vmatpush.bf16.msrb.mxu3 %v5176_v32  ;;  %507 = vmatpush.bf16.msrb.mxu2 %v5172_v36  ;;  %v5397_v36 = vld [vmem:[#allocation3 + $0xf8] sm:$0xf0]  ;;  %v5364_v31 = vor.u32 %v7418_v25, %v5363_v24  ;;  %v7408_v24 = vld [vmem:[#allocation3 + $0x6c] sm:$0xf] }
  0x2f   :  { %v5400_v38 = vor.u32 %v7424_v35, %v5397_v36  ;;  %v5339_v35 = vld [vmem:[#allocation3 + $0x80] sm:$0xf]  ;;  %v7413_v36 = vld [vmem:[#allocation3 + $0x8c] sm:$0xf0]  ;;  %v5333_v25 = vld [vmem:[#allocation3 + $0x78] sm:$0xf0] }
  0x30   :  { %494 = vmatpush.bf16.msra.mxu1 %v5168_v45 }
  0x31   :  { %482 = vmatpush.bf16.msrb.mxu0 %v5148_v37 }
  0x32   :  { %521 = vmatpush.bf16.msrb.mxu3 %v5160_v40  ;;  %508 = vmatpush.bf16.msrb.mxu2 %v5156_v42  ;;  %v7421_v40 = vld [vmem:[#allocation3 + $0xcc] sm:$0xf0]  ;;  %v7419_v42 = vld [vmem:[#allocation3 + $0xc4] sm:$0xf] }
  0x33   :  { %5131 = vmatmul.msk.bf16.gmra.mxu0 %vm151_vm0, %v7357_v41  ;;  %5134 = vmatmul.msk.bf16.gmra.mxu1 %vm151_vm0, %v8318_v61  ;;  %v5376_v45 = vor.u32 %v7419_v42, %v5373_v43  ;;  %v7414_v43 = vld [vmem:[#allocation3 + $0x94] sm:$0xf0] }
  0x34   :  { %5139 = vmatmul.msk.bf16.gmra.mxu2 %vm151_vm0, %v7357_v41  ;;  %495 = vmatpush.bf16.msra.mxu1 %v5152_v48  ;;  %v5380_v48 = vor.u32 %v7422_v46, %v5379_v44  ;;  %v7412_v44 = vld [vmem:[#allocation3 + $0x8c] sm:$0xf] }
  0x35   :  { %5143 = vmatmul.msk.bf16.gmra.mxu3 %vm151_vm0, %v7357_v41  ;;  %743 = vmatpush.bf16.msra.mxu0 %v5388_v28 }
  0x36   :  { %769 = vmatpush.bf16.msra.mxu2 %v5396_v34  ;;  %782 = vmatpush.bf16.msra.mxu3 %v5400_v38  ;;  %v7411_v38 = vld [vmem:[#allocation3 + $0x84] sm:$0xf] }
  0x38   :  { %756 = vmatpush.bf16.msrb.mxu1 %v5392_v33 }
  0x3a   :  { %770 = vmatpush.bf16.msra.mxu2 %v5380_v48  ;;  %783 = vmatpush.bf16.msra.mxu3 %v5384_v51  ;;  %v7407_v51 = vld [vmem:[#allocation3 + $0x64] sm:$0xf] }
  0x3c   :  { %757 = vmatpush.bf16.msrb.mxu1 %v5376_v45  ;;  %v5349_v45 = vld [vmem:[#allocation3 + $0x98] sm:$0xf0] }
  0x3d   :  { %v5352_v48 = vor.u32 %v7412_v44, %v5349_v45  ;;  %v7401_v45 = vld [vmem:[#allocation3 + $0x2c] sm:$0xf0] }
  0x3e   :  { %771 = vmatpush.bf16.msra.mxu2 %v5364_v31  ;;  %v5336_v31 = vor.u32 %v7408_v24, %v5333_v25  ;;  %v7397_v24 = vld [vmem:[#allocation3 + $0xc] sm:$0xf0] }
  0x43   :  { %5135 = vmatmul.msk.bf16.gmra.mxu1 %vm151_vm0, %v7357_v41  ;;  %483 = vmatmul.bf16.vlgmr.msrb.gmra.mxu0 %v282_v50  ;;  %v5372_v41 = vor.u32 %v7421_v40, %v5371_v39  ;;  %v5340_v39 = vor.u32 %v7413_v36, %v5339_v35  ;;  %v5341_v40 = vld [vmem:[#allocation3 + $0x90] sm:$0xf0]  ;;  %v5315_v36 = vld [vmem:[#allocation3 + $0x48] sm:$0xf] }
  0x44   :  { %5140 = vmatmul.msk.bf16.gmra.mxu2 %vm151_vm0, %v8299_v10  ;;  %v5344_v42 = vor.u32 %v7411_v38, %v5341_v40  ;;  %v5309_v35 = vld [vmem:[#allocation3 + $0x50] sm:$0xf0]  ;;  %v7406_v38 = vld [vmem:[#allocation3 + $0x54] sm:$0xf0] }
  0x45   :  { %5144 = vmatmul.msk.bf16.gmra.mxu3 %vm151_vm0, %v8299_v10  ;;  %744 = vmatpush.bf16.msra.mxu0 %v5372_v41  ;;  %v5347_v41 = vld [vmem:[#allocation3 + $0x88] sm:$0xf]  ;;  %v5316_v40 = vor.u32 %v7406_v38, %v5315_v36  ;;  %v7398_v36 = vld [vmem:[#allocation3 + $0x14] sm:$0xf0]  ;;  %v7396_v38 = vld [vmem:[#allocation3 + $0xc] sm:$0xf] }
  0x46   :  { %v5348_v47 = vor.u32 %v7414_v43, %v5347_v41  ;;  %v7404_v41 = vld [vmem:[#allocation3 + $0x4c] sm:$0xf]  ;;  %v5291_v43 = vld [vmem:[#allocation3 + $0x20] sm:$0xf] }
  0x48   :  { %772 = vmatpush.bf16.msra.mxu2 %v5348_v47  ;;  %v7399_v47 = vld [vmem:[#allocation3 + $0x24] sm:$0xf] }
  0x53   :  { %5136 = vmatmul.msk.bf16.gmra.mxu1 %vm151_vm0, %v8299_v10 }
  0x54   :  { %509 = vmatmul.bf16.vlgmr.msrb.gmra.mxu2 %v282_v50 }
  0x55   :  { %522 = vmatmul.bf16.vlgmr.msrb.gmra.mxu3 %v282_v50 }
  0x63   :  { %496 = vmatmul.bf16.vlgmr.msra.gmra.mxu1 %v282_v50 }
  0x90   :  { %v8351_v53 = vpop.f32.mrf.mxu0  ;;  %v188_v54 = vpop.f32.mrf.mxu1 }
  0x91   :  { %v8354_v55 = vadd.f32 %v188_v54, %v8349_v52  ;;  %v5355_v54 = vld [vmem:[#allocation3 + $0xa0] sm:$0xf] }
  0x97   :  { %v8356_v56 = vpop.f32.mrf.mxu2 }
  0x98   :  { %v8358_v57 = vpop.f32.mrf.mxu3  ;;  %v8360_v10 = vpop.f32.mrf.mxu0 }
  0x99   :  { %v8362_v58 = vpop.f32.mrf.mxu1 }
  0x9f   :  { %v8364_v59 = vpop.f32.mrf.mxu2 }
  0xa0   :  { %v8366_v60 = vpop.f32.mrf.mxu3  ;;  %v178_v61 = vpop.f32.mrf.mxu0 }
  0xa1   :  { %v8369_v62 = vadd.f32 %v178_v61, %v8349_v52  ;;  %v8371_v63 = vpop.f32.mrf.mxu1  ;;  %v7417_v61 = vld [vmem:[#allocation3 + $0xac] sm:$0xf0] }
  0xa7   :  { %v236_v2 = vpop.f32.mrf.mxu2 }
  0xa8   :  { %v8378_v3 = vadd.f32 %v236_v2, %v8373_v0  ;;  %v265_v4 = vpop.f32.mrf.mxu3  ;;  %v8380_v5 = vpop.f32.mrf.mxu0  ;;  %v7415_v2 = vld [vmem:[#allocation3 + $0xa4] sm:$0xf] }
  0xa9   :  { %v8383_v6 = vadd.f32 %v265_v4, %v8375_v1  ;;  %v8385_v7 = vpop.f32.mrf.mxu1  ;;  %v174_v4 = vadd.f32 %v8351_v53, %v8349_v52  ;;  %v5360_v30 = vor.u32 %v7415_v2, %v5357_v23  ;;  %v5365_v53 = vld [vmem:[#allocation3 + $0xb8] sm:$0xf0]  ;;  %v5325_v2 = vld [vmem:[#allocation3 + $0x70] sm:$0xf0] }
  0xab   :  { %758 = vmatpush.bf16.msrb.mxu1 %v5360_v30 }
  0xaf   :  { %v8387_v8 = vpop.f32.mrf.mxu2  ;;  %759 = vmatpush.bf16.msrb.mxu1 %v5344_v42  ;;  %v5317_v42 = vld [vmem:[#allocation3 + $0x58] sm:$0xf0] }
  0xb0   :  { %v8391_v12 = vpop.f32.mrf.mxu3  ;;  %v183_v13 = vpop.f32.mrf.mxu0  ;;  %v5320_v44 = vor.u32 %v7404_v41, %v5317_v42 }
  0xb1   :  { %v8394_v14 = vadd.f32 %v183_v13, %v8349_v52  ;;  %v207_v15 = vpop.f32.mrf.mxu1 }
  0xb2   :  { %v8397_v16 = vadd.f32 %v207_v15, %v8389_v11 }
  0xb7   :  { %v241_v9 = vpop.f32.mrf.mxu2 }
  0xb8   :  { %v8400_v17 = vadd.f32 %v241_v9, %v8373_v0  ;;  %v270_v18 = vpop.f32.mrf.mxu3  ;;  %v8402_v19 = vpop.f32.mrf.mxu0 }
  0xb9   :  { %v8405_v20 = vadd.f32 %v270_v18, %v8375_v1  ;;  %v8407_v21 = vpop.f32.mrf.mxu1  ;;  %v5356_v18 = vor.u32 %v7417_v61, %v5355_v54 }
  0xbb   :  { %745 = vmatpush.bf16.msra.mxu0 %v5356_v18  ;;  %v5328_v18 = vor.u32 %v7407_v51, %v5325_v2  ;;  %v7402_v2 = vld [vmem:[#allocation3 + $0x34] sm:$0xf0] }
  0xbd   :  { %760 = vmatpush.bf16.msrb.mxu1 %v5328_v18  ;;  %v5301_v18 = vld [vmem:[#allocation3 + $0x38] sm:$0xf0] }
  0xbf   :  { %v8409_v22 = vpop.f32.mrf.mxu2  ;;  %746 = vmatpush.bf16.msra.mxu0 %v5340_v39 }
  0xc0   :  { %v8411_v26 = vpop.f32.mrf.mxu3  ;;  %v484_v27 = vpop.f32.mrf.mxu0 }
  0xc1   :  { %v212_v32 = vpop.f32.mrf.mxu1  ;;  %v527_v33 = vadd.f32 %v484_v27, %v174_v4  ;;  %v5331_v4 = vld [vmem:[#allocation3 + $0x68] sm:$0xf] }
  0xc2   :  { %v8414_v37 = vadd.f32 %v212_v32, %v8389_v11  ;;  %v7416_v32 = vld [vmem:[#allocation3 + $0xac] sm:$0xf] }
  0xc3   :  { %v5368_v34 = vor.u32 %v7416_v32, %v5365_v53  ;;  %v531_v46 = vmul.f32 0.5, %v527_v33  ;;  %v5307_v32 = vld [vmem:[#allocation3 + $0x40] sm:$0xf]  ;;  %v7405_v53 = vld [vmem:[#allocation3 + $0x4c] sm:$0xf0] }
  0xc4   :  { %v7403_v33 = vld [vmem:[#allocation3 + $0x44] sm:$0xf] }
  0xc5   :  { %784 = vmatpush.bf16.msra.mxu3 %v5368_v34  ;;  %7922 = vtanh.f32 %v531_v46  ;;  %v5308_v34 = vor.u32 %v7405_v53, %v5307_v32  ;;  %v5312_v39 = vor.u32 %v7403_v33, %v5309_v35  ;;  %v5293_v46 = vld [vmem:[#allocation3 + $0x30] sm:$0xf0] }
  0xc6   :  { %v5296_v51 = vor.u32 %v7399_v47, %v5293_v46  ;;  %v5277_v33 = vld [vmem:[#allocation3 + $0x10] sm:$0xf0] }
  0xc7   :  { %v246_v50 = vpop.f32.mrf.mxu2  ;;  %761 = vmatpush.bf16.msrb.mxu1 %v5312_v39 }
  0xc8   :  { %v8419_v13 = vadd.f32 %v246_v50, %v8373_v0  ;;  %v275_v15 = vpop.f32.mrf.mxu3  ;;  %v486_v9 = vpop.f32.mrf.mxu0  ;;  %v7409_v50 = vld [vmem:[#allocation3 + $0x6c] sm:$0xf0] }
  0xc9   :  { %v8422_v28 = vadd.f32 %v275_v15, %v8375_v1  ;;  %v8424_v29 = vpop.f32.mrf.mxu1  ;;  %v5324_v61 = vor.u32 %v7409_v50, %v5323_v49  ;;  %v7410_v15 = vld [vmem:[#allocation3 + $0x74] sm:$0xf0]  ;;  %785 = vmatpush.bf16.msra.mxu3 %v5352_v48  ;;  %v261_v48 = vadd.f32 %v8358_v57, %v8375_v1  ;;  %v5292_v50 = vor.u32 %v7401_v45, %v5291_v43  ;;  %v7395_v57 = vld [vmem:[#allocation3 + $0x4] sm:$0xf] }
  0xca   :  { %v5332_v23 = vor.u32 %v7410_v15, %v5331_v4  ;;  %v7400_v4 = vld [vmem:[#allocation3 + $0x2c] sm:$0xf]  ;;  %v5280_v39 = vor.u32 %v7395_v57, %v5277_v33 }
  0xcb   :  { %747 = vmatpush.bf16.msra.mxu0 %v5324_v61  ;;  %v5299_v61 = vld [vmem:[#allocation3 + $0x28] sm:$0xf]  ;;  %v7923_v25 = vpop.eup %7922  ;;  %v5304_v53 = vor.u32 %v7400_v4, %v5301_v18  ;;  %762 = vmatpush.bf16.msrb.mxu1 %v5296_v51 }
  0xcc   :  { %773 = vmatpush.bf16.msra.mxu2 %v5332_v23  ;;  %v5275_v23 = vld [vmem:[#allocation3] sm:$0xf]  ;;  %v537_v41 = vmul.f32 0.5, %v7923_v25 }
  0xcd   :  { %786 = vmatpush.bf16.msra.mxu3 %v5336_v31  ;;  %v5276_v35 = vor.u32 %v7397_v24, %v5275_v23 }
  0xce   :  { %v540_v47 = vadd.f32 0.5, %v537_v41  ;;  %v5517_v41 = vld [vmem:[#allocation3 + $0xf0] sm:$0xf0] }
  0xcf   :  { %v8426_v27 = vpop.f32.mrf.mxu2  ;;  %748 = vmatpush.bf16.msra.mxu0 %v5308_v34  ;;  %v5283_v34 = vld [vmem:[#allocation3 + $0x8] sm:$0xf]  ;;  %763 = vmatpush.bf16.msrb.mxu1 %v5280_v39  ;;  %v7455_v39 = vld [vmem:[#allocation3 + $0xe4] sm:$0xf] }
  0xd0   :  { %v8428_v54 = vpop.f32.mrf.mxu3  ;;  %774 = vmatpush.bf16.msra.mxu2 %v5316_v40  ;;  %v5285_v40 = vld [vmem:[#allocation3 + $0x18] sm:$0xf0]  ;;  %v5284_v42 = vor.u32 %v7398_v36, %v5283_v34  ;;  %v5515_v36 = vld [vmem:[#allocation3 + $0xe0] sm:$0xf] }
  0xd1   :  { %v217_v9 = vpop.f32.mrf.mxu1  ;;  %787 = vmatpush.bf16.msra.mxu3 %v5320_v44  ;;  %v5288_v43 = vor.u32 %v7396_v38, %v5285_v40  ;;  %v203_v44 = vadd.f32 %v8371_v63, %v8389_v11  ;;  %v281_v63 = vld [vmem:[%s8817_s2] sm:$0xff]  ;;  %v7457_v38 = vld [vmem:[#allocation3 + $0xec] sm:$0xf0] }
  0xd2   :  { %v8431_v30 = vadd.f32 %v217_v9, %v8389_v11  ;;  %v5300_v9 = vor.u32 %v7402_v2, %v5299_v61  ;;  %v232_v2 = vadd.f32 %v8356_v56, %v8373_v0  ;;  %v5516_v40 = vor.u32 %v7457_v38, %v5515_v36  ;;  %v7450_v36 = vld [vmem:[#allocation3 + $0xb4] sm:$0xf0] }
  0xd3   :  { %749 = vmatpush.bf16.msra.mxu0 %v5292_v50 }
  0xd4   :  { %775 = vmatpush.bf16.msra.mxu2 %v5300_v9 }
  0xd5   :  { %788 = vmatpush.bf16.msra.mxu3 %v5304_v53 }
  0xd7   :  { %v510_v49 = vpop.f32.mrf.mxu2  ;;  %750 = vmatpush.bf16.msra.mxu0 %v5276_v35 }
  0xd8   :  { %v523_v15 = vpop.f32.mrf.mxu3  ;;  %776 = vmatpush.bf16.msra.mxu2 %v5284_v42  ;;  %v5523_v42 = vld [vmem:[#allocation3 + $0xe8] sm:$0xf] }
  0xd9   :  { %v530_v31 = vadd.f32 %v523_v15, %v261_v48  ;;  %v8435_v32 = vpop.f32.mrf.mxu1  ;;  %789 = vmatpush.bf16.msra.mxu3 %v5288_v43  ;;  %v529_v15 = vadd.f32 %v510_v49, %v232_v2  ;;  %v7458_v43 = vld [vmem:[#allocation3 + $0xf4] sm:$0xf0] }
  0xdb   :  { %7924 = vtanh.f32 %v530_v31  ;;  %v533_v9 = vmul.f32 0.5, %v529_v15  ;;  %1011 = vmatpush.bf16.msrb.mxu0 %v5516_v40  ;;  %v5507_v15 = vld [vmem:[#allocation3 + $0xc8] sm:$0xf]  ;;  %v7448_v40 = vld [vmem:[#allocation3 + $0xac] sm:$0xf] }
  0xdf   :  { %v512_v45 = vpop.f32.mrf.mxu2 }
  0xe0   :  { %v525_v46 = vpop.f32.mrf.mxu3  ;;  %v5520_v45 = vor.u32 %v7455_v39, %v5517_v41  ;;  %v5493_v41 = vld [vmem:[#allocation3 + $0xb8] sm:$0xf0] }
  0xe1   :  { %v7925_v48 = vpop.eup %7924  ;;  %v497_v50 = vpop.f32.mrf.mxu1  ;;  %v5525_v46 = vld [vmem:[#allocation3 + $0xf8] sm:$0xf0] }
  0xe2   :  { %v545_v51 = vmul.f32 %v7925_v48, %v540_v47  ;;  %v528_v61 = vadd.f32 %v497_v50, %v203_v44  ;;  %v5524_v44 = vor.u32 %v7458_v43, %v5523_v42  ;;  %v7456_v47 = vld [vmem:[#allocation3 + $0xec] sm:$0xf]  ;;  %1024 = vmatpush.bf16.msra.mxu1 %v5520_v45  ;;  %v5499_v50 = vld [vmem:[#allocation3 + $0xc0] sm:$0xf]  ;;  %v5496_v42 = vor.u32 %v7448_v40, %v5493_v41  ;;  %v7445_v45 = vld [vmem:[#allocation3 + $0x8c] sm:$0xf0] }
  0xe3   :  { %v5528_v48 = vor.u32 %v7456_v47, %v5525_v46  ;;  %v5467_v43 = vld [vmem:[#allocation3 + $0x80] sm:$0xf]  ;;  %v5469_v46 = vld [vmem:[#allocation3 + $0x90] sm:$0xf0] }
  0xe4   :  { %v532_v4 = vmul.f32 0.5, %v528_v61  ;;  %1037 = vmatpush.bf16.msrb.mxu2 %v5524_v44  ;;  %v7451_v61 = vld [vmem:[#allocation3 + $0xc4] sm:$0xf]  ;;  %v5468_v47 = vor.u32 %v7445_v45, %v5467_v43  ;;  %v5437_v41 = vld [vmem:[#allocation3 + $0x50] sm:$0xf0] }
  0xe5   :  { %1050 = vmatpush.bf16.msrb.mxu3 %v5528_v48  ;;  %v7443_v44 = vld [vmem:[#allocation3 + $0x84] sm:$0xf]  ;;  %v5475_v48 = vld [vmem:[#allocation3 + $0x88] sm:$0xf]  ;;  %v7438_v43 = vld [vmem:[#allocation3 + $0x54] sm:$0xf0] }
  0xe6   :  { %7926 = vtanh.f32 %v532_v4  ;;  %v5501_v4 = vld [vmem:[#allocation3 + $0xd0] sm:$0xf0] }
  0xe7   :  { %7928 = vtanh.f32 %v533_v9  ;;  %v7454_v9 = vld [vmem:[#allocation3 + $0xd4] sm:$0xf0] }
  0xe9   :  { %v499_v18 = vpop.f32.mrf.mxu1 }
  0xea   :  { %v5504_v18 = vor.u32 %v7451_v61, %v5501_v4  ;;  %v5477_v4 = vld [vmem:[#allocation3 + $0x98] sm:$0xf0] }
  0xec   :  { %v7927_v23 = vpop.eup %7926  ;;  %1025 = vmatpush.bf16.msra.mxu1 %v5504_v18  ;;  %v7441_v18 = vld [vmem:[#allocation3 + $0x6c] sm:$0xf0] }
  0xed   :  { %v538_v24 = vmul.f32 0.5, %v7927_v23  ;;  %v7929_v53 = vpop.eup %7928  ;;  %v5508_v23 = vor.u32 %v7454_v9, %v5507_v15  ;;  %v5451_v9 = vld [vmem:[#allocation3 + $0x60] sm:$0xf] }
  0xee   :  { %v539_v56 = vmul.f32 0.5, %v7929_v53  ;;  %v7449_v53 = vld [vmem:[#allocation3 + $0xac] sm:$0xf0] }
  0xef   :  { %v541_v25 = vadd.f32 0.5, %v538_v24  ;;  %v7452_v24 = vld [vmem:[#allocation3 + $0xcc] sm:$0xf]  ;;  %1038 = vmatpush.bf16.msrb.mxu2 %v5508_v23  ;;  %v7439_v23 = vld [vmem:[#allocation3 + $0x64] sm:$0xf] }
  0xf0   :  { %v542_v33 = vadd.f32 0.5, %v539_v56  ;;  %v7447_v56 = vld [vmem:[#allocation3 + $0xa4] sm:$0xf] }
  0xf1   :  { %v544_v31 = vmul.f32 %v541_v25, %v281_v63  ;;  %v5509_v63 = vld [vmem:[#allocation3 + $0xd8] sm:$0xf0] }
  0xf2   :  { %v5512_v25 = vor.u32 %v7452_v24, %v5509_v63  ;;  %v5452_v24 = vor.u32 %v7441_v18, %v5451_v9  ;;  %v5453_v63 = vld [vmem:[#allocation3 + $0x70] sm:$0xf0]  ;;  %v7434_v9 = vld [vmem:[#allocation3 + $0x34] sm:$0xf0] }
  0xf3   :  { %v8444_v57 = vadd.f32 %v545_v51, %v544_v31  ;;  %v7453_v51 = vld [vmem:[#allocation3 + $0xcc] sm:$0xf0]  ;;  %v5483_v31 = vld [vmem:[#allocation3 + $0xa0] sm:$0xf] }
  0xf4   :  { %v5500_v2 = vor.u32 %v7453_v51, %v5499_v50  ;;  %1051 = vmatpush.bf16.msrb.mxu3 %v5512_v25  ;;  %v7446_v50 = vld [vmem:[#allocation3 + $0x94] sm:$0xf0]  ;;  %v5472_v51 = vor.u32 %v7443_v44, %v5469_v46  ;;  %v5459_v25 = vld [vmem:[#allocation3 + $0x68] sm:$0xf]  ;;  %v5445_v46 = vld [vmem:[#allocation3 + $0x58] sm:$0xf0] }
  0xf5   :  { %7930 = vtanh.f32 %v8444_v57  ;;  %v5476_v61 = vor.u32 %v7446_v50, %v5475_v48  ;;  %v5419_v50 = vld [vmem:[#allocation3 + $0x20] sm:$0xf] }
  0xf6   :  { %1012 = vmatpush.bf16.msrb.mxu0 %v5500_v2  ;;  %v7444_v2 = vld [vmem:[#allocation3 + $0x8c] sm:$0xf] }
  0xf7   :  { %v5480_v15 = vor.u32 %v7444_v2, %v5477_v4  ;;  %v5421_v4 = vld [vmem:[#allocation3 + $0x30] sm:$0xf0] }
  0xf8   :  { %1052 = vmatpush.bf16.msrb.mxu3 %v5496_v42  ;;  %v5443_v42 = vld [vmem:[#allocation3 + $0x48] sm:$0xf] }
  0xf9   :  { %v5444_v44 = vor.u32 %v7438_v43, %v5443_v42  ;;  %v176_v43 = vadd.f32 %v8360_v10, %v8349_v52 }
  0xfb   :  { %v7931_v49 = vpop.eup %7930 }
  0xfc   :  { %v8447_v34 = vmul.f32 %v7931_v49, %v542_v33  ;;  %v5484_v33 = vor.u32 %v7449_v53, %v5483_v31  ;;  %v5485_v49 = vld [vmem:[#allocation3 + $0xb0] sm:$0xf0]  ;;  %1053 = vmatpush.bf16.msrb.mxu3 %v5480_v15  ;;  %v7442_v31 = vld [vmem:[#allocation3 + $0x74] sm:$0xf0]  ;;  %v5456_v53 = vor.u32 %v7439_v23, %v5453_v63  ;;  %v5427_v15 = vld [vmem:[#allocation3 + $0x28] sm:$0xf] }
  0xfd   :  { %v5488_v38 = vor.u32 %v7447_v56, %v5485_v49  ;;  %v5460_v56 = vor.u32 %v7442_v31, %v5459_v25  ;;  %v5461_v49 = vld [vmem:[#allocation3 + $0x78] sm:$0xf0]  ;;  %v5428_v23 = vor.u32 %v7434_v9, %v5427_v15  ;;  %v5403_v25 = vld [vmem:[#allocation3] sm:$0xf] }
  0xfe   :  { %v550_v35 = vpack.c.bf16 %v8447_v34, %v8447_v34  ;;  %1013 = vmatpush.bf16.msrb.mxu0 %v5484_v33  ;;  %v7440_v33 = vld [vmem:[#allocation3 + $0x6c] sm:$0xf]  ;;  %v5429_v63 = vld [vmem:[#allocation3 + $0x38] sm:$0xf0] }
  0xff   :  { %1026 = vmatpush.bf16.msra.mxu1 %v5488_v38  ;;  %v7437_v38 = vld [vmem:[#allocation3 + $0x4c] sm:$0xf0] }
 0x100   :  { %751 = vmatmul.bf16.vlgmr.msra.gmra.mxu0 %v550_v35  ;;  %764 = vmatmul.bf16.vlgmr.msrb.gmra.mxu1 %v550_v35 }
 0x101   :  { %777 = vmatmul.bf16.vlgmr.msra.gmra.mxu2 %v550_v35  ;;  %790 = vmatmul.bf16.vlgmr.msra.gmra.mxu3 %v550_v35  ;;  %v5491_v35 = vld [vmem:[#allocation3 + $0xa8] sm:$0xf] }
 0x102   :  { %v5492_v39 = vor.u32 %v7450_v36, %v5491_v35  ;;  %1014 = vmatpush.bf16.msrb.mxu0 %v5468_v47  ;;  %v5464_v35 = vor.u32 %v7440_v33, %v5461_v49  ;;  %v5435_v36 = vld [vmem:[#allocation3 + $0x40] sm:$0xf]  ;;  %v7436_v47 = vld [vmem:[#allocation3 + $0x4c] sm:$0xf]  ;;  %v5405_v33 = vld [vmem:[#allocation3 + $0x10] sm:$0xf0] }
 0x103   :  { %1027 = vmatpush.bf16.msra.mxu1 %v5472_v51  ;;  %v5436_v40 = vor.u32 %v7437_v38, %v5435_v36  ;;  %v5448_v48 = vor.u32 %v7436_v47, %v5445_v46  ;;  %v7433_v51 = vld [vmem:[#allocation3 + $0x2c] sm:$0xf0]  ;;  %v7430_v36 = vld [vmem:[#allocation3 + $0x14] sm:$0xf0]  ;;  %v7428_v38 = vld [vmem:[#allocation3 + $0xc] sm:$0xf] }
 0x104   :  { %1039 = vmatpush.bf16.msrb.mxu2 %v5492_v39  ;;  %v7435_v39 = vld [vmem:[#allocation3 + $0x44] sm:$0xf]  ;;  %1054 = vmatpush.bf16.msrb.mxu3 %v5464_v35  ;;  %v5420_v2 = vor.u32 %v7433_v51, %v5419_v50  ;;  %v5411_v35 = vld [vmem:[#allocation3 + $0x8] sm:$0xf] }
 0x105   :  { %v5440_v45 = vor.u32 %v7435_v39, %v5437_v41  ;;  %v5413_v41 = vld [vmem:[#allocation3 + $0x18] sm:$0xf0] }
 0x106   :  { %1015 = vmatpush.bf16.msrb.mxu0 %v5452_v24  ;;  %v7432_v24 = vld [vmem:[#allocation3 + $0x2c] sm:$0xf]  ;;  %v5416_v42 = vor.u32 %v7428_v38, %v5413_v41 }
 0x107   :  { %1028 = vmatpush.bf16.msra.mxu1 %v5456_v53  ;;  %v5432_v31 = vor.u32 %v7432_v24, %v5429_v63  ;;  %v7429_v53 = vld [vmem:[#allocation3 + $0xc] sm:$0xf0] }
 0x108   :  { %1040 = vmatpush.bf16.msrb.mxu2 %v5476_v61  ;;  %v7431_v61 = vld [vmem:[#allocation3 + $0x24] sm:$0xf]  ;;  %1055 = vmatpush.bf16.msrb.mxu3 %v5448_v48  ;;  %v5404_v49 = vor.u32 %v7429_v53, %v5403_v25 }
 0x109   :  { %v5424_v18 = vor.u32 %v7431_v61, %v5421_v4  ;;  %v234_v61 = vadd.f32 %v8364_v59, %v8373_v0 }
 0x10a   :  { %1016 = vmatpush.bf16.msrb.mxu0 %v5436_v40  ;;  %v5412_v40 = vor.u32 %v7430_v36, %v5411_v35 }
 0x10b   :  { %1029 = vmatpush.bf16.msra.mxu1 %v5440_v45  ;;  %v205_v45 = vadd.f32 %v8385_v7, %v8389_v11 }
 0x10c   :  { %1041 = vmatpush.bf16.msrb.mxu2 %v5460_v56  ;;  %v7427_v56 = vld [vmem:[#allocation3 + $0x4] sm:$0xf]  ;;  %1056 = vmatpush.bf16.msrb.mxu3 %v5432_v31 }
 0x10d   :  { %v5408_v39 = vor.u32 %v7427_v56, %v5405_v33 }
 0x10e   :  { %1017 = vmatpush.bf16.msrb.mxu0 %v5420_v2  ;;  %v263_v2 = vadd.f32 %v8366_v60, %v8375_v1 }
 0x10f   :  { %1030 = vmatpush.bf16.msra.mxu1 %v5424_v18 }
 0x110   :  { %1042 = vmatpush.bf16.msrb.mxu2 %v5444_v44  ;;  %1057 = vmatpush.bf16.msrb.mxu3 %v5416_v42 }
 0x112   :  { %1018 = vmatpush.bf16.msrb.mxu0 %v5404_v49 }
 0x113   :  { %1031 = vmatpush.bf16.msra.mxu1 %v5408_v39 }
 0x114   :  { %1043 = vmatpush.bf16.msrb.mxu2 %v5428_v23 }
 0x118   :  { %1044 = vmatpush.bf16.msrb.mxu2 %v5412_v40 }
 0x17d   :  { %v752_v44 = vpop.f32.mrf.mxu0  ;;  %v765_v47 = vpop.f32.mrf.mxu1 }
 0x17e   :  { %v795_v46 = vadd.f32 %v752_v44, %v176_v43  ;;  %v796_v48 = vadd.f32 %v765_v47, %v205_v45  ;;  %v5643_v45 = vld [vmem:[#allocation3 + $0xe0] sm:$0xf]  ;;  %v7487_v44 = vld [vmem:[#allocation3 + $0xe4] sm:$0xf] }
 0x180   :  { %v799_v50 = vmul.f32 0.5, %v795_v46  ;;  %v800_v51 = vmul.f32 0.5, %v796_v48  ;;  %v5645_v46 = vld [vmem:[#allocation3 + $0xf0] sm:$0xf0]  ;;  %v5651_v48 = vld [vmem:[#allocation3 + $0xe8] sm:$0xf] }
 0x182   :  { %7932 = vtanh.f32 %v799_v50  ;;  %v7490_v50 = vld [vmem:[#allocation3 + $0xf4] sm:$0xf0] }
 0x183   :  { %7934 = vtanh.f32 %v800_v51  ;;  %v5648_v51 = vor.u32 %v7487_v44, %v5645_v46  ;;  %v7477_v46 = vld [vmem:[#allocation3 + $0x8c] sm:$0xf0] }
 0x184   :  { %v778_v4 = vpop.f32.mrf.mxu2  ;;  %v791_v10 = vpop.f32.mrf.mxu3 }
 0x185   :  { %v797_v15 = vadd.f32 %v778_v4, %v234_v61  ;;  %v798_v9 = vadd.f32 %v791_v10, %v263_v2  ;;  %v754_v7 = vpop.f32.mrf.mxu0  ;;  %v767_v18 = vpop.f32.mrf.mxu1  ;;  %v5652_v61 = vor.u32 %v7490_v50, %v5651_v48  ;;  %v7488_v2 = vld [vmem:[#allocation3 + $0xec] sm:$0xf]  ;;  %v5653_v4 = vld [vmem:[#allocation3 + $0xf8] sm:$0xf0]  ;;  %1292 = vmatpush.bf16.msrb.mxu1 %v5648_v51  ;;  %v7475_v48 = vld [vmem:[#allocation3 + $0x84] sm:$0xf] }
 0x186   :  { %v5656_v10 = vor.u32 %v7488_v2, %v5653_v4  ;;  %v7483_v7 = vld [vmem:[#allocation3 + $0xc4] sm:$0xf]  ;;  %v5597_v51 = vld [vmem:[#allocation3 + $0x90] sm:$0xf0]  ;;  %v7478_v2 = vld [vmem:[#allocation3 + $0x94] sm:$0xf0] }
 0x187   :  { %v801_v23 = vmul.f32 0.5, %v797_v15  ;;  %7936 = vtanh.f32 %v798_v9  ;;  %1305 = vmatpush.bf16.msra.mxu2 %v5652_v61  ;;  %v5627_v15 = vld [vmem:[#allocation3 + $0xc0] sm:$0xf]  ;;  %v7485_v9 = vld [vmem:[#allocation3 + $0xcc] sm:$0xf0]  ;;  %v5600_v4 = vor.u32 %v7475_v48, %v5597_v51 }
 0x188   :  { %v7933_v24 = vpop.eup %7932  ;;  %1318 = vmatpush.bf16.msra.mxu3 %v5656_v10  ;;  %v5628_v18 = vor.u32 %v7485_v9, %v5627_v15  ;;  %v5603_v61 = vld [vmem:[#allocation3 + $0x88] sm:$0xf]  ;;  %v7476_v15 = vld [vmem:[#allocation3 + $0x8c] sm:$0xf]  ;;  %v5605_v9 = vld [vmem:[#allocation3 + $0x98] sm:$0xf0] }
 0x189   :  { %v7935_v63 = vpop.eup %7934  ;;  %v805_v25 = vmul.f32 0.5, %v7933_v24  ;;  %7938 = vtanh.f32 %v801_v23  ;;  %v5629_v23 = vld [vmem:[#allocation3 + $0xd0] sm:$0xf0]  ;;  %v5635_v24 = vld [vmem:[#allocation3 + $0xc8] sm:$0xf]  ;;  %v5604_v10 = vor.u32 %v7478_v2, %v5603_v61 }
 0x18a   :  { %v806_v31 = vmul.f32 0.5, %v7935_v63  ;;  %v7486_v63 = vld [vmem:[#allocation3 + $0xd4] sm:$0xf0]  ;;  %v7465_v51 = vld [vmem:[#allocation3 + $0x2c] sm:$0xf0] }
 0x18b   :  { %v808_v53 = vadd.f32 0.5, %v805_v25  ;;  %v5632_v25 = vor.u32 %v7483_v7, %v5629_v23  ;;  %v5608_v7 = vor.u32 %v7476_v15, %v5605_v9  ;;  %v7473_v23 = vld [vmem:[#allocation3 + $0x6c] sm:$0xf0]  ;;  %v7463_v61 = vld [vmem:[#allocation3 + $0x24] sm:$0xf] }
 0x18c   :  { %v809_v56 = vadd.f32 0.5, %v806_v31  ;;  %v780_v59 = vpop.f32.mrf.mxu2  ;;  %v793_v33 = vpop.f32.mrf.mxu3  ;;  %v5636_v31 = vor.u32 %v7486_v63, %v5635_v24  ;;  %v7471_v24 = vld [vmem:[#allocation3 + $0x64] sm:$0xf]  ;;  %v7466_v15 = vld [vmem:[#allocation3 + $0x34] sm:$0xf0] }
 0x18d   :  { %v7937_v49 = vpop.eup %7936  ;;  %1293 = vmatpush.bf16.msrb.mxu1 %v5632_v25  ;;  %v5611_v33 = vld [vmem:[#allocation3 + $0xa0] sm:$0xf]  ;;  %v5581_v25 = vld [vmem:[#allocation3 + $0x70] sm:$0xf0] }
 0x18e   :  { %v812_v60 = vmul.f32 %v809_v56, %v8444_v57  ;;  %v813_v35 = vmul.f32 %v7937_v49, %v808_v53  ;;  %v7489_v57 = vld [vmem:[#allocation3 + $0xec] sm:$0xf0]  ;;  %v7484_v53 = vld [vmem:[#allocation3 + $0xcc] sm:$0xf]  ;;  %v5637_v56 = vld [vmem:[#allocation3 + $0xd8] sm:$0xf0]  ;;  %1306 = vmatpush.bf16.msra.mxu2 %v5636_v31 }
 0x18f   :  { %v7939_v36 = vpop.eup %7938  ;;  %v5644_v47 = vor.u32 %v7489_v57, %v5643_v45  ;;  %v5640_v59 = vor.u32 %v7484_v53, %v5637_v56  ;;  %v7481_v49 = vld [vmem:[#allocation3 + $0xac] sm:$0xf0]  ;;  %v7480_v45 = vld [vmem:[#allocation3 + $0xac] sm:$0xf]  ;;  %v5621_v57 = vld [vmem:[#allocation3 + $0xb8] sm:$0xf0]  ;;  %v5584_v56 = vor.u32 %v7471_v24, %v5581_v25 }
 0x190   :  { %v8460_v38 = vadd.f32 %v813_v35, %v812_v60  ;;  %v807_v39 = vmul.f32 0.5, %v7939_v36  ;;  %v7479_v60 = vld [vmem:[#allocation3 + $0xa4] sm:$0xf]  ;;  %v5612_v35 = vor.u32 %v7481_v49, %v5611_v33  ;;  %v5613_v36 = vld [vmem:[#allocation3 + $0xb0] sm:$0xf0]  ;;  %v5624_v44 = vor.u32 %v7480_v45, %v5621_v57 }
 0x191   :  { %1279 = vmatpush.bf16.msra.mxu0 %v5644_v47  ;;  %1319 = vmatpush.bf16.msra.mxu3 %v5640_v59  ;;  %v5595_v47 = vld [vmem:[#allocation3 + $0x80] sm:$0xf]  ;;  %v5587_v31 = vld [vmem:[#allocation3 + $0x68] sm:$0xf]  ;;  %v7474_v53 = vld [vmem:[#allocation3 + $0x74] sm:$0xf0] }
 0x192   :  { %7940 = vtanh.f32 %v8460_v38  ;;  %v810_v40 = vadd.f32 0.5, %v807_v39  ;;  %v5619_v39 = vld [vmem:[#allocation3 + $0xa8] sm:$0xf]  ;;  %v5596_v50 = vor.u32 %v7477_v46, %v5595_v47  ;;  %v5588_v59 = vor.u32 %v7474_v53, %v5587_v31  ;;  %v7472_v33 = vld [vmem:[#allocation3 + $0x6c] sm:$0xf] }
 0x193   :  { %v5589_v49 = vld [vmem:[#allocation3 + $0x78] sm:$0xf0]  ;;  %v7470_v45 = vld [vmem:[#allocation3 + $0x54] sm:$0xf0]  ;;  %v7468_v47 = vld [vmem:[#allocation3 + $0x4c] sm:$0xf] }
 0x194   :  { %v5573_v46 = vld [vmem:[#allocation3 + $0x58] sm:$0xf0]  ;;  %v5531_v24 = vld [vmem:[#allocation3] sm:$0xf]  ;;  %v7461_v25 = vld [vmem:[#allocation3 + $0xc] sm:$0xf0] }
 0x195   :  { %1280 = vmatpush.bf16.msra.mxu0 %v5628_v18  ;;  %1320 = vmatpush.bf16.msra.mxu3 %v5624_v44  ;;  %v5579_v18 = vld [vmem:[#allocation3 + $0x60] sm:$0xf]  ;;  %v5576_v48 = vor.u32 %v7468_v47, %v5573_v46  ;;  %v7459_v31 = vld [vmem:[#allocation3 + $0x4] sm:$0xf]  ;;  %v5533_v53 = vld [vmem:[#allocation3 + $0x10] sm:$0xf0] }
 0x196   :  { %v5580_v63 = vor.u32 %v7473_v23, %v5579_v18  ;;  %v7464_v18 = vld [vmem:[#allocation3 + $0x2c] sm:$0xf]  ;;  %v5557_v23 = vld [vmem:[#allocation3 + $0x38] sm:$0xf0] }
 0x198   :  { %v7941_v41 = vpop.eup %7940 }
 0x199   :  { %v8463_v42 = vmul.f32 %v7941_v41, %v810_v40  ;;  %v7482_v40 = vld [vmem:[#allocation3 + $0xb4] sm:$0xf0]  ;;  %v5616_v41 = vor.u32 %v7479_v60, %v5613_v36  ;;  %1281 = vmatpush.bf16.msra.mxu0 %v5612_v35  ;;  %1321 = vmatpush.bf16.msra.mxu3 %v5608_v7  ;;  %v5592_v60 = vor.u32 %v7472_v33, %v5589_v49  ;;  %v5563_v35 = vld [vmem:[#allocation3 + $0x40] sm:$0xf]  ;;  %v7469_v36 = vld [vmem:[#allocation3 + $0x4c] sm:$0xf0] }
 0x19a   :  { %v7462_v33 = vld [vmem:[#allocation3 + $0x14] sm:$0xf0]  ;;  %v7460_v49 = vld [vmem:[#allocation3 + $0xc] sm:$0xf] }
 0x19b   :  { %v818_v43 = vpack.c.bf16 %v8463_v42, %v8463_v42  ;;  %1294 = vmatpush.bf16.msrb.mxu1 %v5616_v41  ;;  %v5565_v41 = vld [vmem:[#allocation3 + $0x50] sm:$0xf0] }
 0x19d   :  { %1019 = vmatmul.bf16.vlgmr.msrb.gmra.mxu0 %v818_v43  ;;  %1032 = vmatmul.bf16.vlgmr.msra.gmra.mxu1 %v818_v43 }
 0x19e   :  { %1045 = vmatmul.bf16.vlgmr.msrb.gmra.mxu2 %v818_v43  ;;  %1058 = vmatmul.bf16.vlgmr.msrb.gmra.mxu3 %v818_v43  ;;  %v5620_v43 = vor.u32 %v7482_v40, %v5619_v39  ;;  %v7467_v39 = vld [vmem:[#allocation3 + $0x44] sm:$0xf]  ;;  %v5564_v40 = vor.u32 %v7469_v36, %v5563_v35  ;;  %v5541_v36 = vld [vmem:[#allocation3 + $0x18] sm:$0xf0] }
 0x19f   :  { %1282 = vmatpush.bf16.msra.mxu0 %v5596_v50  ;;  %1295 = vmatpush.bf16.msrb.mxu1 %v5600_v4  ;;  %v5568_v57 = vor.u32 %v7467_v39, %v5565_v41  ;;  %v5547_v50 = vld [vmem:[#allocation3 + $0x20] sm:$0xf]  ;;  %v5549_v4 = vld [vmem:[#allocation3 + $0x30] sm:$0xf0]  ;;  %v5544_v39 = vor.u32 %v7460_v49, %v5541_v36  ;;  %v7519_v49 = vld [vmem:[#allocation3 + $0xe4] sm:$0xf] }
 0x1a0   :  { %1307 = vmatpush.bf16.msra.mxu2 %v5620_v43  ;;  %1322 = vmatpush.bf16.msra.mxu3 %v5592_v60  ;;  %v5571_v43 = vld [vmem:[#allocation3 + $0x48] sm:$0xf]  ;;  %v5548_v2 = vor.u32 %v7465_v51, %v5547_v50  ;;  %v5552_v9 = vor.u32 %v7463_v61, %v5549_v4  ;;  %v5536_v60 = vor.u32 %v7459_v31, %v5533_v53 }
 0x1a1   :  { %v5572_v44 = vor.u32 %v7470_v45, %v5571_v43  ;;  %v5779_v36 = vld [vmem:[#allocation3 + $0xe8] sm:$0xf] }
 0x1a3   :  { %1283 = vmatpush.bf16.msra.mxu0 %v5580_v63  ;;  %1296 = vmatpush.bf16.msrb.mxu1 %v5584_v56  ;;  %v5560_v63 = vor.u32 %v7464_v18, %v5557_v23  ;;  %v5532_v56 = vor.u32 %v7461_v25, %v5531_v24 }
 0x1a4   :  { %1308 = vmatpush.bf16.msra.mxu2 %v5604_v10  ;;  %v5555_v10 = vld [vmem:[#allocation3 + $0x28] sm:$0xf]  ;;  %1323 = vmatpush.bf16.msra.mxu3 %v5576_v48 }
 0x1a5   :  { %v5556_v7 = vor.u32 %v7466_v15, %v5555_v10 }
 0x1a7   :  { %1284 = vmatpush.bf16.msra.mxu0 %v5564_v40  ;;  %1297 = vmatpush.bf16.msrb.mxu1 %v5568_v57 }
 0x1a8   :  { %1309 = vmatpush.bf16.msra.mxu2 %v5588_v59  ;;  %v5539_v59 = vld [vmem:[#allocation3 + $0x8] sm:$0xf]  ;;  %1324 = vmatpush.bf16.msra.mxu3 %v5560_v63 }
 0x1a9   :  { %v5540_v35 = vor.u32 %v7462_v33, %v5539_v59  ;;  %v5771_v33 = vld [vmem:[#allocation3 + $0xe0] sm:$0xf] }
 0x1ab   :  { %1285 = vmatpush.bf16.msra.mxu0 %v5548_v2  ;;  %1298 = vmatpush.bf16.msrb.mxu1 %v5552_v9 }
 0x1ac   :  { %1310 = vmatpush.bf16.msra.mxu2 %v5572_v44  ;;  %1325 = vmatpush.bf16.msra.mxu3 %v5544_v39  ;;  %v7522_v39 = vld [vmem:[#allocation3 + $0xf4] sm:$0xf0] }
 0x1af   :  { %1286 = vmatpush.bf16.msra.mxu0 %v5532_v56  ;;  %1299 = vmatpush.bf16.msrb.mxu1 %v5536_v60 }
 0x1b0   :  { %1311 = vmatpush.bf16.msra.mxu2 %v5556_v7 }
 0x1b4   :  { %1312 = vmatpush.bf16.msra.mxu2 %v5540_v35  ;;  %v5773_v35 = vld [vmem:[#allocation3 + $0xf0] sm:$0xf0] }
 0x21a   :  { %v1020_v40 = vpop.f32.mrf.mxu0  ;;  %v1033_v41 = vpop.f32.mrf.mxu1 }
 0x21b   :  { %v1063_v43 = vadd.f32 %v1020_v40, %v8369_v62  ;;  %v1064_v45 = vadd.f32 %v1033_v41, %v8397_v16  ;;  %v5776_v40 = vor.u32 %v7519_v49, %v5773_v35  ;;  %v5780_v41 = vor.u32 %v7522_v39, %v5779_v36  ;;  %v7507_v49 = vld [vmem:[#allocation3 + $0x84] sm:$0xf]  ;;  %v5725_v35 = vld [vmem:[#allocation3 + $0x90] sm:$0xf0]  ;;  %v5731_v36 = vld [vmem:[#allocation3 + $0x88] sm:$0xf] }
 0x21c   :  { %v7510_v39 = vld [vmem:[#allocation3 + $0x94] sm:$0xf0] }
 0x21d   :  { %v1067_v57 = vmul.f32 0.5, %v1063_v43  ;;  %v1068_v44 = vmul.f32 0.5, %v1064_v45  ;;  %v7520_v43 = vld [vmem:[#allocation3 + $0xec] sm:$0xf]  ;;  %v5781_v45 = vld [vmem:[#allocation3 + $0xf8] sm:$0xf0]  ;;  %1560 = vmatpush.bf16.msra.mxu1 %v5776_v40  ;;  %1573 = vmatpush.bf16.msrb.mxu2 %v5780_v41  ;;  %v5728_v40 = vor.u32 %v7507_v49, %v5725_v35  ;;  %v5732_v41 = vor.u32 %v7510_v39, %v5731_v36 }
 0x21e   :  { %v7495_v49 = vld [vmem:[#allocation3 + $0x24] sm:$0xf]  ;;  %v5677_v35 = vld [vmem:[#allocation3 + $0x30] sm:$0xf0]  ;;  %v5683_v36 = vld [vmem:[#allocation3 + $0x28] sm:$0xf] }
 0x21f   :  { %7942 = vtanh.f32 %v1067_v57  ;;  %v5784_v57 = vor.u32 %v7520_v43, %v5781_v45  ;;  %v7508_v43 = vld [vmem:[#allocation3 + $0x8c] sm:$0xf]  ;;  %v5733_v45 = vld [vmem:[#allocation3 + $0x98] sm:$0xf0]  ;;  %v7498_v39 = vld [vmem:[#allocation3 + $0x34] sm:$0xf0] }
 0x220   :  { %7944 = vtanh.f32 %v1068_v44  ;;  %v5755_v44 = vld [vmem:[#allocation3 + $0xc0] sm:$0xf] }
 0x221   :  { %v1046_v47 = vpop.f32.mrf.mxu2  ;;  %v1059_v46 = vpop.f32.mrf.mxu3  ;;  %1586 = vmatpush.bf16.msrb.mxu3 %v5784_v57  ;;  %v5736_v57 = vor.u32 %v7508_v43, %v5733_v45  ;;  %v7496_v43 = vld [vmem:[#allocation3 + $0x2c] sm:$0xf]  ;;  %v5685_v45 = vld [vmem:[#allocation3 + $0x38] sm:$0xf0] }
 0x222   :  { %v1065_v48 = vadd.f32 %v1046_v47, %v8378_v3  ;;  %v1066_v50 = vadd.f32 %v1059_v46, %v8383_v6  ;;  %v1022_v51 = vpop.f32.mrf.mxu0  ;;  %v1035_v61 = vpop.f32.mrf.mxu1  ;;  %v7517_v47 = vld [vmem:[#allocation3 + $0xcc] sm:$0xf0]  ;;  %v7515_v46 = vld [vmem:[#allocation3 + $0xc4] sm:$0xf] }
 0x223   :  { %v5763_v51 = vld [vmem:[#allocation3 + $0xc8] sm:$0xf]  ;;  %v7518_v61 = vld [vmem:[#allocation3 + $0xd4] sm:$0xf0] }
 0x224   :  { %v1069_v2 = vmul.f32 0.5, %v1065_v48  ;;  %7946 = vtanh.f32 %v1066_v50  ;;  %v5756_v48 = vor.u32 %v7517_v47, %v5755_v44  ;;  %v5757_v50 = vld [vmem:[#allocation3 + $0xd0] sm:$0xf0]  ;;  %v5707_v44 = vld [vmem:[#allocation3 + $0x60] sm:$0xf] }
 0x225   :  { %v7943_v4 = vpop.eup %7942  ;;  %v7505_v47 = vld [vmem:[#allocation3 + $0x6c] sm:$0xf0] }
 0x226   :  { %v7945_v10 = vpop.eup %7944  ;;  %v1073_v15 = vmul.f32 0.5, %v7943_v4  ;;  %7948 = vtanh.f32 %v1069_v2  ;;  %v5760_v2 = vor.u32 %v7515_v46, %v5757_v50  ;;  %v5764_v4 = vor.u32 %v7518_v61, %v5763_v51  ;;  %v7503_v46 = vld [vmem:[#allocation3 + $0x64] sm:$0xf]  ;;  %v5709_v50 = vld [vmem:[#allocation3 + $0x70] sm:$0xf0] }
 0x227   :  { %v1074_v62 = vmul.f32 0.5, %v7945_v10  ;;  %v7516_v10 = vld [vmem:[#allocation3 + $0xcc] sm:$0xf]  ;;  %v5715_v51 = vld [vmem:[#allocation3 + $0x68] sm:$0xf] }
 0x228   :  { %v1076_v16 = vadd.f32 0.5, %v1073_v15  ;;  %v5765_v15 = vld [vmem:[#allocation3 + $0xd8] sm:$0xf0]  ;;  %1561 = vmatpush.bf16.msra.mxu1 %v5760_v2  ;;  %1574 = vmatpush.bf16.msrb.mxu2 %v5764_v4  ;;  %v7506_v61 = vld [vmem:[#allocation3 + $0x74] sm:$0xf0]  ;;  %v5712_v2 = vor.u32 %v7503_v46, %v5709_v50 }
 0x229   :  { %v1077_v9 = vadd.f32 0.5, %v1074_v62  ;;  %v1048_v7 = vpop.f32.mrf.mxu2  ;;  %v1061_v18 = vpop.f32.mrf.mxu3  ;;  %v5768_v62 = vor.u32 %v7516_v10, %v5765_v15  ;;  %v5716_v4 = vor.u32 %v7506_v61, %v5715_v51  ;;  %v7504_v10 = vld [vmem:[#allocation3 + $0x6c] sm:$0xf]  ;;  %v5717_v15 = vld [vmem:[#allocation3 + $0x78] sm:$0xf0] }
 0x22a   :  { %v7947_v23 = vpop.eup %7946  ;;  %v7511_v7 = vld [vmem:[#allocation3 + $0xa4] sm:$0xf]  ;;  %v5667_v51 = vld [vmem:[#allocation3 + $0x8] sm:$0xf]  ;;  %v7494_v61 = vld [vmem:[#allocation3 + $0x14] sm:$0xf0] }
 0x22b   :  { %v1080_v24 = vmul.f32 %v1077_v9, %v8460_v38  ;;  %v1081_v63 = vmul.f32 %v7947_v23, %v1076_v16  ;;  %v7521_v38 = vld [vmem:[#allocation3 + $0xec] sm:$0xf0]  ;;  %v5739_v16 = vld [vmem:[#allocation3 + $0xa0] sm:$0xf]  ;;  %1587 = vmatpush.bf16.msrb.mxu3 %v5768_v62  ;;  %v5741_v23 = vld [vmem:[#allocation3 + $0xb0] sm:$0xf0]  ;;  %v5720_v62 = vor.u32 %v7504_v10, %v5717_v15  ;;  %v5668_v10 = vor.u32 %v7494_v61, %v5667_v51 }
 0x22c   :  { %v7949_v3 = vpop.eup %7948  ;;  %v5772_v60 = vor.u32 %v7521_v38, %v5771_v33  ;;  %v7513_v9 = vld [vmem:[#allocation3 + $0xac] sm:$0xf0]  ;;  %v5723_v33 = vld [vmem:[#allocation3 + $0x80] sm:$0xf]  ;;  %v7491_v46 = vld [vmem:[#allocation3 + $0x4] sm:$0xf] }
 0x22d   :  { %v8472_v25 = vadd.f32 %v1081_v63, %v1080_v24  ;;  %v1075_v6 = vmul.f32 0.5, %v7949_v3  ;;  %v5740_v18 = vor.u32 %v7513_v9, %v5739_v16  ;;  %v5747_v24 = vld [vmem:[#allocation3 + $0xa8] sm:$0xf]  ;;  %v7514_v63 = vld [vmem:[#allocation3 + $0xb4] sm:$0xf0]  ;;  %v5744_v3 = vor.u32 %v7511_v7, %v5741_v23 }
 0x22e   :  { %1547 = vmatpush.bf16.msrb.mxu0 %v5772_v60  ;;  %v7509_v38 = vld [vmem:[#allocation3 + $0x8c] sm:$0xf0]  ;;  %v5691_v16 = vld [vmem:[#allocation3 + $0x40] sm:$0xf]  ;;  %v7499_v7 = vld [vmem:[#allocation3 + $0x44] sm:$0xf] }
 0x22f   :  { %7950 = vtanh.f32 %v8472_v25  ;;  %v1078_v31 = vadd.f32 0.5, %v1075_v6  ;;  %v5748_v6 = vor.u32 %v7514_v63, %v5747_v24  ;;  %1562 = vmatpush.bf16.msra.mxu1 %v5744_v3  ;;  %v5724_v60 = vor.u32 %v7509_v38, %v5723_v33  ;;  %v7501_v9 = vld [vmem:[#allocation3 + $0x4c] sm:$0xf0]  ;;  %v5693_v23 = vld [vmem:[#allocation3 + $0x50] sm:$0xf0] }
 0x230   :  { %v5699_v24 = vld [vmem:[#allocation3 + $0x48] sm:$0xf]  ;;  %v7502_v63 = vld [vmem:[#allocation3 + $0x54] sm:$0xf0]  ;;  %v5696_v3 = vor.u32 %v7499_v7, %v5693_v23  ;;  %v5675_v33 = vld [vmem:[#allocation3 + $0x20] sm:$0xf] }
 0x231   :  { %1575 = vmatpush.bf16.msrb.mxu2 %v5748_v6  ;;  %v5700_v6 = vor.u32 %v7502_v63, %v5699_v24  ;;  %v7497_v38 = vld [vmem:[#allocation3 + $0x2c] sm:$0xf0]  ;;  %v5669_v15 = vld [vmem:[#allocation3 + $0x18] sm:$0xf0] }
 0x232   :  { %1548 = vmatpush.bf16.msrb.mxu0 %v5756_v48  ;;  %v5708_v48 = vor.u32 %v7505_v47, %v5707_v44  ;;  %v5688_v44 = vor.u32 %v7496_v43, %v5685_v45  ;;  %v7493_v47 = vld [vmem:[#allocation3 + $0xc] sm:$0xf0] }
 0x233   :  { %1563 = vmatpush.bf16.msra.mxu1 %v5728_v40  ;;  %v5680_v40 = vor.u32 %v7495_v49, %v5677_v35 }
 0x235   :  { %v7951_v53 = vpop.eup %7950  ;;  %1576 = vmatpush.bf16.msrb.mxu2 %v5732_v41  ;;  %v5684_v41 = vor.u32 %v7498_v39, %v5683_v36 }
 0x236   :  { %v8475_v56 = vmul.f32 %v7951_v53, %v1078_v31  ;;  %v7512_v31 = vld [vmem:[#allocation3 + $0xac] sm:$0xf]  ;;  %v5749_v53 = vld [vmem:[#allocation3 + $0xb8] sm:$0xf0]  ;;  %1549 = vmatpush.bf16.msrb.mxu0 %v5740_v18  ;;  %v5692_v18 = vor.u32 %v7501_v9, %v5691_v16  ;;  %v181_v16 = vadd.f32 %v8380_v5, %v8349_v52  ;;  %v210_v9 = vadd.f32 %v8407_v21, %v8389_v11 }
 0x237   :  { %1564 = vmatpush.bf16.msra.mxu1 %v5712_v2  ;;  %v7492_v2 = vld [vmem:[#allocation3 + $0xc] sm:$0xf] }
 0x238   :  { %v1086_v59 = vpack.c.bf16 %v8475_v56, %v8475_v56 }
 0x239   :  { %1577 = vmatpush.bf16.msrb.mxu2 %v5716_v4 }
 0x23a   :  { %1287 = vmatmul.bf16.vlgmr.msra.gmra.mxu0 %v1086_v59  ;;  %1300 = vmatmul.bf16.vlgmr.msrb.gmra.mxu1 %v1086_v59 }
 0x23b   :  { %1313 = vmatmul.bf16.vlgmr.msra.gmra.mxu2 %v1086_v59  ;;  %1326 = vmatmul.bf16.vlgmr.msra.gmra.mxu3 %v1086_v59  ;;  %v5752_v59 = vor.u32 %v7512_v31, %v5749_v53  ;;  %v7500_v31 = vld [vmem:[#allocation3 + $0x4c] sm:$0xf]  ;;  %v5701_v53 = vld [vmem:[#allocation3 + $0x58] sm:$0xf0] }
 0x23c   :  { %1550 = vmatpush.bf16.msrb.mxu0 %v5724_v60  ;;  %1565 = vmatpush.bf16.msra.mxu1 %v5696_v3  ;;  %v5676_v60 = vor.u32 %v7497_v38, %v5675_v33 }
 0x23d   :  { %1588 = vmatpush.bf16.msrb.mxu3 %v5752_v59  ;;  %v5704_v59 = vor.u32 %v7500_v31, %v5701_v53  ;;  %1578 = vmatpush.bf16.msrb.mxu2 %v5700_v6  ;;  %v239_v6 = vadd.f32 %v8387_v8, %v8373_v0  ;;  %v268_v31 = vadd.f32 %v8391_v12, %v8375_v1 }
 0x240   :  { %1551 = vmatpush.bf16.msrb.mxu0 %v5708_v48  ;;  %v5661_v48 = vld [vmem:[#allocation3 + $0x10] sm:$0xf0]  ;;  %1566 = vmatpush.bf16.msra.mxu1 %v5680_v40 }
 0x241   :  { %1589 = vmatpush.bf16.msrb.mxu3 %v5736_v57  ;;  %v5659_v57 = vld [vmem:[#allocation3] sm:$0xf]  ;;  %1579 = vmatpush.bf16.msrb.mxu2 %v5684_v41  ;;  %v5664_v4 = vor.u32 %v7491_v46, %v5661_v48 }
 0x242   :  { %v5660_v50 = vor.u32 %v7493_v47, %v5659_v57 }
 0x244   :  { %1552 = vmatpush.bf16.msrb.mxu0 %v5692_v18  ;;  %1567 = vmatpush.bf16.msra.mxu1 %v5664_v4  ;;  %v7551_v4 = vld [vmem:[#allocation3 + $0xe4] sm:$0xf] }
 0x245   :  { %1590 = vmatpush.bf16.msrb.mxu3 %v5720_v62  ;;  %v5672_v62 = vor.u32 %v7492_v2, %v5669_v15  ;;  %1580 = vmatpush.bf16.msrb.mxu2 %v5668_v10  ;;  %v5899_v2 = vld [vmem:[#allocation3 + $0xe0] sm:$0xf]  ;;  %v5901_v15 = vld [vmem:[#allocation3 + $0xf0] sm:$0xf0] }
 0x248   :  { %1553 = vmatpush.bf16.msrb.mxu0 %v5676_v60 }
 0x249   :  { %1591 = vmatpush.bf16.msrb.mxu3 %v5704_v59 }
 0x24c   :  { %1554 = vmatpush.bf16.msrb.mxu0 %v5660_v50 }
 0x24d   :  { %1592 = vmatpush.bf16.msrb.mxu3 %v5688_v44 }
 0x251   :  { %1593 = vmatpush.bf16.msrb.mxu3 %v5672_v62  ;;  %v5907_v62 = vld [vmem:[#allocation3 + $0xe8] sm:$0xf] }
 0x2b7   :  { %v1288_v7 = vpop.f32.mrf.mxu0  ;;  %v1301_v18 = vpop.f32.mrf.mxu1 }
 0x2b8   :  { %v1331_v23 = vadd.f32 %v1288_v7, %v181_v16  ;;  %v1332_v24 = vadd.f32 %v1301_v18, %v210_v9  ;;  %v7554_v16 = vld [vmem:[#allocation3 + $0xf4] sm:$0xf0]  ;;  %v5904_v9 = vor.u32 %v7551_v4, %v5901_v15  ;;  %v7552_v18 = vld [vmem:[#allocation3 + $0xec] sm:$0xf]  ;;  %v5859_v4 = vld [vmem:[#allocation3 + $0x88] sm:$0xf] }
 0x2b9   :  { %v5908_v7 = vor.u32 %v7554_v16, %v5907_v62  ;;  %v7540_v16 = vld [vmem:[#allocation3 + $0x8c] sm:$0xf] }
 0x2ba   :  { %v1335_v63 = vmul.f32 0.5, %v1331_v23  ;;  %v1336_v3 = vmul.f32 0.5, %v1332_v24  ;;  %v5909_v23 = vld [vmem:[#allocation3 + $0xf8] sm:$0xf0]  ;;  %1828 = vmatpush.bf16.msrb.mxu1 %v5904_v9 }
 0x2bb   :  { %v5912_v24 = vor.u32 %v7552_v18, %v5909_v23  ;;  %1841 = vmatpush.bf16.msra.mxu2 %v5908_v7  ;;  %v5861_v9 = vld [vmem:[#allocation3 + $0x98] sm:$0xf0]  ;;  %v5835_v18 = vld [vmem:[#allocation3 + $0x60] sm:$0xf]  ;;  %v7537_v23 = vld [vmem:[#allocation3 + $0x6c] sm:$0xf0] }
 0x2bc   :  { %7952 = vtanh.f32 %v1335_v63  ;;  %v5883_v63 = vld [vmem:[#allocation3 + $0xc0] sm:$0xf]  ;;  %v5864_v7 = vor.u32 %v7540_v16, %v5861_v9  ;;  %v7525_v9 = vld [vmem:[#allocation3 + $0xc] sm:$0xf0] }
 0x2bd   :  { %7954 = vtanh.f32 %v1336_v3  ;;  %v7549_v3 = vld [vmem:[#allocation3 + $0xcc] sm:$0xf0]  ;;  %1854 = vmatpush.bf16.msra.mxu3 %v5912_v24  ;;  %v7535_v24 = vld [vmem:[#allocation3 + $0x64] sm:$0xf] }
 0x2be   :  { %v1314_v53 = vpop.f32.mrf.mxu2  ;;  %v1327_v5 = vpop.f32.mrf.mxu3 }
 0x2bf   :  { %v1333_v59 = vadd.f32 %v1314_v53, %v239_v6  ;;  %v1334_v33 = vadd.f32 %v1327_v5, %v268_v31  ;;  %v1290_v21 = vpop.f32.mrf.mxu0  ;;  %v1303_v38 = vpop.f32.mrf.mxu1  ;;  %v7547_v6 = vld [vmem:[#allocation3 + $0xc4] sm:$0xf]  ;;  %v5884_v31 = vor.u32 %v7549_v3, %v5883_v63  ;;  %v5885_v53 = vld [vmem:[#allocation3 + $0xd0] sm:$0xf0]  ;;  %v5891_v5 = vld [vmem:[#allocation3 + $0xc8] sm:$0xf]  ;;  %v5836_v63 = vor.u32 %v7537_v23, %v5835_v18 }
 0x2c0   :  { %v7548_v38 = vld [vmem:[#allocation3 + $0xcc] sm:$0xf]  ;;  %v5837_v3 = vld [vmem:[#allocation3 + $0x70] sm:$0xf0] }
 0x2c1   :  { %v1337_v49 = vmul.f32 0.5, %v1333_v59  ;;  %7956 = vtanh.f32 %v1334_v33  ;;  %v7550_v59 = vld [vmem:[#allocation3 + $0xd4] sm:$0xf0]  ;;  %v5888_v33 = vor.u32 %v7547_v6, %v5885_v53  ;;  %v5843_v6 = vld [vmem:[#allocation3 + $0x68] sm:$0xf]  ;;  %v5840_v53 = vor.u32 %v7535_v24, %v5837_v3 }
 0x2c2   :  { %v7953_v60 = vpop.eup %7952  ;;  %v5892_v21 = vor.u32 %v7550_v59, %v5891_v5  ;;  %v7536_v59 = vld [vmem:[#allocation3 + $0x6c] sm:$0xf]  ;;  %v5789_v18 = vld [vmem:[#allocation3 + $0x10] sm:$0xf0]  ;;  %v5795_v24 = vld [vmem:[#allocation3 + $0x8] sm:$0xf] }
 0x2c3   :  { %v7955_v35 = vpop.eup %7954  ;;  %v1341_v36 = vmul.f32 0.5, %v7953_v60  ;;  %7958 = vtanh.f32 %v1337_v49  ;;  %v5893_v49 = vld [vmem:[#allocation3 + $0xd8] sm:$0xf0]  ;;  %1829 = vmatpush.bf16.msrb.mxu1 %v5888_v33  ;;  %v7524_v3 = vld [vmem:[#allocation3 + $0xc] sm:$0xf] }
 0x2c4   :  { %v1342_v39 = vmul.f32 0.5, %v7955_v35  ;;  %v5896_v60 = vor.u32 %v7548_v38, %v5893_v49  ;;  %1842 = vmatpush.bf16.msra.mxu2 %v5892_v21  ;;  %v5867_v35 = vld [vmem:[#allocation3 + $0xa0] sm:$0xf]  ;;  %v5845_v33 = vld [vmem:[#allocation3 + $0x78] sm:$0xf0] }
 0x2c5   :  { %v1344_v40 = vadd.f32 0.5, %v1341_v36  ;;  %v7545_v36 = vld [vmem:[#allocation3 + $0xac] sm:$0xf0]  ;;  %v5848_v21 = vor.u32 %v7536_v59, %v5845_v33  ;;  %v5819_v38 = vld [vmem:[#allocation3 + $0x40] sm:$0xf] }
 0x2c6   :  { %v1345_v41 = vadd.f32 0.5, %v1342_v39  ;;  %v1316_v8 = vpop.f32.mrf.mxu2  ;;  %v1329_v43 = vpop.f32.mrf.mxu3  ;;  %v7543_v39 = vld [vmem:[#allocation3 + $0xa4] sm:$0xf]  ;;  %1855 = vmatpush.bf16.msra.mxu3 %v5896_v60  ;;  %v7533_v49 = vld [vmem:[#allocation3 + $0x4c] sm:$0xf0] }
 0x2c7   :  { %v7957_v45 = vpop.eup %7956  ;;  %v5875_v8 = vld [vmem:[#allocation3 + $0xa8] sm:$0xf]  ;;  %v7546_v43 = vld [vmem:[#allocation3 + $0xb4] sm:$0xf0]  ;;  %v7531_v60 = vld [vmem:[#allocation3 + $0x44] sm:$0xf] }
 0x2c8   :  { %v1348_v12 = vmul.f32 %v1345_v41, %v8472_v25  ;;  %v1349_v57 = vmul.f32 %v7957_v45, %v1344_v40  ;;  %v7553_v25 = vld [vmem:[#allocation3 + $0xec] sm:$0xf0]  ;;  %v5868_v40 = vor.u32 %v7545_v36, %v5867_v35  ;;  %v5869_v41 = vld [vmem:[#allocation3 + $0xb0] sm:$0xf0]  ;;  %v5820_v35 = vor.u32 %v7533_v49, %v5819_v38 }
 0x2c9   :  { %v7959_v44 = vpop.eup %7958  ;;  %v5900_v10 = vor.u32 %v7553_v25, %v5899_v2  ;;  %v5872_v45 = vor.u32 %v7543_v39, %v5869_v41  ;;  %v5853_v25 = vld [vmem:[#allocation3 + $0x90] sm:$0xf0]  ;;  %v5827_v39 = vld [vmem:[#allocation3 + $0x48] sm:$0xf] }
 0x2ca   :  { %v8488_v47 = vadd.f32 %v1349_v57, %v1348_v12  ;;  %v1343_v46 = vmul.f32 0.5, %v7959_v44  ;;  %v5876_v12 = vor.u32 %v7546_v43, %v5875_v8  ;;  %v7544_v57 = vld [vmem:[#allocation3 + $0xac] sm:$0xf]  ;;  %v5877_v44 = vld [vmem:[#allocation3 + $0xb8] sm:$0xf0] }
 0x2cb   :  { %1815 = vmatpush.bf16.msra.mxu0 %v5900_v10  ;;  %1830 = vmatpush.bf16.msrb.mxu1 %v5872_v45  ;;  %v7542_v10 = vld [vmem:[#allocation3 + $0x94] sm:$0xf0]  ;;  %v5821_v36 = vld [vmem:[#allocation3 + $0x50] sm:$0xf0]  ;;  %v7532_v43 = vld [vmem:[#allocation3 + $0x4c] sm:$0xf] }
 0x2cc   :  { %7960 = vtanh.f32 %v8488_v47  ;;  %v1346_v48 = vadd.f32 0.5, %v1343_v46  ;;  %v5880_v46 = vor.u32 %v7544_v57, %v5877_v44  ;;  %1843 = vmatpush.bf16.msra.mxu2 %v5876_v12  ;;  %v5860_v62 = vor.u32 %v7542_v10, %v5859_v4  ;;  %v5829_v45 = vld [vmem:[#allocation3 + $0x58] sm:$0xf0]  ;;  %v5803_v57 = vld [vmem:[#allocation3 + $0x20] sm:$0xf] }
 0x2cd   :  { %v5824_v41 = vor.u32 %v7531_v60, %v5821_v36  ;;  %v5832_v12 = vor.u32 %v7532_v43, %v5829_v45  ;;  %v7529_v44 = vld [vmem:[#allocation3 + $0x2c] sm:$0xf0]  ;;  %v7528_v10 = vld [vmem:[#allocation3 + $0x2c] sm:$0xf] }
 0x2ce   :  { %1856 = vmatpush.bf16.msra.mxu3 %v5880_v46  ;;  %v7527_v46 = vld [vmem:[#allocation3 + $0x24] sm:$0xf] }
 0x2cf   :  { %1816 = vmatpush.bf16.msra.mxu0 %v5884_v31  ;;  %v7538_v31 = vld [vmem:[#allocation3 + $0x74] sm:$0xf0] }
 0x2d0   :  { %1844 = vmatpush.bf16.msra.mxu2 %v5860_v62  ;;  %v5844_v5 = vor.u32 %v7538_v31, %v5843_v6  ;;  %v5787_v62 = vld [vmem:[#allocation3] sm:$0xf] }
 0x2d1   :  { %v5788_v23 = vor.u32 %v7525_v9, %v5787_v62  ;;  %v7583_v9 = vld [vmem:[#allocation3 + $0xe4] sm:$0xf] }
 0x2d2   :  { %v7961_v50 = vpop.eup %7960  ;;  %1857 = vmatpush.bf16.msra.mxu3 %v5864_v7  ;;  %v7523_v7 = vld [vmem:[#allocation3 + $0x4] sm:$0xf] }
 0x2d3   :  { %v8491_v51 = vmul.f32 %v7961_v50, %v1346_v48  ;;  %1817 = vmatpush.bf16.msra.mxu0 %v5868_v40  ;;  %v5851_v48 = vld [vmem:[#allocation3 + $0x80] sm:$0xf]  ;;  %v7541_v50 = vld [vmem:[#allocation3 + $0x8c] sm:$0xf0]  ;;  %v7534_v40 = vld [vmem:[#allocation3 + $0x54] sm:$0xf0]  ;;  %v5792_v6 = vor.u32 %v7523_v7, %v5789_v18 }
 0x2d4   :  { %v5852_v2 = vor.u32 %v7541_v50, %v5851_v48  ;;  %1845 = vmatpush.bf16.msra.mxu2 %v5844_v5  ;;  %v5828_v8 = vor.u32 %v7534_v40, %v5827_v39  ;;  %v5804_v48 = vor.u32 %v7529_v44, %v5803_v57  ;;  %v5805_v50 = vld [vmem:[#allocation3 + $0x30] sm:$0xf0] }
 0x2d5   :  { %v1354_v61 = vpack.c.bf16 %v8491_v51, %v8491_v51  ;;  %v6029_v18 = vld [vmem:[#allocation3 + $0xf0] sm:$0xf0] }
 0x2d6   :  { %1858 = vmatpush.bf16.msra.mxu3 %v5848_v21 }
 0x2d7   :  { %1555 = vmatmul.bf16.vlgmr.msrb.gmra.mxu0 %v1354_v61  ;;  %1568 = vmatmul.bf16.vlgmr.msra.gmra.mxu1 %v1354_v61 }
 0x2d8   :  { %1581 = vmatmul.bf16.vlgmr.msrb.gmra.mxu2 %v1354_v61  ;;  %1594 = vmatmul.bf16.vlgmr.msrb.gmra.mxu3 %v1354_v61  ;;  %v7539_v61 = vld [vmem:[#allocation3 + $0x84] sm:$0xf] }
 0x2d9   :  { %v5856_v15 = vor.u32 %v7539_v61, %v5853_v25  ;;  %1818 = vmatpush.bf16.msra.mxu0 %v5852_v2  ;;  %1846 = vmatpush.bf16.msra.mxu2 %v5828_v8  ;;  %v5811_v61 = vld [vmem:[#allocation3 + $0x28] sm:$0xf]  ;;  %v7530_v2 = vld [vmem:[#allocation3 + $0x34] sm:$0xf0]  ;;  %v5808_v25 = vor.u32 %v7527_v46, %v5805_v50 }
 0x2da   :  { %1859 = vmatpush.bf16.msra.mxu3 %v5832_v12  ;;  %v5812_v4 = vor.u32 %v7530_v2, %v5811_v61 }
 0x2db   :  { %1831 = vmatpush.bf16.msrb.mxu1 %v5856_v15  ;;  %v5813_v15 = vld [vmem:[#allocation3 + $0x38] sm:$0xf0] }
 0x2dc   :  { %v5816_v16 = vor.u32 %v7528_v10, %v5813_v15 }
 0x2dd   :  { %1819 = vmatpush.bf16.msra.mxu0 %v5836_v63  ;;  %v7526_v63 = vld [vmem:[#allocation3 + $0x14] sm:$0xf0]  ;;  %1847 = vmatpush.bf16.msra.mxu2 %v5812_v4 }
 0x2de   :  { %v5796_v31 = vor.u32 %v7526_v63, %v5795_v24  ;;  %1860 = vmatpush.bf16.msra.mxu3 %v5816_v16  ;;  %v6027_v16 = vld [vmem:[#allocation3 + $0xe0] sm:$0xf]  ;;  %v7586_v24 = vld [vmem:[#allocation3 + $0xf4] sm:$0xf0]  ;;  %v6032_v63 = vor.u32 %v7583_v9, %v6029_v18  ;;  %v5989_v18 = vld [vmem:[#allocation3 + $0x98] sm:$0xf0] }
 0x2df   :  { %1832 = vmatpush.bf16.msrb.mxu1 %v5840_v53  ;;  %v5797_v53 = vld [vmem:[#allocation3 + $0x18] sm:$0xf0] }
 0x2e0   :  { %v5800_v5 = vor.u32 %v7524_v3, %v5797_v53 }
 0x2e1   :  { %1820 = vmatpush.bf16.msra.mxu0 %v5820_v35  ;;  %1848 = vmatpush.bf16.msra.mxu2 %v5796_v31  ;;  %v6037_v31 = vld [vmem:[#allocation3 + $0xf8] sm:$0xf0] }
 0x2e2   :  { %1861 = vmatpush.bf16.msra.mxu3 %v5800_v5  ;;  %v6011_v5 = vld [vmem:[#allocation3 + $0xc0] sm:$0xf] }
 0x2e3   :  { %1833 = vmatpush.bf16.msrb.mxu1 %v5824_v41 }
 0x2e5   :  { %1821 = vmatpush.bf16.msra.mxu0 %v5804_v48 }
 0x2e7   :  { %1834 = vmatpush.bf16.msrb.mxu1 %v5808_v25 }
 0x2e9   :  { %1822 = vmatpush.bf16.msra.mxu0 %v5788_v23  ;;  %v6035_v23 = vld [vmem:[#allocation3 + $0xe8] sm:$0xf] }
 0x2ea   :  { %v6036_v3 = vor.u32 %v7586_v24, %v6035_v23  ;;  %v5963_v24 = vld [vmem:[#allocation3 + $0x60] sm:$0xf] }
 0x2eb   :  { %1835 = vmatpush.bf16.msrb.mxu1 %v5792_v6  ;;  %v7584_v6 = vld [vmem:[#allocation3 + $0xec] sm:$0xf] }
 0x2ec   :  { %v6040_v53 = vor.u32 %v7584_v6, %v6037_v31  ;;  %2109 = vmatpush.bf16.msrb.mxu2 %v6036_v3  ;;  %v7567_v3 = vld [vmem:[#allocation3 + $0x64] sm:$0xf]  ;;  %v5965_v31 = vld [vmem:[#allocation3 + $0x70] sm:$0xf0] }
 0x2ee   :  { %2122 = vmatpush.bf16.msrb.mxu3 %v6040_v53  ;;  %v5971_v53 = vld [vmem:[#allocation3 + $0x68] sm:$0xf] }
 0x2ef   :  { %2096 = vmatpush.bf16.msra.mxu1 %v6032_v63  ;;  %v7569_v63 = vld [vmem:[#allocation3 + $0x6c] sm:$0xf0] }
 0x2f0   :  { %v5964_v6 = vor.u32 %v7569_v63, %v5963_v24  ;;  %v7558_v24 = vld [vmem:[#allocation3 + $0x14] sm:$0xf0]  ;;  %v7556_v63 = vld [vmem:[#allocation3 + $0xc] sm:$0xf] }
 0x354   :  { %v1556_v59 = vpop.f32.mrf.mxu0  ;;  %v1569_v33 = vpop.f32.mrf.mxu1 }
 0x355   :  { %v1599_v21 = vadd.f32 %v1556_v59, %v8394_v14  ;;  %v1600_v38 = vadd.f32 %v1569_v33, %v8414_v37  ;;  %v7581_v59 = vld [vmem:[#allocation3 + $0xcc] sm:$0xf0]  ;;  %v7579_v33 = vld [vmem:[#allocation3 + $0xc4] sm:$0xf] }
 0x357   :  { %v1603_v49 = vmul.f32 0.5, %v1599_v21  ;;  %v1604_v60 = vmul.f32 0.5, %v1600_v38  ;;  %v6012_v21 = vor.u32 %v7581_v59, %v6011_v5  ;;  %v6013_v38 = vld [vmem:[#allocation3 + $0xd0] sm:$0xf0]  ;;  %v7570_v5 = vld [vmem:[#allocation3 + $0x74] sm:$0xf0]  ;;  %v5968_v59 = vor.u32 %v7567_v3, %v5965_v31 }
 0x358   :  { %v5925_v31 = vld [vmem:[#allocation3 + $0x18] sm:$0xf0] }
 0x359   :  { %7962 = vtanh.f32 %v1603_v49  ;;  %v6019_v49 = vld [vmem:[#allocation3 + $0xc8] sm:$0xf] }
 0x35a   :  { %7964 = vtanh.f32 %v1604_v60  ;;  %v7582_v60 = vld [vmem:[#allocation3 + $0xd4] sm:$0xf0] }
 0x35b   :  { %v1582_v35 = vpop.f32.mrf.mxu2  ;;  %v1595_v36 = vpop.f32.mrf.mxu3 }
 0x35c   :  { %v1601_v39 = vadd.f32 %v1582_v35, %v8400_v17  ;;  %v1602_v40 = vadd.f32 %v1595_v36, %v8405_v20  ;;  %v1558_v41 = vpop.f32.mrf.mxu0  ;;  %v1571_v8 = vpop.f32.mrf.mxu1  ;;  %v6016_v35 = vor.u32 %v7579_v33, %v6013_v38  ;;  %v6020_v36 = vor.u32 %v7582_v60, %v6019_v49  ;;  %v5973_v38 = vld [vmem:[#allocation3 + $0x78] sm:$0xf0]  ;;  %v5947_v60 = vld [vmem:[#allocation3 + $0x40] sm:$0xf] }
 0x35d   :  { %v5995_v8 = vld [vmem:[#allocation3 + $0xa0] sm:$0xf]  ;;  %v5972_v33 = vor.u32 %v7570_v5, %v5971_v53  ;;  %v5928_v53 = vor.u32 %v7556_v63, %v5925_v31  ;;  %v186_v5 = vadd.f32 %v8402_v19, %v8349_v52  ;;  %v7616_v19 = vld [vmem:[#allocation3 + $0xec] sm:$0xf] }
 0x35e   :  { %v1605_v43 = vmul.f32 0.5, %v1601_v39  ;;  %7966 = vtanh.f32 %v1602_v40  ;;  %v7580_v39 = vld [vmem:[#allocation3 + $0xcc] sm:$0xf]  ;;  %v6021_v40 = vld [vmem:[#allocation3 + $0xd8] sm:$0xf0]  ;;  %2097 = vmatpush.bf16.msra.mxu1 %v6016_v35  ;;  %2110 = vmatpush.bf16.msrb.mxu2 %v6020_v36 }
 0x35f   :  { %v7963_v45 = vpop.eup %7962  ;;  %v6024_v41 = vor.u32 %v7580_v39, %v6021_v40  ;;  %v7565_v35 = vld [vmem:[#allocation3 + $0x4c] sm:$0xf0]  ;;  %v7563_v36 = vld [vmem:[#allocation3 + $0x44] sm:$0xf]  ;;  %v5949_v40 = vld [vmem:[#allocation3 + $0x50] sm:$0xf0] }
 0x360   :  { %v7965_v12 = vpop.eup %7964  ;;  %v1609_v57 = vmul.f32 0.5, %v7963_v45  ;;  %7968 = vtanh.f32 %v1605_v43  ;;  %v7577_v43 = vld [vmem:[#allocation3 + $0xac] sm:$0xf0]  ;;  %v7575_v45 = vld [vmem:[#allocation3 + $0xa4] sm:$0xf]  ;;  %v5948_v39 = vor.u32 %v7565_v35, %v5947_v60 }
 0x361   :  { %v1610_v14 = vmul.f32 0.5, %v7965_v12  ;;  %2123 = vmatpush.bf16.msrb.mxu3 %v6024_v41  ;;  %v5996_v12 = vor.u32 %v7577_v43, %v5995_v8  ;;  %v5955_v41 = vld [vmem:[#allocation3 + $0x48] sm:$0xf]  ;;  %v7566_v8 = vld [vmem:[#allocation3 + $0x54] sm:$0xf0]  ;;  %v5952_v43 = vor.u32 %v7563_v36, %v5949_v40 }
 0x362   :  { %v1612_v37 = vadd.f32 0.5, %v1609_v57  ;;  %v5997_v57 = vld [vmem:[#allocation3 + $0xb0] sm:$0xf0]  ;;  %v6155_v60 = vld [vmem:[#allocation3 + $0xe0] sm:$0xf] }
 0x363   :  { %v1613_v44 = vadd.f32 0.5, %v1610_v14  ;;  %v1584_v46 = vpop.f32.mrf.mxu2  ;;  %v1597_v48 = vpop.f32.mrf.mxu3  ;;  %v6003_v14 = vld [vmem:[#allocation3 + $0xa8] sm:$0xf]  ;;  %v7617_v35 = vld [vmem:[#allocation3 + $0xec] sm:$0xf0] }
 0x364   :  { %v7967_v50 = vpop.eup %7966  ;;  %v7576_v48 = vld [vmem:[#allocation3 + $0xac] sm:$0xf]  ;;  %v7615_v36 = vld [vmem:[#allocation3 + $0xe4] sm:$0xf]  ;;  %v6157_v40 = vld [vmem:[#allocation3 + $0xf0] sm:$0xf0] }
 0x365   :  { %v1616_v61 = vmul.f32 %v1613_v44, %v8488_v47  ;;  %v1617_v2 = vmul.f32 %v7967_v50, %v1612_v37  ;;  %v7585_v47 = vld [vmem:[#allocation3 + $0xec] sm:$0xf0]  ;;  %v7578_v37 = vld [vmem:[#allocation3 + $0xb4] sm:$0xf0]  ;;  %v6000_v44 = vor.u32 %v7575_v45, %v5997_v57  ;;  %v6005_v50 = vld [vmem:[#allocation3 + $0xb8] sm:$0xf0]  ;;  %v5956_v45 = vor.u32 %v7566_v8, %v5955_v41 }
 0x366   :  { %v7969_v17 = vpop.eup %7968  ;;  %v6028_v7 = vor.u32 %v7585_v47, %v6027_v16  ;;  %v6004_v46 = vor.u32 %v7578_v37, %v6003_v14  ;;  %v7574_v16 = vld [vmem:[#allocation3 + $0x94] sm:$0xf0]  ;;  %v5957_v57 = vld [vmem:[#allocation3 + $0x58] sm:$0xf0]  ;;  %v5931_v37 = vld [vmem:[#allocation3 + $0x20] sm:$0xf] }
 0x367   :  { %v8500_v25 = vadd.f32 %v1617_v2, %v1616_v61  ;;  %v1611_v20 = vmul.f32 0.5, %v7969_v17  ;;  %v6008_v61 = vor.u32 %v7576_v48, %v6005_v50  ;;  %2098 = vmatpush.bf16.msra.mxu1 %v6000_v44  ;;  %v5979_v2 = vld [vmem:[#allocation3 + $0x80] sm:$0xf]  ;;  %v7573_v17 = vld [vmem:[#allocation3 + $0x8c] sm:$0xf0] }
 0x368   :  { %2083 = vmatpush.bf16.msrb.mxu0 %v6028_v7  ;;  %2111 = vmatpush.bf16.msrb.mxu2 %v6004_v46  ;;  %v7572_v7 = vld [vmem:[#allocation3 + $0x8c] sm:$0xf]  ;;  %v7561_v44 = vld [vmem:[#allocation3 + $0x2c] sm:$0xf0]  ;;  %v7559_v46 = vld [vmem:[#allocation3 + $0x24] sm:$0xf] }
 0x369   :  { %7970 = vtanh.f32 %v8500_v25  ;;  %v1614_v4 = vadd.f32 0.5, %v1611_v20  ;;  %v7571_v20 = vld [vmem:[#allocation3 + $0x84] sm:$0xf]  ;;  %2124 = vmatpush.bf16.msrb.mxu3 %v6008_v61  ;;  %v5992_v23 = vor.u32 %v7572_v7, %v5989_v18  ;;  %v5932_v48 = vor.u32 %v7561_v44, %v5931_v37  ;;  %v5933_v50 = vld [vmem:[#allocation3 + $0x30] sm:$0xf0] }
 0x36a   :  { %v5939_v61 = vld [vmem:[#allocation3 + $0x28] sm:$0xf]  ;;  %v5917_v7 = vld [vmem:[#allocation3 + $0x10] sm:$0xf0]  ;;  %v7618_v8 = vld [vmem:[#allocation3 + $0xf4] sm:$0xf0] }
 0x36b   :  { %v6163_v41 = vld [vmem:[#allocation3 + $0xe8] sm:$0xf]  ;;  %v6139_v37 = vld [vmem:[#allocation3 + $0xc0] sm:$0xf]  ;;  %v7613_v44 = vld [vmem:[#allocation3 + $0xcc] sm:$0xf0] }
 0x36c   :  { %2084 = vmatpush.bf16.msrb.mxu0 %v6012_v21  ;;  %v7568_v21 = vld [vmem:[#allocation3 + $0x6c] sm:$0xf] }
 0x36d   :  { %2125 = vmatpush.bf16.msrb.mxu3 %v5992_v23  ;;  %v5976_v49 = vor.u32 %v7568_v21, %v5973_v38  ;;  %v5923_v23 = vld [vmem:[#allocation3 + $0x8] sm:$0xf] }
 0x36f   :  { %v7971_v10 = vpop.eup %7970 }
 0x370   :  { %v8503_v15 = vmul.f32 %v7971_v10, %v1614_v4  ;;  %2085 = vmatpush.bf16.msrb.mxu0 %v5996_v12  ;;  %v5980_v4 = vor.u32 %v7573_v17, %v5979_v2  ;;  %v5981_v10 = vld [vmem:[#allocation3 + $0x90] sm:$0xf0]  ;;  %v7564_v12 = vld [vmem:[#allocation3 + $0x4c] sm:$0xf]  ;;  %v7562_v2 = vld [vmem:[#allocation3 + $0x34] sm:$0xf0]  ;;  %v5936_v17 = vor.u32 %v7559_v46, %v5933_v50  ;;  %v6140_v50 = vor.u32 %v7613_v44, %v6139_v37 }
 0x371   :  { %v5984_v47 = vor.u32 %v7571_v20, %v5981_v10  ;;  %2126 = vmatpush.bf16.msrb.mxu3 %v5976_v49  ;;  %v5960_v14 = vor.u32 %v7564_v12, %v5957_v57  ;;  %v5940_v20 = vor.u32 %v7562_v2, %v5939_v61  ;;  %v5941_v10 = vld [vmem:[#allocation3 + $0x38] sm:$0xf0]  ;;  %v6160_v12 = vor.u32 %v7615_v36, %v6157_v40  ;;  %v7611_v46 = vld [vmem:[#allocation3 + $0xc4] sm:$0xf]  ;;  %v6141_v61 = vld [vmem:[#allocation3 + $0xd0] sm:$0xf0] }
 0x372   :  { %v1622_v62 = vpack.c.bf16 %v8503_v15, %v8503_v15  ;;  %v6164_v57 = vor.u32 %v7618_v8, %v6163_v41  ;;  %v6147_v2 = vld [vmem:[#allocation3 + $0xc8] sm:$0xf]  ;;  %v6109_v40 = vld [vmem:[#allocation3 + $0x90] sm:$0xf0] }
 0x373   :  { %2099 = vmatpush.bf16.msra.mxu1 %v5984_v47  ;;  %v7557_v47 = vld [vmem:[#allocation3 + $0xc] sm:$0xf0]  ;;  %v6115_v8 = vld [vmem:[#allocation3 + $0x88] sm:$0xf] }
 0x374   :  { %1823 = vmatmul.bf16.vlgmr.msra.gmra.mxu0 %v1622_v62  ;;  %1836 = vmatmul.bf16.vlgmr.msrb.gmra.mxu1 %v1622_v62 }
 0x375   :  { %1849 = vmatmul.bf16.vlgmr.msra.gmra.mxu2 %v1622_v62  ;;  %1862 = vmatmul.bf16.vlgmr.msra.gmra.mxu3 %v1622_v62  ;;  %v5987_v62 = vld [vmem:[#allocation3 + $0x88] sm:$0xf] }
 0x376   :  { %v5988_v9 = vor.u32 %v7574_v16, %v5987_v62  ;;  %2086 = vmatpush.bf16.msrb.mxu0 %v5980_v4  ;;  %2127 = vmatpush.bf16.msrb.mxu3 %v5960_v14  ;;  %v7560_v4 = vld [vmem:[#allocation3 + $0x2c] sm:$0xf]  ;;  %v5915_v62 = vld [vmem:[#allocation3] sm:$0xf]  ;;  %v6165_v14 = vld [vmem:[#allocation3 + $0xf8] sm:$0xf0] }
 0x377   :  { %2100 = vmatpush.bf16.msra.mxu1 %v5968_v59  ;;  %v5944_v16 = vor.u32 %v7560_v4, %v5941_v10  ;;  %v5916_v18 = vor.u32 %v7557_v47, %v5915_v62  ;;  %v215_v59 = vadd.f32 %v8424_v29, %v8389_v11  ;;  %v6168_v29 = vor.u32 %v7616_v19, %v6165_v14  ;;  %v7612_v62 = vld [vmem:[#allocation3 + $0xcc] sm:$0xf]  ;;  %v6123_v47 = vld [vmem:[#allocation3 + $0xa0] sm:$0xf]  ;;  %v6117_v14 = vld [vmem:[#allocation3 + $0x98] sm:$0xf0] }
 0x378   :  { %2112 = vmatpush.bf16.msrb.mxu2 %v5988_v9  ;;  %v7555_v9 = vld [vmem:[#allocation3 + $0x4] sm:$0xf]  ;;  %v6144_v4 = vor.u32 %v7611_v46, %v6141_v61 }
 0x379   :  { %v5920_v3 = vor.u32 %v7555_v9, %v5917_v7 }
 0x37a   :  { %2087 = vmatpush.bf16.msrb.mxu0 %v5964_v6  ;;  %v5924_v6 = vor.u32 %v7558_v24, %v5923_v23  ;;  %2128 = vmatpush.bf16.msrb.mxu3 %v5944_v16  ;;  %v6149_v16 = vld [vmem:[#allocation3 + $0xd8] sm:$0xf0]  ;;  %v7607_v23 = vld [vmem:[#allocation3 + $0xa4] sm:$0xf]  ;;  %v6125_v24 = vld [vmem:[#allocation3 + $0xb0] sm:$0xf0] }
 0x37b   :  { %2101 = vmatpush.bf16.msra.mxu1 %v5952_v43 }
 0x37c   :  { %2113 = vmatpush.bf16.msrb.mxu2 %v5972_v33 }
 0x37e   :  { %2088 = vmatpush.bf16.msrb.mxu0 %v5948_v39  ;;  %2129 = vmatpush.bf16.msrb.mxu3 %v5928_v53  ;;  %v6156_v39 = vor.u32 %v7617_v35, %v6155_v60  ;;  %v7605_v60 = vld [vmem:[#allocation3 + $0x8c] sm:$0xf0] }
 0x37f   :  { %2102 = vmatpush.bf16.msra.mxu1 %v5936_v17  ;;  %v7614_v17 = vld [vmem:[#allocation3 + $0xd4] sm:$0xf0] }
 0x380   :  { %2114 = vmatpush.bf16.msrb.mxu2 %v5956_v45  ;;  %v6148_v10 = vor.u32 %v7614_v17, %v6147_v2 }
 0x382   :  { %2089 = vmatpush.bf16.msrb.mxu0 %v5932_v48  ;;  %v244_v48 = vadd.f32 %v8409_v22, %v8373_v0  ;;  %2390 = vmatpush.bf16.msra.mxu3 %v6168_v29  ;;  %v6152_v22 = vor.u32 %v7612_v62, %v6149_v16 }
 0x383   :  { %2103 = vmatpush.bf16.msra.mxu1 %v5920_v3 }
 0x384   :  { %2115 = vmatpush.bf16.msrb.mxu2 %v5940_v20  ;;  %v273_v20 = vadd.f32 %v8411_v26, %v8375_v1  ;;  %v6131_v26 = vld [vmem:[#allocation3 + $0xa8] sm:$0xf] }
 0x386   :  { %2090 = vmatpush.bf16.msrb.mxu0 %v5916_v18  ;;  %v7609_v18 = vld [vmem:[#allocation3 + $0xac] sm:$0xf0]  ;;  %2391 = vmatpush.bf16.msra.mxu3 %v6152_v22 }
 0x387   :  { %2364 = vmatpush.bf16.msrb.mxu1 %v6160_v12  ;;  %v6124_v53 = vor.u32 %v7609_v18, %v6123_v47  ;;  %v7601_v18 = vld [vmem:[#allocation3 + $0x6c] sm:$0xf0] }
 0x388   :  { %2116 = vmatpush.bf16.msrb.mxu2 %v5924_v6 }
 0x38a   :  { %2351 = vmatpush.bf16.msra.mxu0 %v6156_v39  ;;  %v7603_v39 = vld [vmem:[#allocation3 + $0x84] sm:$0xf] }
 0x38b   :  { %2365 = vmatpush.bf16.msrb.mxu1 %v6144_v4  ;;  %v6112_v37 = vor.u32 %v7603_v39, %v6109_v40 }
 0x38c   :  { %2377 = vmatpush.bf16.msra.mxu2 %v6164_v57 }
 0x38e   :  { %2352 = vmatpush.bf16.msra.mxu0 %v6140_v50 }
 0x390   :  { %2378 = vmatpush.bf16.msra.mxu2 %v6148_v10 }
 0x392   :  { %2353 = vmatpush.bf16.msra.mxu0 %v6124_v53 }
 0x3f1   :  { %v1824_v33 = vpop.f32.mrf.mxu0  ;;  %v1837_v21 = vpop.f32.mrf.mxu1 }
 0x3f2   :  { %v1867_v38 = vadd.f32 %v1824_v33, %v186_v5  ;;  %v1868_v49 = vadd.f32 %v1837_v21, %v215_v59  ;;  %v7610_v5 = vld [vmem:[#allocation3 + $0xb4] sm:$0xf0]  ;;  %v7608_v59 = vld [vmem:[#allocation3 + $0xac] sm:$0xf]  ;;  %v6128_v33 = vor.u32 %v7607_v23, %v6125_v24  ;;  %v7599_v23 = vld [vmem:[#allocation3 + $0x64] sm:$0xf] }
 0x3f3   :  { %v6132_v21 = vor.u32 %v7610_v5, %v6131_v26  ;;  %v7600_v26 = vld [vmem:[#allocation3 + $0x6c] sm:$0xf]  ;;  %v6101_v5 = vld [vmem:[#allocation3 + $0x78] sm:$0xf0] }
 0x3f4   :  { %v1871_v43 = vmul.f32 0.5, %v1867_v38  ;;  %v1872_v45 = vmul.f32 0.5, %v1868_v49  ;;  %v6133_v38 = vld [vmem:[#allocation3 + $0xb8] sm:$0xf0]  ;;  %v6107_v49 = vld [vmem:[#allocation3 + $0x80] sm:$0xf]  ;;  %2366 = vmatpush.bf16.msrb.mxu1 %v6128_v33 }
 0x3f5   :  { %v6136_v36 = vor.u32 %v7608_v59, %v6133_v38  ;;  %v6108_v19 = vor.u32 %v7605_v60, %v6107_v49  ;;  %2379 = vmatpush.bf16.msra.mxu2 %v6132_v21  ;;  %v6104_v59 = vor.u32 %v7600_v26, %v6101_v5  ;;  %v6075_v33 = vld [vmem:[#allocation3 + $0x40] sm:$0xf]  ;;  %v7597_v21 = vld [vmem:[#allocation3 + $0x4c] sm:$0xf0]  ;;  %v7595_v38 = vld [vmem:[#allocation3 + $0x44] sm:$0xf] }
 0x3f6   :  { %7972 = vtanh.f32 %v1871_v43  ;;  %v7606_v43 = vld [vmem:[#allocation3 + $0x94] sm:$0xf0]  ;;  %v6076_v49 = vor.u32 %v7597_v21, %v6075_v33  ;;  %v6077_v60 = vld [vmem:[#allocation3 + $0x50] sm:$0xf0]  ;;  %v6291_v26 = vld [vmem:[#allocation5 + $0xe8] sm:$0xf] }
 0x3f7   :  { %7974 = vtanh.f32 %v1872_v45  ;;  %v7604_v45 = vld [vmem:[#allocation3 + $0x8c] sm:$0xf]  ;;  %v6116_v44 = vor.u32 %v7606_v43, %v6115_v8  ;;  %2392 = vmatpush.bf16.msra.mxu3 %v6136_v36  ;;  %2354 = vmatpush.bf16.msra.mxu0 %v6108_v19  ;;  %v7598_v36 = vld [vmem:[#allocation3 + $0x54] sm:$0xf0]  ;;  %v6080_v39 = vor.u32 %v7595_v38, %v6077_v60  ;;  %v6085_v8 = vld [vmem:[#allocation3 + $0x58] sm:$0xf0] }
 0x3f8   :  { %v1850_v9 = vpop.f32.mrf.mxu2  ;;  %v1863_v7 = vpop.f32.mrf.mxu3  ;;  %2367 = vmatpush.bf16.msrb.mxu1 %v6112_v37  ;;  %v7594_v37 = vld [vmem:[#allocation3 + $0x34] sm:$0xf0]  ;;  %v6293_v21 = vld [vmem:[#allocation5 + $0xf8] sm:$0xf0]  ;;  %v6267_v38 = vld [vmem:[#allocation5 + $0xc0] sm:$0xf] }
 0x3f9   :  { %v1869_v63 = vadd.f32 %v1850_v9, %v244_v48  ;;  %v1870_v3 = vadd.f32 %v1863_v7, %v273_v20  ;;  %v1826_v6 = vpop.f32.mrf.mxu0  ;;  %v1839_v31 = vpop.f32.mrf.mxu1  ;;  %v6120_v48 = vor.u32 %v7604_v45, %v6117_v14  ;;  %2380 = vmatpush.bf16.msra.mxu2 %v6116_v44  ;;  %v6059_v45 = vld [vmem:[#allocation3 + $0x20] sm:$0xf]  ;;  %v6061_v14 = vld [vmem:[#allocation3 + $0x30] sm:$0xf0]  ;;  %v7650_v5 = vld [vmem:[#allocation5 + $0xf4] sm:$0xf0] }
 0x3fa   :  { %v7602_v6 = vld [vmem:[#allocation3 + $0x74] sm:$0xf0]  ;;  %v6292_v33 = vor.u32 %v7650_v5, %v6291_v26 }
 0x3fb   :  { %v1873_v35 = vmul.f32 0.5, %v1869_v63  ;;  %7976 = vtanh.f32 %v1870_v3  ;;  %2393 = vmatpush.bf16.msra.mxu3 %v6120_v48  ;;  %v6093_v63 = vld [vmem:[#allocation3 + $0x70] sm:$0xf0]  ;;  %v6099_v3 = vld [vmem:[#allocation3 + $0x68] sm:$0xf] }
 0x3fc   :  { %v7973_v41 = vpop.eup %7972  ;;  %v6096_v31 = vor.u32 %v7599_v23, %v6093_v63  ;;  %v6100_v53 = vor.u32 %v7602_v6, %v6099_v3  ;;  %v7592_v48 = vld [vmem:[#allocation3 + $0x2c] sm:$0xf]  ;;  %v6283_v23 = vld [vmem:[#allocation5 + $0xe0] sm:$0xf]  ;;  %v7649_v63 = vld [vmem:[#allocation5 + $0xec] sm:$0xf0] }
 0x3fd   :  { %v7975_v12 = vpop.eup %7974  ;;  %v1877_v57 = vmul.f32 0.5, %v7973_v41  ;;  %7978 = vtanh.f32 %v1873_v35  ;;  %v6083_v35 = vld [vmem:[#allocation3 + $0x48] sm:$0xf]  ;;  %v7596_v41 = vld [vmem:[#allocation3 + $0x4c] sm:$0xf] }
 0x3fe   :  { %v1878_v29 = vmul.f32 0.5, %v7975_v12  ;;  %2368 = vmatpush.bf16.msrb.mxu1 %v6096_v31  ;;  %2381 = vmatpush.bf16.msra.mxu2 %v6100_v53  ;;  %v6084_v40 = vor.u32 %v7598_v36, %v6083_v35  ;;  %v6088_v43 = vor.u32 %v7596_v41, %v6085_v8  ;;  %v7593_v12 = vld [vmem:[#allocation3 + $0x2c] sm:$0xf0]  ;;  %v7647_v3 = vld [vmem:[#allocation5 + $0xe4] sm:$0xf]  ;;  %v6284_v31 = vor.u32 %v7649_v63, %v6283_v23 }
 0x3ff   :  { %v1880_v46 = vadd.f32 0.5, %v1877_v57  ;;  %2394 = vmatpush.bf16.msra.mxu3 %v6104_v59  ;;  %v7591_v57 = vld [vmem:[#allocation3 + $0x24] sm:$0xf]  ;;  %v6060_v19 = vor.u32 %v7593_v12, %v6059_v45  ;;  %v6285_v6 = vld [vmem:[#allocation5 + $0xf0] sm:$0xf0] }
 0x400   :  { %v1881_v50 = vadd.f32 0.5, %v1878_v29  ;;  %v1852_v61 = vpop.f32.mrf.mxu2  ;;  %v1865_v2 = vpop.f32.mrf.mxu3  ;;  %v6067_v29 = vld [vmem:[#allocation3 + $0x28] sm:$0xf]  ;;  %v6064_v44 = vor.u32 %v7591_v57, %v6061_v14  ;;  %v6288_v53 = vor.u32 %v7647_v3, %v6285_v6  ;;  %v7648_v59 = vld [vmem:[#allocation5 + $0xec] sm:$0xf] }
 0x401   :  { %v7977_v17 = vpop.eup %7976  ;;  %v6043_v2 = vld [vmem:[#allocation3] sm:$0xf]  ;;  %v6296_v60 = vor.u32 %v7648_v59, %v6293_v21  ;;  %v7643_v36 = vld [vmem:[#allocation5 + $0xc4] sm:$0xf]  ;;  %v7646_v8 = vld [vmem:[#allocation5 + $0xd4] sm:$0xf0] }
 0x402   :  { %v1884_v20 = vmul.f32 %v1881_v50, %v8500_v25  ;;  %v1885_v4 = vmul.f32 %v7977_v17, %v1880_v46  ;;  %v6091_v25 = vld [vmem:[#allocation3 + $0x60] sm:$0xf]  ;;  %2369 = vmatpush.bf16.msrb.mxu1 %v6080_v39  ;;  %2382 = vmatpush.bf16.msra.mxu2 %v6084_v40  ;;  %v6068_v46 = vor.u32 %v7594_v37, %v6067_v29  ;;  %v6069_v50 = vld [vmem:[#allocation3 + $0x38] sm:$0xf0]  ;;  %v7589_v17 = vld [vmem:[#allocation3 + $0xc] sm:$0xf0] }
 0x403   :  { %v7979_v10 = vpop.eup %7978  ;;  %v6092_v24 = vor.u32 %v7601_v18, %v6091_v25  ;;  %2395 = vmatpush.bf16.msra.mxu3 %v6088_v43  ;;  %v6072_v61 = vor.u32 %v7592_v48, %v6069_v50  ;;  %v7588_v25 = vld [vmem:[#allocation3 + $0xc] sm:$0xf]  ;;  %v6053_v18 = vld [vmem:[#allocation3 + $0x18] sm:$0xf0]  ;;  %v6269_v39 = vld [vmem:[#allocation5 + $0xd0] sm:$0xf0] }
 0x404   :  { %v8516_v62 = vadd.f32 %v1885_v4, %v1884_v20  ;;  %v1879_v16 = vmul.f32 0.5, %v7979_v10  ;;  %v7587_v20 = vld [vmem:[#allocation3 + $0x4] sm:$0xf]  ;;  %v6044_v4 = vor.u32 %v7589_v17, %v6043_v2  ;;  %v6045_v10 = vld [vmem:[#allocation3 + $0x10] sm:$0xf0]  ;;  %v6272_v41 = vor.u32 %v7643_v36, %v6269_v39 }
 0x405   :  { %2355 = vmatpush.bf16.msra.mxu0 %v6092_v24  ;;  %v6056_v24 = vor.u32 %v7588_v25, %v6053_v18  ;;  %v6275_v40 = vld [vmem:[#allocation5 + $0xc8] sm:$0xf]  ;;  %v7644_v43 = vld [vmem:[#allocation5 + $0xcc] sm:$0xf]  ;;  %v6277_v45 = vld [vmem:[#allocation5 + $0xd8] sm:$0xf0] }
 0x406   :  { %7980 = vtanh.f32 %v8516_v62  ;;  %v1882_v47 = vadd.f32 0.5, %v1879_v16  ;;  %2370 = vmatpush.bf16.msrb.mxu1 %v6064_v44  ;;  %2383 = vmatpush.bf16.msra.mxu2 %v6068_v46  ;;  %v6051_v16 = vld [vmem:[#allocation3 + $0x8] sm:$0xf]  ;;  %v6276_v12 = vor.u32 %v7646_v8, %v6275_v40  ;;  %v6280_v57 = vor.u32 %v7644_v43, %v6277_v45  ;;  %v7641_v14 = vld [vmem:[#allocation5 + $0xac] sm:$0xf0] }
 0x407   :  { %2396 = vmatpush.bf16.msra.mxu3 %v6072_v61  ;;  %v7639_v29 = vld [vmem:[#allocation5 + $0xa4] sm:$0xf]  ;;  %v6253_v37 = vld [vmem:[#allocation5 + $0xb0] sm:$0xf0]  ;;  %v6259_v44 = vld [vmem:[#allocation5 + $0xa8] sm:$0xf] }
 0x408   :  { %v7642_v46 = vld [vmem:[#allocation5 + $0xb4] sm:$0xf0]  ;;  %v6256_v50 = vor.u32 %v7639_v29, %v6253_v37  ;;  %v7640_v61 = vld [vmem:[#allocation5 + $0xac] sm:$0xf]  ;;  %v6261_v2 = vld [vmem:[#allocation5 + $0xb8] sm:$0xf0] }
 0x409   :  { %2356 = vmatpush.bf16.msra.mxu0 %v6076_v49  ;;  %v7645_v49 = vld [vmem:[#allocation5 + $0xcc] sm:$0xf0]  ;;  %v6235_v17 = vld [vmem:[#allocation5 + $0x80] sm:$0xf]  ;;  %v7636_v25 = vld [vmem:[#allocation5 + $0x8c] sm:$0xf] }
 0x40a   :  { %v6268_v35 = vor.u32 %v7645_v49, %v6267_v38  ;;  %v6245_v18 = vld [vmem:[#allocation5 + $0x98] sm:$0xf0]  ;;  %v6219_v6 = vld [vmem:[#allocation5 + $0x60] sm:$0xf]  ;;  %v6227_v21 = vld [vmem:[#allocation5 + $0x68] sm:$0xf] }
 0x40b   :  { %2397 = vmatpush.bf16.msra.mxu3 %v6056_v24  ;;  %v6248_v3 = vor.u32 %v7636_v25, %v6245_v18  ;;  %v7634_v38 = vld [vmem:[#allocation5 + $0x74] sm:$0xf0]  ;;  %v7632_v39 = vld [vmem:[#allocation5 + $0x6c] sm:$0xf]  ;;  %v6229_v40 = vld [vmem:[#allocation5 + $0x78] sm:$0xf0] }
 0x40c   :  { %v7981_v9 = vpop.eup %7980  ;;  %v6228_v36 = vor.u32 %v7634_v38, %v6227_v21  ;;  %v6232_v8 = vor.u32 %v7632_v39, %v6229_v40  ;;  %v7629_v43 = vld [vmem:[#allocation5 + $0x4c] sm:$0xf0]  ;;  %v7627_v45 = vld [vmem:[#allocation5 + $0x44] sm:$0xf]  ;;  %v6211_v37 = vld [vmem:[#allocation5 + $0x48] sm:$0xf] }
 0x40d   :  { %v8519_v7 = vmul.f32 %v7981_v9, %v1882_v47  ;;  %2357 = vmatpush.bf16.msra.mxu0 %v6060_v19  ;;  %v7590_v47 = vld [vmem:[#allocation3 + $0x14] sm:$0xf0]  ;;  %v6048_v9 = vor.u32 %v7587_v20, %v6045_v10  ;;  %v6251_v19 = vld [vmem:[#allocation5 + $0xa0] sm:$0xf]  ;;  %v6260_v20 = vor.u32 %v7642_v46, %v6259_v44  ;;  %v7635_v10 = vld [vmem:[#allocation5 + $0x84] sm:$0xf] }
 0x40e   :  { %v6252_v48 = vor.u32 %v7641_v14, %v6251_v19  ;;  %v7628_v44 = vld [vmem:[#allocation5 + $0x4c] sm:$0xf]  ;;  %v6213_v46 = vld [vmem:[#allocation5 + $0x58] sm:$0xf0]  ;;  %v6171_v18 = vld [vmem:[#allocation5] sm:$0xf] }
 0x40f   :  { %v1890_v22 = vpack.c.bf16 %v8519_v7, %v8519_v7  ;;  %2371 = vmatpush.bf16.msrb.mxu1 %v6048_v9  ;;  %v6243_v9 = vld [vmem:[#allocation5 + $0x88] sm:$0xf]  ;;  %v6197_v25 = vld [vmem:[#allocation5 + $0x38] sm:$0xf0]  ;;  %v7620_v38 = vld [vmem:[#allocation5 + $0xc] sm:$0xf] }
 0x411   :  { %2091 = vmatmul.bf16.vlgmr.msrb.gmra.mxu0 %v1890_v22  ;;  %2104 = vmatmul.bf16.vlgmr.msra.gmra.mxu1 %v1890_v22 }
 0x412   :  { %2117 = vmatmul.bf16.vlgmr.msrb.gmra.mxu2 %v1890_v22  ;;  %2130 = vmatmul.bf16.vlgmr.msrb.gmra.mxu3 %v1890_v22  ;;  %v6052_v22 = vor.u32 %v7590_v47, %v6051_v16  ;;  %v6237_v16 = vld [vmem:[#allocation5 + $0x90] sm:$0xf0]  ;;  %v6264_v47 = vor.u32 %v7640_v61, %v6261_v2  ;;  %v7625_v61 = vld [vmem:[#allocation5 + $0x2c] sm:$0xf0]  ;;  %v7623_v2 = vld [vmem:[#allocation5 + $0x24] sm:$0xf] }
 0x413   :  { %2358 = vmatpush.bf16.msra.mxu0 %v6044_v4  ;;  %2669 = vmatpush.bf16.msra.mxu1 %v6288_v53  ;;  %v7637_v4 = vld [vmem:[#allocation5 + $0x8c] sm:$0xf0]  ;;  %v6240_v24 = vor.u32 %v7635_v10, %v6237_v16  ;;  %v7631_v53 = vld [vmem:[#allocation5 + $0x64] sm:$0xf]  ;;  %v7624_v10 = vld [vmem:[#allocation5 + $0x2c] sm:$0xf] }
 0x414   :  { %2384 = vmatpush.bf16.msra.mxu2 %v6052_v22  ;;  %2727 = vmatpush.bf16.msrb.mxu3 %v6296_v60  ;;  %v7638_v22 = vld [vmem:[#allocation5 + $0x94] sm:$0xf0]  ;;  %v6236_v23 = vor.u32 %v7637_v4, %v6235_v17  ;;  %v6189_v17 = vld [vmem:[#allocation5 + $0x30] sm:$0xf0] }
 0x415   :  { %v6244_v63 = vor.u32 %v7638_v22, %v6243_v9  ;;  %v7626_v4 = vld [vmem:[#allocation5 + $0x34] sm:$0xf0]  ;;  %v6192_v22 = vor.u32 %v7623_v2, %v6189_v17  ;;  %v7679_v2 = vld [vmem:[#allocation7 + $0xe4] sm:$0xf] }
 0x417   :  { %2640 = vmatpush.bf16.msrb.mxu0 %v6284_v31  ;;  %2670 = vmatpush.bf16.msra.mxu1 %v6272_v41  ;;  %v7633_v31 = vld [vmem:[#allocation5 + $0x6c] sm:$0xf0]  ;;  %v6203_v41 = vld [vmem:[#allocation5 + $0x40] sm:$0xf] }
 0x418   :  { %2698 = vmatpush.bf16.msrb.mxu2 %v6292_v33  ;;  %2728 = vmatpush.bf16.msrb.mxu3 %v6280_v57  ;;  %v6220_v59 = vor.u32 %v7633_v31, %v6219_v6  ;;  %v6221_v33 = vld [vmem:[#allocation5 + $0x70] sm:$0xf0]  ;;  %v6204_v14 = vor.u32 %v7629_v43, %v6203_v41  ;;  %v7621_v31 = vld [vmem:[#allocation5 + $0xc] sm:$0xf0] }
 0x41b   :  { %2641 = vmatpush.bf16.msrb.mxu0 %v6268_v35  ;;  %2671 = vmatpush.bf16.msra.mxu1 %v6256_v50  ;;  %v6224_v35 = vor.u32 %v7631_v53, %v6221_v33  ;;  %v6216_v50 = vor.u32 %v7628_v44, %v6213_v46  ;;  %v7619_v53 = vld [vmem:[#allocation5 + $0x4] sm:$0xf]  ;;  %v7622_v33 = vld [vmem:[#allocation5 + $0x14] sm:$0xf0] }
 0x41c   :  { %2699 = vmatpush.bf16.msrb.mxu2 %v6276_v12  ;;  %2729 = vmatpush.bf16.msrb.mxu3 %v6264_v47  ;;  %v6205_v12 = vld [vmem:[#allocation5 + $0x50] sm:$0xf0] }
 0x41d   :  { %v6208_v29 = vor.u32 %v7627_v45, %v6205_v12 }
 0x41f   :  { %2642 = vmatpush.bf16.msrb.mxu0 %v6252_v48  ;;  %2672 = vmatpush.bf16.msra.mxu1 %v6240_v24  ;;  %v6187_v48 = vld [vmem:[#allocation5 + $0x20] sm:$0xf] }
 0x420   :  { %2700 = vmatpush.bf16.msrb.mxu2 %v6260_v20  ;;  %2730 = vmatpush.bf16.msrb.mxu3 %v6248_v3  ;;  %v6195_v20 = vld [vmem:[#allocation5 + $0x28] sm:$0xf]  ;;  %v6188_v9 = vor.u32 %v7625_v61, %v6187_v48  ;;  %v7681_v61 = vld [vmem:[#allocation7 + $0xec] sm:$0xf0] }
 0x421   :  { %v6196_v6 = vor.u32 %v7626_v4, %v6195_v20  ;;  %v6415_v20 = vld [vmem:[#allocation7 + $0xf0] sm:$0xf0]  ;;  %v7680_v4 = vld [vmem:[#allocation7 + $0xec] sm:$0xf] }
 0x423   :  { %2643 = vmatpush.bf16.msrb.mxu0 %v6236_v23  ;;  %2673 = vmatpush.bf16.msra.mxu1 %v6224_v35 }
 0x424   :  { %2701 = vmatpush.bf16.msrb.mxu2 %v6244_v63  ;;  %2731 = vmatpush.bf16.msrb.mxu3 %v6232_v8 }
 0x427   :  { %2644 = vmatpush.bf16.msrb.mxu0 %v6220_v59  ;;  %2674 = vmatpush.bf16.msra.mxu1 %v6208_v29  ;;  %v6179_v59 = vld [vmem:[#allocation5 + $0x8] sm:$0xf] }
 0x428   :  { %2702 = vmatpush.bf16.msrb.mxu2 %v6228_v36  ;;  %2732 = vmatpush.bf16.msrb.mxu3 %v6216_v50  ;;  %v6180_v39 = vor.u32 %v7622_v33, %v6179_v59  ;;  %v6413_v50 = vld [vmem:[#allocation7 + $0xe0] sm:$0xf]  ;;  %v7673_v59 = vld [vmem:[#allocation7 + $0xac] sm:$0xf0] }
 0x429   :  { %v6414_v17 = vor.u32 %v7681_v61, %v6413_v50 }
 0x42b   :  { %2645 = vmatpush.bf16.msrb.mxu0 %v6204_v14  ;;  %2675 = vmatpush.bf16.msra.mxu1 %v6192_v22  ;;  %v7682_v22 = vld [vmem:[#allocation7 + $0xf4] sm:$0xf0] }
 0x42f   :  { %2646 = vmatpush.bf16.msrb.mxu0 %v6188_v9  ;;  %v6421_v9 = vld [vmem:[#allocation7 + $0xe8] sm:$0xf] }
 0x48e   :  { %v2092_v26 = vpop.f32.mrf.mxu0  ;;  %v2105_v5 = vpop.f32.mrf.mxu1 }
 0x48f   :  { %v2135_v49 = vadd.f32 %v2092_v26, %v8354_v55  ;;  %v2136_v60 = vadd.f32 %v2105_v5, %v8431_v30  ;;  %v7630_v55 = vld [vmem:[#allocation5 + $0x54] sm:$0xf0]  ;;  %v6173_v26 = vld [vmem:[#allocation5 + $0x10] sm:$0xf0]  ;;  %v6200_v5 = vor.u32 %v7624_v10, %v6197_v25  ;;  %v6423_v10 = vld [vmem:[#allocation7 + $0xf8] sm:$0xf0] }
 0x490   :  { %v6212_v30 = vor.u32 %v7630_v55, %v6211_v37  ;;  %v6397_v25 = vld [vmem:[#allocation7 + $0xc0] sm:$0xf] }
 0x491   :  { %v2139_v57 = vmul.f32 0.5, %v2135_v49  ;;  %v2140_v19 = vmul.f32 0.5, %v2136_v60  ;;  %v6181_v49 = vld [vmem:[#allocation5 + $0x18] sm:$0xf0]  ;;  %2733 = vmatpush.bf16.msrb.mxu3 %v6200_v5  ;;  %v6381_v5 = vld [vmem:[#allocation7 + $0xa0] sm:$0xf] }
 0x492   :  { %2703 = vmatpush.bf16.msrb.mxu2 %v6212_v30  ;;  %v6184_v41 = vor.u32 %v7620_v38, %v6181_v49  ;;  %v6383_v38 = vld [vmem:[#allocation7 + $0xb0] sm:$0xf0]  ;;  %v7672_v49 = vld [vmem:[#allocation7 + $0xac] sm:$0xf] }
 0x493   :  { %7982 = vtanh.f32 %v2139_v57 }
 0x494   :  { %7984 = vtanh.f32 %v2140_v19 }
 0x495   :  { %v2118_v16 = vpop.f32.mrf.mxu2  ;;  %v2131_v47 = vpop.f32.mrf.mxu3  ;;  %2734 = vmatpush.bf16.msrb.mxu3 %v6184_v41  ;;  %v7674_v41 = vld [vmem:[#allocation7 + $0xb4] sm:$0xf0] }
 0x496   :  { %v2137_v23 = vadd.f32 %v2118_v16, %v8419_v13  ;;  %v2138_v24 = vadd.f32 %v2131_v47, %v8422_v28  ;;  %v2094_v63 = vpop.f32.mrf.mxu0  ;;  %v2107_v3 = vpop.f32.mrf.mxu1  ;;  %v6172_v13 = vor.u32 %v7621_v31, %v6171_v18  ;;  %v6176_v28 = vor.u32 %v7619_v53, %v6173_v26  ;;  %2704 = vmatpush.bf16.msrb.mxu2 %v6196_v6  ;;  %v6407_v6 = vld [vmem:[#allocation7 + $0xd8] sm:$0xf0]  ;;  %v6405_v31 = vld [vmem:[#allocation7 + $0xc8] sm:$0xf]  ;;  %v7678_v26 = vld [vmem:[#allocation7 + $0xd4] sm:$0xf0] }
 0x497   :  { %v6418_v16 = vor.u32 %v7679_v2, %v6415_v20  ;;  %v6426_v47 = vor.u32 %v7680_v4, %v6423_v10  ;;  %v6422_v18 = vor.u32 %v7682_v22, %v6421_v9  ;;  %v7676_v3 = vld [vmem:[#allocation7 + $0xcc] sm:$0xf]  ;;  %v6406_v33 = vor.u32 %v7678_v26, %v6405_v31  ;;  %v6357_v20 = vld [vmem:[#allocation7 + $0x68] sm:$0xf]  ;;  %v7666_v10 = vld [vmem:[#allocation7 + $0x74] sm:$0xf0] }
 0x498   :  { %v2141_v21 = vmul.f32 0.5, %v2137_v23  ;;  %7986 = vtanh.f32 %v2138_v24  ;;  %2647 = vmatpush.bf16.msrb.mxu0 %v6172_v13  ;;  %2676 = vmatpush.bf16.msra.mxu1 %v6176_v28  ;;  %v7677_v23 = vld [vmem:[#allocation7 + $0xcc] sm:$0xf0]  ;;  %v6410_v53 = vor.u32 %v7676_v3, %v6407_v6  ;;  %v6391_v13 = vld [vmem:[#allocation7 + $0xb8] sm:$0xf0]  ;;  %v191_v31 = vadd.f32 %v8362_v58, %v8349_v52 }
 0x499   :  { %v7983_v60 = vpop.eup %7982  ;;  %v6398_v24 = vor.u32 %v7677_v23, %v6397_v25  ;;  %v7664_v2 = vld [vmem:[#allocation7 + $0x6c] sm:$0xf]  ;;  %v7661_v9 = vld [vmem:[#allocation7 + $0x4c] sm:$0xf0]  ;;  %v7659_v22 = vld [vmem:[#allocation7 + $0x44] sm:$0xf] }
 0x49a   :  { %v7985_v35 = vpop.eup %7984  ;;  %v2145_v36 = vmul.f32 0.5, %v7983_v60  ;;  %7988 = vtanh.f32 %v2141_v21  ;;  %2705 = vmatpush.bf16.msrb.mxu2 %v6180_v39  ;;  %v7671_v21 = vld [vmem:[#allocation7 + $0xa4] sm:$0xf]  ;;  %v6382_v60 = vor.u32 %v7673_v59, %v6381_v5  ;;  %v2436_v39 = vpack.c.bf16 %v8519_v7, %v8503_v15  ;;  %v6349_v15 = vld [vmem:[#allocation7 + $0x60] sm:$0xf] }
 0x49b   :  { %v2146_v40 = vmul.f32 0.5, %v7985_v35  ;;  %v6386_v28 = vor.u32 %v7671_v21, %v6383_v38  ;;  %v6394_v35 = vor.u32 %v7672_v49, %v6391_v13  ;;  %v6335_v25 = vld [vmem:[#allocation7 + $0x50] sm:$0xf0]  ;;  %v7660_v23 = vld [vmem:[#allocation7 + $0x4c] sm:$0xf] }
 0x49c   :  { %v2148_v8 = vadd.f32 0.5, %v2145_v36  ;;  %v2435_v36 = vpack.c.bf16 %v8491_v51, %v8475_v56  ;;  %v6367_v56 = vld [vmem:[#allocation7 + $0x90] sm:$0xf0]  ;;  %v7668_v51 = vld [vmem:[#allocation7 + $0x8c] sm:$0xf] }
 0x49d   :  { %v2149_v43 = vadd.f32 0.5, %v2146_v40  ;;  %v2120_v45 = vpop.f32.mrf.mxu2  ;;  %v2133_v12 = vpop.f32.mrf.mxu3  ;;  %v6389_v40 = vld [vmem:[#allocation7 + $0xa8] sm:$0xf]  ;;  %v7662_v3 = vld [vmem:[#allocation7 + $0x54] sm:$0xf0] }
 0x49e   :  { %v7987_v57 = vpop.eup %7986  ;;  %v7669_v45 = vld [vmem:[#allocation7 + $0x8c] sm:$0xf0]  ;;  %v7667_v12 = vld [vmem:[#allocation7 + $0x84] sm:$0xf]  ;;  %v6317_v21 = vld [vmem:[#allocation7 + $0x20] sm:$0xf] }
 0x49f   :  { %v2152_v19 = vmul.f32 %v2149_v43, %v8516_v62  ;;  %v2153_v14 = vmul.f32 %v7987_v57, %v2148_v8  ;;  %v2434_v62 = vpack.c.bf16 %v8463_v42, %v8447_v34  ;;  %v7675_v34 = vld [vmem:[#allocation7 + $0xc4] sm:$0xf]  ;;  %v6399_v42 = vld [vmem:[#allocation7 + $0xd0] sm:$0xf0]  ;;  %v6390_v8 = vor.u32 %v7674_v41, %v6389_v40  ;;  %v6365_v43 = vld [vmem:[#allocation7 + $0x80] sm:$0xf] }
 0x4a0   :  { %v7989_v29 = vpop.eup %7988  ;;  %v6402_v63 = vor.u32 %v7675_v34, %v6399_v42  ;;  %v6366_v57 = vor.u32 %v7669_v45, %v6365_v43  ;;  %v6343_v34 = vld [vmem:[#allocation7 + $0x58] sm:$0xf0]  ;;  %v6341_v42 = vld [vmem:[#allocation7 + $0x48] sm:$0xf]  ;;  %v7657_v38 = vld [vmem:[#allocation7 + $0x2c] sm:$0xf0]  ;;  %v249_v41 = vadd.f32 %v8426_v27, %v8373_v0 }
 0x4a1   :  { %v8528_v37 = vadd.f32 %v2153_v14, %v2152_v19  ;;  %v2147_v55 = vmul.f32 0.5, %v7989_v29  ;;  %v6375_v19 = vld [vmem:[#allocation7 + $0x98] sm:$0xf0]  ;;  %v6370_v14 = vor.u32 %v7667_v12, %v6367_v56  ;;  %v6342_v6 = vor.u32 %v7662_v3, %v6341_v42  ;;  %v7655_v49 = vld [vmem:[#allocation7 + $0x24] sm:$0xf] }
 0x4a2   :  { %v6378_v29 = vor.u32 %v7668_v51, %v6375_v19  ;;  %v6319_v13 = vld [vmem:[#allocation7 + $0x30] sm:$0xf0]  ;;  %v6301_v19 = vld [vmem:[#allocation7] sm:$0xf] }
 0x4a3   :  { %7990 = vtanh.f32 %v8528_v37  ;;  %v2150_v30 = vadd.f32 0.5, %v2147_v55  ;;  %v6373_v55 = vld [vmem:[#allocation7 + $0x88] sm:$0xf]  ;;  %v6322_v58 = vor.u32 %v7655_v49, %v6319_v13 }
 0x4a9   :  { %v7991_v44 = vpop.eup %7990 }
 0x4aa   :  { %v8531_v46 = vmul.f32 %v7991_v44, %v2150_v30  ;;  %v7670_v30 = vld [vmem:[#allocation7 + $0x94] sm:$0xf0]  ;;  %v7665_v44 = vld [vmem:[#allocation7 + $0x6c] sm:$0xf0] }
 0x4ab   :  { %v6374_v7 = vor.u32 %v7670_v30, %v6373_v55  ;;  %v6350_v50 = vor.u32 %v7665_v44, %v6349_v15  ;;  %v6303_v30 = vld [vmem:[#allocation7 + $0x10] sm:$0xf0]  ;;  %v7652_v15 = vld [vmem:[#allocation7 + $0xc] sm:$0xf] }
 0x4ac   :  { %v2158_v48 = vpack.c.bf16 %v8531_v46, %v8531_v46 }
 0x4ae   :  { %2359 = vmatmul.bf16.vlgmr.msra.gmra.mxu0 %v2158_v48  ;;  %2372 = vmatmul.bf16.vlgmr.msrb.gmra.mxu1 %v2158_v48 }
 0x4af   :  { %2385 = vmatmul.bf16.vlgmr.msra.gmra.mxu2 %v2158_v48  ;;  %2398 = vmatmul.bf16.vlgmr.msra.gmra.mxu3 %v2158_v48  ;;  %v7663_v48 = vld [vmem:[#allocation7 + $0x64] sm:$0xf] }
 0x4b0   :  { %2953 = vmatpush.bf16.msra.mxu0 %v6414_v17  ;;  %2966 = vmatpush.bf16.msrb.mxu1 %v6418_v16  ;;  %v6359_v17 = vld [vmem:[#allocation7 + $0x78] sm:$0xf0]  ;;  %v6333_v16 = vld [vmem:[#allocation7 + $0x40] sm:$0xf] }
 0x4b1   :  { %2992 = vmatpush.bf16.msra.mxu3 %v6426_v47  ;;  %2979 = vmatpush.bf16.msra.mxu2 %v6422_v18  ;;  %v6362_v4 = vor.u32 %v7664_v2, %v6359_v17  ;;  %v6358_v47 = vor.u32 %v7666_v10, %v6357_v20  ;;  %v6334_v18 = vor.u32 %v7661_v9, %v6333_v16 }
 0x4b4   :  { %2954 = vmatpush.bf16.msra.mxu0 %v6398_v24  ;;  %2967 = vmatpush.bf16.msrb.mxu1 %v6402_v63  ;;  %v6338_v24 = vor.u32 %v7659_v22, %v6335_v25  ;;  %v6346_v63 = vor.u32 %v7660_v23, %v6343_v34 }
 0x4b5   :  { %2993 = vmatpush.bf16.msra.mxu3 %v6410_v53  ;;  %2980 = vmatpush.bf16.msra.mxu2 %v6406_v33  ;;  %v220_v53 = vadd.f32 %v8435_v32, %v8389_v11  ;;  %v6325_v11 = vld [vmem:[#allocation7 + $0x28] sm:$0xf]  ;;  %v7658_v32 = vld [vmem:[#allocation7 + $0x34] sm:$0xf0] }
 0x4b6   :  { %v6326_v40 = vor.u32 %v7658_v32, %v6325_v11  ;;  %v7711_v11 = vld [vmem:[#allocation7 + $0xe4] sm:$0xf] }
 0x4b8   :  { %2955 = vmatpush.bf16.msra.mxu0 %v6382_v60  ;;  %2968 = vmatpush.bf16.msrb.mxu1 %v6386_v28  ;;  %v6318_v60 = vor.u32 %v7657_v38, %v6317_v21  ;;  %v7656_v28 = vld [vmem:[#allocation7 + $0x2c] sm:$0xf] }
 0x4b9   :  { %2994 = vmatpush.bf16.msra.mxu3 %v6394_v35  ;;  %2981 = vmatpush.bf16.msra.mxu2 %v6390_v8  ;;  %v6327_v35 = vld [vmem:[#allocation7 + $0x38] sm:$0xf0]  ;;  %v278_v8 = vadd.f32 %v8428_v54, %v8375_v1  ;;  %v6309_v1 = vld [vmem:[#allocation7 + $0x8] sm:$0xf]  ;;  %v7654_v54 = vld [vmem:[#allocation7 + $0x14] sm:$0xf0] }
 0x4bc   :  { %2956 = vmatpush.bf16.msra.mxu0 %v6366_v57  ;;  %2969 = vmatpush.bf16.msrb.mxu1 %v6370_v14  ;;  %v7653_v14 = vld [vmem:[#allocation7 + $0xc] sm:$0xf0] }
 0x4bd   :  { %2995 = vmatpush.bf16.msra.mxu3 %v6378_v29  ;;  %2982 = vmatpush.bf16.msra.mxu2 %v6374_v7  ;;  %v7651_v29 = vld [vmem:[#allocation7 + $0x4] sm:$0xf]  ;;  %v6302_v55 = vor.u32 %v7653_v14, %v6301_v19  ;;  %v6311_v7 = vld [vmem:[#allocation7 + $0x18] sm:$0xf0]  ;;  %v7709_v19 = vld [vmem:[#allocation7 + $0xcc] sm:$0xf0] }
 0x4be   :  { %2648 = vmatmul.bf16.vlgmr.msrb.gmra.mxu0 %v2434_v62  ;;  %2677 = vmatmul.bf16.vlgmr.msra.gmra.mxu1 %v2434_v62  ;;  %v6306_v0 = vor.u32 %v7651_v29, %v6303_v30  ;;  %v6314_v27 = vor.u32 %v7652_v15, %v6311_v7  ;;  %v7707_v14 = vld [vmem:[#allocation7 + $0xc4] sm:$0xf]  ;;  %v6533_v30 = vld [vmem:[#allocation7 + $0xc8] sm:$0xf]  ;;  %v7710_v15 = vld [vmem:[#allocation7 + $0xd4] sm:$0xf0] }
 0x4bf   :  { %2706 = vmatmul.bf16.vlgmr.msrb.gmra.mxu2 %v2434_v62  ;;  %2735 = vmatmul.bf16.vlgmr.msrb.gmra.mxu3 %v2434_v62  ;;  %v6351_v62 = vld [vmem:[#allocation7 + $0x70] sm:$0xf0] }
 0x4c0   :  { %v6354_v61 = vor.u32 %v7663_v48, %v6351_v62  ;;  %2957 = vmatpush.bf16.msra.mxu0 %v6350_v50  ;;  %v6310_v62 = vor.u32 %v7654_v54, %v6309_v1 }
 0x4c1   :  { %2996 = vmatpush.bf16.msra.mxu3 %v6362_v4  ;;  %2983 = vmatpush.bf16.msra.mxu2 %v6358_v47 }
 0x4c2   :  { %2970 = vmatpush.bf16.msrb.mxu1 %v6354_v61 }
 0x4c4   :  { %2958 = vmatpush.bf16.msra.mxu0 %v6334_v18 }
 0x4c5   :  { %2997 = vmatpush.bf16.msra.mxu3 %v6346_v63  ;;  %2984 = vmatpush.bf16.msra.mxu2 %v6342_v6  ;;  %v6297_v63 = vld [vmem:[%s8816_s1 + $0x8] sm:$0xff] }
 0x4c6   :  { %2971 = vmatpush.bf16.msrb.mxu1 %v6338_v24  ;;  %v2760_v3 = vpack.c.bf16 %v6297_v63, %v6297_v63  ;;  %v6495_v63 = vld [vmem:[#allocation7 + $0x90] sm:$0xf0] }
 0x4c8   :  { %2959 = vmatpush.bf16.msra.mxu0 %v6318_v60 }
 0x4c9   :  { %2985 = vmatpush.bf16.msra.mxu2 %v6326_v40  ;;  %v6543_v40 = vld [vmem:[#allocation7 + $0xf0] sm:$0xf0] }
 0x4ca   :  { %2972 = vmatpush.bf16.msrb.mxu1 %v6322_v58  ;;  %v6541_v58 = vld [vmem:[#allocation7 + $0xe0] sm:$0xf] }
 0x4cc   :  { %2960 = vmatpush.bf16.msra.mxu0 %v6302_v55  ;;  %v6527_v55 = vld [vmem:[#allocation7 + $0xd0] sm:$0xf0] }
 0x4cd   :  { %2986 = vmatpush.bf16.msra.mxu2 %v6310_v62  ;;  %v6530_v7 = vor.u32 %v7707_v14, %v6527_v55  ;;  %v6509_v62 = vld [vmem:[#allocation7 + $0xa0] sm:$0xf] }
 0x4ce   :  { %2653 = vmatmul.bf16.gmra.mxu0 %v2435_v36  ;;  %2682 = vmatmul.bf16.gmra.mxu1 %v2435_v36 }
 0x4cf   :  { %2711 = vmatmul.bf16.gmra.mxu2 %v2435_v36  ;;  %2740 = vmatmul.bf16.gmra.mxu3 %v2435_v36 }
 0x4d0   :  { %2973 = vmatpush.bf16.msrb.mxu1 %v6306_v0  ;;  %v7708_v0 = vld [vmem:[#allocation7 + $0xcc] sm:$0xf] }
 0x4de   :  { %2658 = vmatmul.bf16.gmra.mxu0 %v2436_v39  ;;  %2687 = vmatmul.bf16.gmra.mxu1 %v2436_v39 }
 0x4df   :  { %2716 = vmatmul.bf16.gmra.mxu2 %v2436_v39  ;;  %2745 = vmatmul.bf16.gmra.mxu3 %v2436_v39  ;;  %v6330_v39 = vor.u32 %v7656_v28, %v6327_v35 }
 0x4e1   :  { %2998 = vmatpush.bf16.msra.mxu3 %v6330_v39  ;;  %v7713_v39 = vld [vmem:[#allocation7 + $0xec] sm:$0xf0] }
 0x4e2   :  { %v6542_v32 = vor.u32 %v7713_v39, %v6541_v58  ;;  %v7702_v58 = vld [vmem:[#allocation7 + $0x94] sm:$0xf0] }
 0x4e4   :  { %3221 = vmatpush.bf16.msrb.mxu0 %v6542_v32  ;;  %v7700_v32 = vld [vmem:[#allocation7 + $0x8c] sm:$0xf] }
 0x4e5   :  { %2999 = vmatpush.bf16.msra.mxu3 %v6314_v27  ;;  %v6535_v27 = vld [vmem:[#allocation7 + $0xd8] sm:$0xf0] }
 0x52b   :  { %v2360_v26 = vpop.f32.mrf.mxu0  ;;  %v2373_v5 = vpop.f32.mrf.mxu1 }
 0x52c   :  { %v2403_v59 = vadd.f32 %v2360_v26, %v191_v31  ;;  %v2404_v33 = vadd.f32 %v2373_v5, %v220_v53 }
 0x52e   :  { %v2407_v36 = vmul.f32 0.5, %v2403_v59  ;;  %v2408_v52 = vmul.f32 0.5, %v2404_v33 }
 0x530   :  { %7992 = vtanh.f32 %v2407_v36 }
 0x531   :  { %7994 = vtanh.f32 %v2408_v52 }
 0x532   :  { %v2386_v43 = vpop.f32.mrf.mxu2  ;;  %v2399_v45 = vpop.f32.mrf.mxu3 }
 0x533   :  { %v2405_v12 = vadd.f32 %v2386_v43, %v249_v41  ;;  %v2406_v57 = vadd.f32 %v2399_v45, %v278_v8  ;;  %v2362_v56 = vpop.f32.mrf.mxu0  ;;  %v2375_v51 = vpop.f32.mrf.mxu1  ;;  %v6549_v41 = vld [vmem:[#allocation7 + $0xe8] sm:$0xf]  ;;  %v7714_v8 = vld [vmem:[#allocation7 + $0xf4] sm:$0xf0]  ;;  %v6546_v43 = vor.u32 %v7711_v11, %v6543_v40  ;;  %v6503_v40 = vld [vmem:[#allocation7 + $0x98] sm:$0xf0] }
 0x534   :  { %v6550_v45 = vor.u32 %v7714_v8, %v6549_v41  ;;  %v6525_v51 = vld [vmem:[#allocation7 + $0xc0] sm:$0xf]  ;;  %v6506_v41 = vor.u32 %v7700_v32, %v6503_v40  ;;  %v7688_v40 = vld [vmem:[#allocation7 + $0x2c] sm:$0xf] }
 0x535   :  { %v2409_v44 = vmul.f32 0.5, %v2405_v12  ;;  %7996 = vtanh.f32 %v2406_v57  ;;  %v7712_v12 = vld [vmem:[#allocation7 + $0xec] sm:$0xf]  ;;  %v6551_v57 = vld [vmem:[#allocation7 + $0xf8] sm:$0xf0]  ;;  %3234 = vmatpush.bf16.msra.mxu1 %v6546_v43  ;;  %v6526_v29 = vor.u32 %v7709_v19, %v6525_v51 }
 0x536   :  { %v7993_v48 = vpop.eup %7992  ;;  %v6554_v56 = vor.u32 %v7712_v12, %v6551_v57  ;;  %3247 = vmatpush.bf16.msrb.mxu2 %v6550_v45  ;;  %v6477_v8 = vld [vmem:[#allocation7 + $0x60] sm:$0xf]  ;;  %v7697_v43 = vld [vmem:[#allocation7 + $0x6c] sm:$0xf0]  ;;  %v6479_v51 = vld [vmem:[#allocation7 + $0x70] sm:$0xf0] }
 0x537   :  { %v7995_v50 = vpop.eup %7994  ;;  %v2413_v61 = vmul.f32 0.5, %v7993_v48  ;;  %7998 = vtanh.f32 %v2409_v44  ;;  %v6534_v44 = vor.u32 %v7710_v15, %v6533_v30  ;;  %3222 = vmatpush.bf16.msrb.mxu0 %v6526_v29  ;;  %v6538_v48 = vor.u32 %v7708_v0, %v6535_v27  ;;  %v6485_v19 = vld [vmem:[#allocation7 + $0x68] sm:$0xf]  ;;  %v7698_v30 = vld [vmem:[#allocation7 + $0x74] sm:$0xf0] }
 0x538   :  { %v2414_v2 = vmul.f32 0.5, %v7995_v50  ;;  %3260 = vmatpush.bf16.msrb.mxu3 %v6554_v56  ;;  %v7705_v50 = vld [vmem:[#allocation7 + $0xac] sm:$0xf0]  ;;  %v6478_v57 = vor.u32 %v7697_v43, %v6477_v8  ;;  %v7695_v56 = vld [vmem:[#allocation7 + $0x64] sm:$0xf] }
 0x539   :  { %v2416_v17 = vadd.f32 0.5, %v2413_v61  ;;  %3235 = vmatpush.bf16.msra.mxu1 %v6530_v7  ;;  %v7703_v61 = vld [vmem:[#allocation7 + $0xa4] sm:$0xf]  ;;  %v6482_v55 = vor.u32 %v7695_v56, %v6479_v51  ;;  %v7696_v15 = vld [vmem:[#allocation7 + $0x6c] sm:$0xf] }
 0x53a   :  { %v2417_v20 = vadd.f32 0.5, %v2414_v2  ;;  %v2388_v4 = vpop.f32.mrf.mxu2  ;;  %v2401_v10 = vpop.f32.mrf.mxu3  ;;  %3248 = vmatpush.bf16.msrb.mxu2 %v6534_v44  ;;  %v6510_v2 = vor.u32 %v7705_v50, %v6509_v62  ;;  %v6487_v7 = vld [vmem:[#allocation7 + $0x78] sm:$0xf0]  ;;  %v6486_v44 = vor.u32 %v7698_v30, %v6485_v19  ;;  %v6461_v27 = vld [vmem:[#allocation7 + $0x40] sm:$0xf] }
 0x53b   :  { %v7997_v16 = vpop.eup %7996  ;;  %v8556_v6 = vpop.f32.mrf.mxu1  ;;  %v7706_v4 = vld [vmem:[#allocation7 + $0xb4] sm:$0xf0]  ;;  %v6490_v0 = vor.u32 %v7696_v15, %v6487_v7  ;;  %v7691_v62 = vld [vmem:[#allocation7 + $0x44] sm:$0xf]  ;;  %v6429_v8 = vld [vmem:[#allocation7] sm:$0xf] }
 0x53c   :  { %v2420_v47 = vmul.f32 %v2417_v20, %v8528_v37  ;;  %v2421_v9 = vmul.f32 %v7997_v16, %v2416_v17  ;;  %v8554_v37 = vpop.f32.mrf.mxu0  ;;  %3261 = vmatpush.bf16.msrb.mxu3 %v6538_v48  ;;  %v6511_v17 = vld [vmem:[#allocation7 + $0xb0] sm:$0xf0]  ;;  %v6517_v20 = vld [vmem:[#allocation7 + $0xa8] sm:$0xf]  ;;  %3223 = vmatpush.bf16.msrb.mxu0 %v6510_v2  ;;  %v7693_v48 = vld [vmem:[#allocation7 + $0x4c] sm:$0xf0] }
 0x53d   :  { %v7999_v22 = vpop.eup %7998  ;;  %v6462_v50 = vor.u32 %v7693_v48, %v6461_v27  ;;  %v6469_v2 = vld [vmem:[#allocation7 + $0x48] sm:$0xf]  ;;  %v7685_v51 = vld [vmem:[#allocation7 + $0xc] sm:$0xf0]  ;;  %v7683_v19 = vld [vmem:[#allocation7 + $0x4] sm:$0xf] }
 0x53e   :  { %v2422_v25 = vadd.f32 %v2421_v9, %v2420_v47  ;;  %v2415_v18 = vmul.f32 0.5, %v7999_v22  ;;  %v6514_v47 = vor.u32 %v7703_v61, %v6511_v17  ;;  %v6518_v9 = vor.u32 %v7706_v4, %v6517_v20  ;;  %v7704_v22 = vld [vmem:[#allocation7 + $0xac] sm:$0xf]  ;;  %v6463_v61 = vld [vmem:[#allocation7 + $0x50] sm:$0xf0] }
 0x53f   :  { %v7694_v17 = vld [vmem:[#allocation7 + $0x54] sm:$0xf0]  ;;  %v6466_v20 = vor.u32 %v7691_v62, %v6463_v61  ;;  %v6430_v30 = vor.u32 %v7685_v51, %v6429_v8  ;;  %v6437_v15 = vld [vmem:[#allocation7 + $0x8] sm:$0xf]  ;;  %v6439_v27 = vld [vmem:[#allocation7 + $0x18] sm:$0xf0] }
 0x540   :  { %8000 = vtanh.f32 %v2422_v25  ;;  %v2418_v23 = vadd.f32 0.5, %v2415_v18  ;;  %v6519_v25 = vld [vmem:[#allocation7 + $0xb8] sm:$0xf0]  ;;  %3236 = vmatpush.bf16.msra.mxu1 %v6514_v47  ;;  %3249 = vmatpush.bf16.msrb.mxu2 %v6518_v9  ;;  %v6470_v4 = vor.u32 %v7694_v17, %v6469_v2  ;;  %v7692_v47 = vld [vmem:[#allocation7 + $0x4c] sm:$0xf] }
 0x541   :  { %v6522_v18 = vor.u32 %v7704_v22, %v6519_v25  ;;  %v6471_v9 = vld [vmem:[#allocation7 + $0x58] sm:$0xf0]  ;;  %v6445_v25 = vld [vmem:[#allocation7 + $0x20] sm:$0xf]  ;;  %v7686_v7 = vld [vmem:[#allocation7 + $0x14] sm:$0xf0] }
 0x542   :  { %v8558_v31 = vpop.f32.mrf.mxu2  ;;  %v6474_v22 = vor.u32 %v7692_v47, %v6471_v9 }
 0x543   :  { %v8564_v26 = vpop.f32.mrf.mxu1  ;;  %3262 = vmatpush.bf16.msrb.mxu3 %v6522_v18  ;;  %v7689_v18 = vld [vmem:[#allocation7 + $0x2c] sm:$0xf0] }
 0x544   :  { %v8562_v53 = vpop.f32.mrf.mxu0 }
 0x546   :  { %v8001_v34 = vpop.eup %8000 }
 0x547   :  { %v2424_v42 = vmul.f32 %v8001_v34, %v2418_v23  ;;  %v6493_v23 = vld [vmem:[#allocation7 + $0x80] sm:$0xf]  ;;  %v7701_v34 = vld [vmem:[#allocation7 + $0x8c] sm:$0xf0]  ;;  %3263 = vmatpush.bf16.msrb.mxu3 %v6506_v41  ;;  %v6455_v41 = vld [vmem:[#allocation7 + $0x38] sm:$0xf0] }
 0x548   :  { %v6458_v56 = vor.u32 %v7688_v40, %v6455_v41 }
 0x549   :  { %v2437_v24 = vpack.c.bf16 %v2424_v42, %v8531_v46  ;;  %v8560_v46 = vpop.f32.mrf.mxu3  ;;  %v7699_v42 = vld [vmem:[#allocation7 + $0x84] sm:$0xf] }
 0x54a   :  { %v8566_v5 = vpop.f32.mrf.mxu2  ;;  %v6498_v39 = vor.u32 %v7699_v42, %v6495_v63  ;;  %v6446_v42 = vor.u32 %v7689_v18, %v6445_v25  ;;  %v6453_v63 = vld [vmem:[#allocation7 + $0x28] sm:$0xf] }
 0x54b   :  { %2663 = vmatmul.bf16.gmra.mxu0 %v2437_v24  ;;  %2692 = vmatmul.bf16.gmra.mxu1 %v2437_v24  ;;  %v8572_v21 = vpop.f32.mrf.mxu1 }
 0x54c   :  { %2721 = vmatmul.bf16.gmra.mxu2 %v2437_v24  ;;  %2750 = vmatmul.bf16.gmra.mxu3 %v2437_v24  ;;  %v8570_v33 = vpop.f32.mrf.mxu0  ;;  %v6494_v24 = vor.u32 %v7701_v34, %v6493_v23  ;;  %v7687_v23 = vld [vmem:[#allocation7 + $0x24] sm:$0xf]  ;;  %v2470_v34 = vld [vmem:[%s8824_s9] sm:$0xf] }
 0x54d   :  { %3237 = vmatpush.bf16.msra.mxu1 %v6498_v39  ;;  %3264 = vmatpush.bf16.msrb.mxu3 %v6490_v0  ;;  %v8617_v48 = vperm.slane %v2470_v34, 0  ;;  %v8619_v62 = vperm.slane %v2470_v34, 1  ;;  %v8629_v18 = vperm.slane %v2470_v34, 2 }
 0x54e   :  { %3224 = vmatpush.bf16.msrb.mxu0 %v6494_v24  ;;  %v6447_v24 = vld [vmem:[#allocation7 + $0x30] sm:$0xf0] }
 0x54f   :  { %v2650_v2 = vadd.f32 %v8554_v37, %v8617_v48  ;;  %v2679_v17 = vadd.f32 %v8556_v6, %v8619_v62  ;;  %v2708_v37 = vadd.f32 %v8558_v31, %v8629_v18  ;;  %v6298_v31 = vld [vmem:[%s8817_s2 + $0x8] sm:$0xff] }
 0x551   :  { %v8568_v59 = vpop.f32.mrf.mxu3  ;;  %3238 = vmatpush.bf16.msra.mxu1 %v6482_v55  ;;  %3265 = vmatpush.bf16.msrb.mxu3 %v6474_v22  ;;  %v6431_v55 = vld [vmem:[#allocation7 + $0x10] sm:$0xf0] }
 0x552   :  { %v8574_v38 = vpop.f32.mrf.mxu2  ;;  %3225 = vmatpush.bf16.msrb.mxu0 %v6478_v57  ;;  %v6434_v0 = vor.u32 %v7683_v19, %v6431_v55 }
 0x553   :  { %v8580_v13 = vpop.f32.mrf.mxu1 }
 0x554   :  { %v8578_v60 = vpop.f32.mrf.mxu0 }
 0x555   :  { %3239 = vmatpush.bf16.msra.mxu1 %v6466_v20  ;;  %3266 = vmatpush.bf16.msrb.mxu3 %v6458_v56 }
 0x556   :  { %3226 = vmatpush.bf16.msrb.mxu0 %v6462_v50  ;;  %v6438_v50 = vor.u32 %v7686_v7, %v6437_v15 }
 0x559   :  { %v8576_v49 = vpop.f32.mrf.mxu3 }
 0x55a   :  { %v8582_v28 = vpop.f32.mrf.mxu2  ;;  %3227 = vmatpush.bf16.msrb.mxu0 %v6446_v42 }
 0x55b   :  { %2961 = vmatmul.bf16.vlgmr.msra.gmra.mxu0 %v2760_v3  ;;  %2974 = vmatmul.bf16.vlgmr.msrb.gmra.mxu1 %v2760_v3  ;;  %v8588_v52 = vpop.f32.mrf.mxu1 }
 0x55c   :  { %2987 = vmatmul.bf16.vlgmr.msra.gmra.mxu2 %v2760_v3  ;;  %3000 = vmatmul.bf16.vlgmr.msra.gmra.mxu3 %v2760_v3  ;;  %v8586_v36 = vpop.f32.mrf.mxu0  ;;  %v6501_v3 = vld [vmem:[#allocation7 + $0x88] sm:$0xf] }
 0x55d   :  { %v6502_v11 = vor.u32 %v7702_v58, %v6501_v3  ;;  %v7690_v3 = vld [vmem:[#allocation7 + $0x34] sm:$0xf0] }
 0x55e   :  { %v6454_v32 = vor.u32 %v7690_v3, %v6453_v63  ;;  %3228 = vmatpush.bf16.msrb.mxu0 %v6430_v30 }
 0x55f   :  { %3250 = vmatpush.bf16.msrb.mxu2 %v6502_v11  ;;  %v6450_v11 = vor.u32 %v7687_v23, %v6447_v24  ;;  %v8631_v23 = vperm.slane %v2470_v34, 3 }
 0x561   :  { %v8584_v35 = vpop.f32.mrf.mxu3  ;;  %3240 = vmatpush.bf16.msra.mxu1 %v6450_v11  ;;  %v2737_v6 = vadd.f32 %v8560_v46, %v8631_v23 }
 0x562   :  { %v8590_v1 = vpop.f32.mrf.mxu2 }
 0x563   :  { %v8596_v16 = vpop.f32.mrf.mxu1  ;;  %3251 = vmatpush.bf16.msrb.mxu2 %v6486_v44  ;;  %v7684_v44 = vld [vmem:[#allocation7 + $0xc] sm:$0xf] }
 0x564   :  { %v8594_v10 = vpop.f32.mrf.mxu0  ;;  %v6442_v61 = vor.u32 %v7684_v44, %v6439_v27 }
 0x565   :  { %3241 = vmatpush.bf16.msra.mxu1 %v6434_v0 }
 0x566   :  { %3267 = vmatpush.bf16.msrb.mxu3 %v6442_v61 }
 0x567   :  { %3252 = vmatpush.bf16.msrb.mxu2 %v6470_v4 }
 0x569   :  { %v8592_v54 = vpop.f32.mrf.mxu3 }
 0x56a   :  { %v8598_v45 = vpop.f32.mrf.mxu2 }
 0x56b   :  { %3253 = vmatpush.bf16.msrb.mxu2 %v6454_v32 }
 0x56f   :  { %3254 = vmatpush.bf16.msrb.mxu2 %v6438_v50 }
 0x571   :  { %v8600_v12 = vpop.f32.mrf.mxu3 }
 0x5c8   :  { %v8602_v14 = vpop.f32.mrf.mxu0  ;;  %v8604_v29 = vpop.f32.mrf.mxu1 }
 0x5cf   :  { %v8609_v58 = vpop.f32.mrf.mxu2  ;;  %v8611_v39 = vpop.f32.mrf.mxu3 }
 0x5d0   :  { %v8613_v43 = vpop.f32.mrf.mxu0  ;;  %v8615_v57 = vpop.f32.mrf.mxu1 }
 0x5d7   :  { %v8625_v20 = vpop.f32.mrf.mxu2  ;;  %v8627_v4 = vpop.f32.mrf.mxu3 }
 0x5d8   :  { %v2962_v47 = vpop.f32.mrf.mxu0  ;;  %v2975_v9 = vpop.f32.mrf.mxu1 }
 0x5d9   :  { %v3005_v22 = vadd.f32 %v2962_v47, %v2650_v2  ;;  %v3006_v25 = vadd.f32 %v2975_v9, %v2679_v17 }
 0x5db   :  { %v3009_v42 = vmul.f32 0.5, %v3005_v22  ;;  %v3010_v24 = vmul.f32 0.5, %v3006_v25  ;;  %v8651_v22 = vld [vmem:[%s8818_s3] sm:$0xff] }
 0x5dd   :  { %8002 = vtanh.f32 %v3009_v42 }
 0x5de   :  { %8004 = vtanh.f32 %v3010_v24  ;;  %v6669_v24 = vld [vmem:[#allocation7 + $0xe0] sm:$0xf] }
 0x5df   :  { %v2988_v63 = vpop.f32.mrf.mxu2  ;;  %v3001_v3 = vpop.f32.mrf.mxu3 }
 0x5e0   :  { %v3007_v11 = vadd.f32 %v2988_v63, %v2708_v37  ;;  %v3008_v32 = vadd.f32 %v3001_v3, %v2737_v6  ;;  %v2964_v40 = vpop.f32.mrf.mxu0  ;;  %v2977_v41 = vpop.f32.mrf.mxu1  ;;  %v7745_v37 = vld [vmem:[#allocation7 + $0xec] sm:$0xf0]  ;;  %v7743_v6 = vld [vmem:[#allocation7 + $0xe4] sm:$0xf]  ;;  %v6671_v3 = vld [vmem:[#allocation7 + $0xf0] sm:$0xf0] }
 0x5e1   :  { %v6670_v63 = vor.u32 %v7745_v37, %v6669_v24  ;;  %v6674_v40 = vor.u32 %v7743_v6, %v6671_v3  ;;  %v6645_v24 = vld [vmem:[#allocation7 + $0xa8] sm:$0xf]  ;;  %v7738_v37 = vld [vmem:[#allocation7 + $0xb4] sm:$0xf0]  ;;  %v7736_v3 = vld [vmem:[#allocation7 + $0xac] sm:$0xf] }
 0x5e2   :  { %v3011_v8 = vmul.f32 0.5, %v3007_v11  ;;  %8006 = vtanh.f32 %v3008_v32  ;;  %v6677_v11 = vld [vmem:[#allocation7 + $0xe8] sm:$0xf]  ;;  %v7746_v32 = vld [vmem:[#allocation7 + $0xf4] sm:$0xf0] }
 0x5e3   :  { %v8003_v34 = vpop.eup %8002  ;;  %v6678_v41 = vor.u32 %v7746_v32, %v6677_v11  ;;  %3489 = vmatpush.bf16.msra.mxu0 %v6670_v63  ;;  %3502 = vmatpush.bf16.msrb.mxu1 %v6674_v40  ;;  %v6646_v63 = vor.u32 %v7738_v37, %v6645_v24  ;;  %v6647_v11 = vld [vmem:[#allocation7 + $0xb8] sm:$0xf0]  ;;  %v6621_v40 = vld [vmem:[#allocation7 + $0x80] sm:$0xf] }
 0x5e4   :  { %v8005_v56 = vpop.eup %8004  ;;  %v3015_v51 = vmul.f32 0.5, %v8003_v34  ;;  %8008 = vtanh.f32 %v3011_v8  ;;  %v7744_v8 = vld [vmem:[#allocation7 + $0xec] sm:$0xf]  ;;  %v6679_v34 = vld [vmem:[#allocation7 + $0xf8] sm:$0xf0]  ;;  %v6650_v32 = vor.u32 %v7736_v3, %v6647_v11 }
 0x5e5   :  { %v3016_v19 = vmul.f32 0.5, %v8005_v56  ;;  %v6682_v56 = vor.u32 %v7744_v8, %v6679_v34  ;;  %3515 = vmatpush.bf16.msra.mxu2 %v6678_v41  ;;  %v7733_v41 = vld [vmem:[#allocation7 + $0x8c] sm:$0xf0]  ;;  %v7731_v8 = vld [vmem:[#allocation7 + $0x84] sm:$0xf] }
 0x5e6   :  { %v3018_v55 = vadd.f32 0.5, %v3015_v51  ;;  %v6653_v51 = vld [vmem:[#allocation7 + $0xc0] sm:$0xf]  ;;  %v6622_v34 = vor.u32 %v7733_v41, %v6621_v40  ;;  %v6615_v24 = vld [vmem:[#allocation7 + $0x78] sm:$0xf0] }
 0x5e7   :  { %v3019_v46 = vadd.f32 0.5, %v3016_v19  ;;  %v2990_v30 = vpop.f32.mrf.mxu2  ;;  %v3003_v15 = vpop.f32.mrf.mxu3  ;;  %v7741_v19 = vld [vmem:[#allocation7 + $0xcc] sm:$0xf0]  ;;  %3528 = vmatpush.bf16.msra.mxu3 %v6682_v56  ;;  %v6623_v56 = vld [vmem:[#allocation7 + $0x90] sm:$0xf0] }
 0x5e8   :  { %v8007_v7 = vpop.eup %8006  ;;  %v6661_v30 = vld [vmem:[#allocation7 + $0xc8] sm:$0xf]  ;;  %v7742_v15 = vld [vmem:[#allocation7 + $0xd4] sm:$0xf0]  ;;  %v7723_v3 = vld [vmem:[#allocation7 + $0x44] sm:$0xf] }
 0x5e9   :  { %v3022_v44 = vmul.f32 %v6298_v31, %v3019_v46  ;;  %v3023_v0 = vmul.f32 %v8007_v7, %v3018_v55  ;;  %v7739_v55 = vld [vmem:[#allocation7 + $0xc4] sm:$0xf]  ;;  %v6654_v31 = vor.u32 %v7741_v19, %v6653_v51  ;;  %v6655_v46 = vld [vmem:[#allocation7 + $0xd0] sm:$0xf0]  ;;  %v6629_v51 = vld [vmem:[#allocation7 + $0x88] sm:$0xf] }
 0x5ea   :  { %v8009_v27 = vpop.eup %8008  ;;  %v6658_v7 = vor.u32 %v7739_v55, %v6655_v46  ;;  %v7734_v19 = vld [vmem:[#allocation7 + $0x94] sm:$0xf0]  ;;  %v6626_v55 = vor.u32 %v7731_v8, %v6623_v56  ;;  %v7732_v46 = vld [vmem:[#allocation7 + $0x8c] sm:$0xf]  ;;  %v6597_v40 = vld [vmem:[#allocation7 + $0x48] sm:$0xf] }
 0x5eb   :  { %v8640_v50 = vadd.f32 %v3023_v0, %v3022_v44  ;;  %v3017_v61 = vmul.f32 0.5, %v8009_v27  ;;  %v6662_v44 = vor.u32 %v7742_v15, %v6661_v30  ;;  %v7740_v0 = vld [vmem:[#allocation7 + $0xcc] sm:$0xf]  ;;  %v6663_v27 = vld [vmem:[#allocation7 + $0xd8] sm:$0xf0]  ;;  %3490 = vmatpush.bf16.msra.mxu0 %v6654_v31  ;;  %v6630_v31 = vor.u32 %v7734_v19, %v6629_v51 }
 0x5ec   :  { %3503 = vmatpush.bf16.msrb.mxu1 %v6658_v7  ;;  %v6631_v30 = vld [vmem:[#allocation7 + $0x98] sm:$0xf0]  ;;  %v6605_v7 = vld [vmem:[#allocation7 + $0x60] sm:$0xf]  ;;  %v7726_v41 = vld [vmem:[#allocation7 + $0x54] sm:$0xf0] }
 0x5ed   :  { %8010 = vtanh.f32 %v8640_v50  ;;  %v3020_v2 = vadd.f32 0.5, %v3017_v61  ;;  %v6666_v61 = vor.u32 %v7740_v0, %v6663_v27  ;;  %3516 = vmatpush.bf16.msra.mxu2 %v6662_v44  ;;  %v6634_v15 = vor.u32 %v7732_v46, %v6631_v30  ;;  %v7729_v44 = vld [vmem:[#allocation7 + $0x6c] sm:$0xf0]  ;;  %v7727_v0 = vld [vmem:[#allocation7 + $0x64] sm:$0xf] }
 0x5ee   :  { %v6606_v27 = vor.u32 %v7729_v44, %v6605_v7  ;;  %v7724_v56 = vld [vmem:[#allocation7 + $0x4c] sm:$0xf]  ;;  %v6599_v51 = vld [vmem:[#allocation7 + $0x58] sm:$0xf0]  ;;  %v7719_v46 = vld [vmem:[#allocation7 + $0x24] sm:$0xf] }
 0x5ef   :  { %3529 = vmatpush.bf16.msra.mxu3 %v6666_v61  ;;  %v6607_v61 = vld [vmem:[#allocation7 + $0x70] sm:$0xf0]  ;;  %v6602_v19 = vor.u32 %v7724_v56, %v6599_v51  ;;  %v6581_v7 = vld [vmem:[#allocation7 + $0x28] sm:$0xf]  ;;  %v7722_v44 = vld [vmem:[#allocation7 + $0x34] sm:$0xf0] }
 0x5f1   :  { %3517 = vmatpush.bf16.msra.mxu2 %v6646_v63  ;;  %v7725_v63 = vld [vmem:[#allocation7 + $0x4c] sm:$0xf0] }
 0x5f3   :  { %v8011_v17 = vpop.eup %8010  ;;  %3530 = vmatpush.bf16.msra.mxu3 %v6650_v32  ;;  %v6591_v32 = vld [vmem:[#allocation7 + $0x50] sm:$0xf0] }
 0x5f4   :  { %v8643_v47 = vmul.f32 %v8011_v17, %v3020_v2  ;;  %v6637_v2 = vld [vmem:[#allocation7 + $0xa0] sm:$0xf]  ;;  %v7737_v17 = vld [vmem:[#allocation7 + $0xac] sm:$0xf0]  ;;  %v6594_v8 = vor.u32 %v7723_v3, %v6591_v32  ;;  %v7716_v3 = vld [vmem:[#allocation7 + $0xc] sm:$0xf] }
 0x5f5   :  { %3518 = vmatpush.bf16.msra.mxu2 %v6630_v31  ;;  %v7721_v31 = vld [vmem:[#allocation7 + $0x2c] sm:$0xf0] }
 0x5f6   :  { %v3028_v9 = vpack.c.bf16 %v8643_v47, %v8643_v47  ;;  %8012 = vtanh.f32 %v8643_v47 }
 0x5f7   :  { %3531 = vmatpush.bf16.msra.mxu3 %v6634_v15  ;;  %v6575_v15 = vld [vmem:[#allocation7 + $0x30] sm:$0xf0] }
 0x5f8   :  { %3229 = vmatmul.bf16.vlgmr.msrb.gmra.mxu0 %v3028_v9  ;;  %3242 = vmatmul.bf16.vlgmr.msra.gmra.mxu1 %v3028_v9 }
 0x5f9   :  { %3255 = vmatmul.bf16.vlgmr.msrb.gmra.mxu2 %v3028_v9  ;;  %3268 = vmatmul.bf16.vlgmr.msrb.gmra.mxu3 %v3028_v9  ;;  %v7735_v9 = vld [vmem:[#allocation7 + $0xa4] sm:$0xf] }
 0x5fc   :  { %v8013_v25 = vpop.eup %8012 }
 0x5fd   :  { %v4921_v42 = vmul.f32 %v8013_v25, %v8651_v22  ;;  %v6638_v25 = vor.u32 %v7737_v17, %v6637_v2  ;;  %v6613_v2 = vld [vmem:[#allocation7 + $0x68] sm:$0xf]  ;;  %v7730_v17 = vld [vmem:[#allocation7 + $0x74] sm:$0xf0] }
 0x5ff   :  { %4929 = vadd.xlane.f32.xlu0 %v4921_v42  ;;  %v6639_v42 = vld [vmem:[#allocation7 + $0xb0] sm:$0xf0]  ;;  %3491 = vmatpush.bf16.msra.mxu0 %v6638_v25  ;;  %v6614_v25 = vor.u32 %v7730_v17, %v6613_v2  ;;  %v6583_v2 = vld [vmem:[#allocation7 + $0x38] sm:$0xf0]  ;;  %v6557_v17 = vld [vmem:[#allocation7] sm:$0xf] }
 0x600   :  { %v6642_v6 = vor.u32 %v7735_v9, %v6639_v42  ;;  %v6610_v9 = vor.u32 %v7727_v0, %v6607_v61  ;;  %v7728_v42 = vld [vmem:[#allocation7 + $0x6c] sm:$0xf]  ;;  %v6578_v0 = vor.u32 %v7719_v46, %v6575_v15  ;;  %v2739_v15 = vadd.f32 %v8568_v59, %v8631_v23 }
 0x601   :  { %v6618_v37 = vor.u32 %v7728_v42, %v6615_v24  ;;  %3519 = vmatpush.bf16.msra.mxu2 %v6614_v25  ;;  %v7720_v61 = vld [vmem:[#allocation7 + $0x2c] sm:$0xf]  ;;  %v7717_v25 = vld [vmem:[#allocation7 + $0xc] sm:$0xf0]  ;;  %v7715_v42 = vld [vmem:[#allocation7 + $0x4] sm:$0xf] }
 0x602   :  { %3504 = vmatpush.bf16.msrb.mxu1 %v6642_v6  ;;  %v6589_v6 = vld [vmem:[#allocation7 + $0x40] sm:$0xf]  ;;  %v6559_v24 = vld [vmem:[#allocation7 + $0x10] sm:$0xf0] }
 0x603   :  { %3492 = vmatpush.bf16.msra.mxu0 %v6622_v34  ;;  %3532 = vmatpush.bf16.msra.mxu3 %v6618_v37  ;;  %v6590_v11 = vor.u32 %v7725_v63, %v6589_v6  ;;  %v6598_v34 = vor.u32 %v7726_v41, %v6597_v40  ;;  %v6558_v37 = vor.u32 %v7717_v25, %v6557_v17  ;;  %v6565_v6 = vld [vmem:[#allocation7 + $0x8] sm:$0xf]  ;;  %v7718_v63 = vld [vmem:[#allocation7 + $0x14] sm:$0xf0]  ;;  %v6567_v40 = vld [vmem:[#allocation7 + $0x18] sm:$0xf0] }
 0x604   :  { %v6566_v32 = vor.u32 %v7718_v63, %v6565_v6  ;;  %v6570_v41 = vor.u32 %v7716_v3, %v6567_v40 }
 0x605   :  { %3520 = vmatpush.bf16.msra.mxu2 %v6598_v34  ;;  %v2681_v34 = vadd.f32 %v8564_v26, %v8619_v62 }
 0x606   :  { %3505 = vmatpush.bf16.msrb.mxu1 %v6626_v55  ;;  %v6573_v55 = vld [vmem:[#allocation7 + $0x20] sm:$0xf] }
 0x607   :  { %3493 = vmatpush.bf16.msra.mxu0 %v6606_v27  ;;  %v6574_v30 = vor.u32 %v7721_v31, %v6573_v55  ;;  %3533 = vmatpush.bf16.msra.mxu3 %v6602_v19  ;;  %v6582_v27 = vor.u32 %v7722_v44, %v6581_v7 }
 0x609   :  { %3521 = vmatpush.bf16.msra.mxu2 %v6582_v27 }
 0x60a   :  { %3506 = vmatpush.bf16.msrb.mxu1 %v6610_v9  ;;  %v6586_v9 = vor.u32 %v7720_v61, %v6583_v2 }
 0x60b   :  { %3494 = vmatpush.bf16.msra.mxu0 %v6590_v11  ;;  %v6562_v11 = vor.u32 %v7715_v42, %v6559_v24 }
 0x60c   :  { %3534 = vmatpush.bf16.msra.mxu3 %v6586_v9 }
 0x60d   :  { %3522 = vmatpush.bf16.msra.mxu2 %v6566_v32 }
 0x60e   :  { %3507 = vmatpush.bf16.msrb.mxu1 %v6594_v8  ;;  %v2652_v8 = vadd.f32 %v8562_v53, %v8617_v48 }
 0x60f   :  { %3495 = vmatpush.bf16.msra.mxu0 %v6574_v30  ;;  %v2710_v30 = vadd.f32 %v8566_v5, %v8629_v18 }
 0x610   :  { %3535 = vmatpush.bf16.msra.mxu3 %v6570_v41 }
 0x612   :  { %3508 = vmatpush.bf16.msrb.mxu1 %v6578_v0 }
 0x613   :  { %3496 = vmatpush.bf16.msra.mxu0 %v6558_v37 }
 0x616   :  { %3509 = vmatpush.bf16.msrb.mxu1 %v6562_v11 }
 0x675   :  { %v3230_v56 = vpop.f32.mrf.mxu0  ;;  %v3243_v51 = vpop.f32.mrf.mxu1 }
 0x676   :  { %v3273_v19 = vadd.f32 %v3230_v56, %v2652_v8  ;;  %v3274_v55 = vadd.f32 %v3243_v51, %v2681_v34  ;;  %v6797_v51 = vld [vmem:[#allocation7 + $0xe0] sm:$0xf] }
 0x678   :  { %v3277_v31 = vmul.f32 0.5, %v3273_v19  ;;  %v3278_v46 = vmul.f32 0.5, %v3274_v55  ;;  %v7777_v19 = vld [vmem:[#allocation7 + $0xec] sm:$0xf0]  ;;  %v7775_v55 = vld [vmem:[#allocation7 + $0xe4] sm:$0xf] }
 0x67a   :  { %8014 = vtanh.f32 %v3277_v31  ;;  %v6798_v31 = vor.u32 %v7777_v19, %v6797_v51  ;;  %v7768_v19 = vld [vmem:[#allocation7 + $0xac] sm:$0xf] }
 0x67b   :  { %8016 = vtanh.f32 %v3278_v46  ;;  %v6799_v46 = vld [vmem:[#allocation7 + $0xf0] sm:$0xf0] }
 0x67c   :  { %v3256_v7 = vpop.f32.mrf.mxu2  ;;  %v3269_v53 = vpop.f32.mrf.mxu3  ;;  %3757 = vmatpush.bf16.msrb.mxu0 %v6798_v31 }
 0x67d   :  { %v3275_v44 = vadd.f32 %v3256_v7, %v2710_v30  ;;  %v3276_v0 = vadd.f32 %v3269_v53, %v2739_v15  ;;  %v3232_v26 = vpop.f32.mrf.mxu0  ;;  %v3245_v27 = vpop.f32.mrf.mxu1  ;;  %v6805_v30 = vld [vmem:[#allocation7 + $0xe8] sm:$0xf]  ;;  %v7778_v15 = vld [vmem:[#allocation7 + $0xf4] sm:$0xf0]  ;;  %v6802_v7 = vor.u32 %v7775_v55, %v6799_v46  ;;  %v6775_v55 = vld [vmem:[#allocation7 + $0xb8] sm:$0xf0] }
 0x67e   :  { %v6806_v53 = vor.u32 %v7778_v15, %v6805_v30  ;;  %v6781_v27 = vld [vmem:[#allocation7 + $0xc0] sm:$0xf]  ;;  %v6778_v31 = vor.u32 %v7768_v19, %v6775_v55  ;;  %v7765_v30 = vld [vmem:[#allocation7 + $0x8c] sm:$0xf0]  ;;  %v7763_v15 = vld [vmem:[#allocation7 + $0x84] sm:$0xf] }
 0x67f   :  { %v3279_v61 = vmul.f32 0.5, %v3275_v44  ;;  %8018 = vtanh.f32 %v3276_v0  ;;  %v7776_v44 = vld [vmem:[#allocation7 + $0xec] sm:$0xf]  ;;  %v6807_v0 = vld [vmem:[#allocation7 + $0xf8] sm:$0xf0]  ;;  %3770 = vmatpush.bf16.msra.mxu1 %v6802_v7 }
 0x680   :  { %v8015_v2 = vpop.eup %8014  ;;  %v6810_v26 = vor.u32 %v7776_v44, %v6807_v0  ;;  %3783 = vmatpush.bf16.msrb.mxu2 %v6806_v53  ;;  %v6749_v46 = vld [vmem:[#allocation7 + $0x80] sm:$0xf]  ;;  %v6751_v53 = vld [vmem:[#allocation7 + $0x90] sm:$0xf0]  ;;  %v6757_v44 = vld [vmem:[#allocation7 + $0x88] sm:$0xf] }
 0x681   :  { %v8017_v17 = vpop.eup %8016  ;;  %v3283_v9 = vmul.f32 0.5, %v8015_v2  ;;  %8020 = vtanh.f32 %v3279_v61  ;;  %v7773_v61 = vld [vmem:[#allocation7 + $0xcc] sm:$0xf0]  ;;  %v7771_v2 = vld [vmem:[#allocation7 + $0xc4] sm:$0xf]  ;;  %v6750_v7 = vor.u32 %v7765_v30, %v6749_v46 }
 0x682   :  { %v3284_v25 = vmul.f32 0.5, %v8017_v17  ;;  %3796 = vmatpush.bf16.msrb.mxu3 %v6810_v26  ;;  %v6782_v17 = vor.u32 %v7773_v61, %v6781_v27  ;;  %v7766_v0 = vld [vmem:[#allocation7 + $0x94] sm:$0xf0]  ;;  %v6754_v26 = vor.u32 %v7763_v15, %v6751_v53  ;;  %v7764_v61 = vld [vmem:[#allocation7 + $0x8c] sm:$0xf] }
 0x683   :  { %v3286_v42 = vadd.f32 0.5, %v3283_v9  ;;  %v6783_v9 = vld [vmem:[#allocation7 + $0xd0] sm:$0xf0]  ;;  %v6758_v27 = vor.u32 %v7766_v0, %v6757_v44  ;;  %v6725_v19 = vld [vmem:[#allocation7 + $0x48] sm:$0xf] }
 0x684   :  { %v3287_v24 = vadd.f32 0.5, %v3284_v25  ;;  %v3258_v5 = vpop.f32.mrf.mxu2  ;;  %v3271_v37 = vpop.f32.mrf.mxu3  ;;  %v6789_v25 = vld [vmem:[#allocation7 + $0xc8] sm:$0xf]  ;;  %3758 = vmatpush.bf16.msrb.mxu0 %v6782_v17  ;;  %v7758_v55 = vld [vmem:[#allocation7 + $0x54] sm:$0xf0] }
 0x685   :  { %v8019_v6 = vpop.eup %8018  ;;  %v7772_v37 = vld [vmem:[#allocation7 + $0xcc] sm:$0xf]  ;;  %v6726_v46 = vor.u32 %v7758_v55, %v6725_v19  ;;  %v6727_v15 = vld [vmem:[#allocation7 + $0x58] sm:$0xf0]  ;;  %v6701_v53 = vld [vmem:[#allocation7 + $0x20] sm:$0xf]  ;;  %v2684_v19 = vadd.f32 %v8572_v21, %v8619_v62 }
 0x686   :  { %v3290_v59 = vmul.f32 %v3287_v24, %v8640_v50  ;;  %v3291_v63 = vmul.f32 %v8019_v6, %v3286_v42  ;;  %v7774_v42 = vld [vmem:[#allocation7 + $0xd4] sm:$0xf0]  ;;  %v6786_v24 = vor.u32 %v7771_v2, %v6783_v9  ;;  %v6791_v6 = vld [vmem:[#allocation7 + $0xd8] sm:$0xf0]  ;;  %v6733_v9 = vld [vmem:[#allocation7 + $0x60] sm:$0xf] }
 0x687   :  { %v8021_v3 = vpop.eup %8020  ;;  %v6790_v5 = vor.u32 %v7774_v42, %v6789_v25  ;;  %v6759_v2 = vld [vmem:[#allocation7 + $0x98] sm:$0xf0]  ;;  %v7761_v25 = vld [vmem:[#allocation7 + $0x6c] sm:$0xf0]  ;;  %v7759_v42 = vld [vmem:[#allocation7 + $0x64] sm:$0xf] }
 0x688   :  { %v8663_v11 = vadd.f32 %v3291_v63, %v3290_v59  ;;  %v3285_v32 = vmul.f32 0.5, %v8021_v3  ;;  %v6794_v59 = vor.u32 %v7772_v37, %v6791_v6  ;;  %3771 = vmatpush.bf16.msra.mxu1 %v6786_v24  ;;  %v6765_v63 = vld [vmem:[#allocation7 + $0xa0] sm:$0xf]  ;;  %v7769_v3 = vld [vmem:[#allocation7 + $0xac] sm:$0xf0]  ;;  %v6762_v17 = vor.u32 %v7764_v61, %v6759_v2 }
 0x689   :  { %3784 = vmatpush.bf16.msrb.mxu2 %v6790_v5  ;;  %v6734_v24 = vor.u32 %v7761_v25, %v6733_v9  ;;  %v6735_v5 = vld [vmem:[#allocation7 + $0x70] sm:$0xf0]  ;;  %v6741_v37 = vld [vmem:[#allocation7 + $0x68] sm:$0xf]  ;;  %v7762_v6 = vld [vmem:[#allocation7 + $0x74] sm:$0xf0] }
 0x68a   :  { %8022 = vtanh.f32 %v8663_v11  ;;  %v3288_v40 = vadd.f32 0.5, %v3285_v32  ;;  %v7767_v32 = vld [vmem:[#allocation7 + $0xa4] sm:$0xf]  ;;  %3797 = vmatpush.bf16.msrb.mxu3 %v6794_v59  ;;  %v6738_v59 = vor.u32 %v7759_v42, %v6735_v5  ;;  %v7756_v30 = vld [vmem:[#allocation7 + $0x4c] sm:$0xf] }
 0x68b   :  { %v7753_v44 = vld [vmem:[#allocation7 + $0x2c] sm:$0xf0]  ;;  %v7751_v0 = vld [vmem:[#allocation7 + $0x24] sm:$0xf]  ;;  %v6709_v61 = vld [vmem:[#allocation7 + $0x28] sm:$0xf] }
 0x68c   :  { %v7754_v2 = vld [vmem:[#allocation7 + $0x34] sm:$0xf0]  ;;  %v7752_v25 = vld [vmem:[#allocation7 + $0x2c] sm:$0xf]  ;;  %v6711_v42 = vld [vmem:[#allocation7 + $0x38] sm:$0xf0] }
 0x68d   :  { %v6710_v9 = vor.u32 %v7754_v2, %v6709_v61  ;;  %v6714_v5 = vor.u32 %v7752_v25, %v6711_v42 }
 0x68e   :  { %3798 = vmatpush.bf16.msrb.mxu3 %v6778_v31 }
 0x690   :  { %v8023_v41 = vpop.eup %8022 }
 0x691   :  { %v8666_v8 = vmul.f32 %v8023_v41, %v3288_v40  ;;  %v6766_v40 = vor.u32 %v7769_v3, %v6765_v63  ;;  %v6767_v41 = vld [vmem:[#allocation7 + $0xb0] sm:$0xf0]  ;;  %v6742_v63 = vor.u32 %v7762_v6, %v6741_v37  ;;  %v7760_v3 = vld [vmem:[#allocation7 + $0x6c] sm:$0xf]  ;;  %v7749_v37 = vld [vmem:[#allocation7 + $0xc] sm:$0xf0] }
 0x692   :  { %3799 = vmatpush.bf16.msrb.mxu3 %v6762_v17  ;;  %v7747_v6 = vld [vmem:[#allocation7 + $0x4] sm:$0xf] }
 0x693   :  { %v3296_v34 = vpack.c.bf16 %v8666_v8, %v8666_v8  ;;  %8024 = vtanh.f32 %v8666_v8  ;;  %3759 = vmatpush.bf16.msrb.mxu0 %v6766_v40 }
 0x695   :  { %3497 = vmatmul.bf16.vlgmr.msra.gmra.mxu0 %v3296_v34  ;;  %3510 = vmatmul.bf16.vlgmr.msrb.gmra.mxu1 %v3296_v34 }
 0x696   :  { %3523 = vmatmul.bf16.vlgmr.msra.gmra.mxu2 %v3296_v34  ;;  %3536 = vmatmul.bf16.vlgmr.msra.gmra.mxu3 %v3296_v34  ;;  %v6773_v34 = vld [vmem:[#allocation7 + $0xa8] sm:$0xf] }
 0x697   :  { %3760 = vmatpush.bf16.msrb.mxu0 %v6750_v7  ;;  %v6730_v7 = vor.u32 %v7756_v30, %v6727_v15 }
 0x699   :  { %v8025_v50 = vpop.eup %8024 }
 0x69a   :  { %v4922_v56 = vmul.f32 %v8025_v50, %v8651_v22  ;;  %v7770_v50 = vld [vmem:[#allocation7 + $0xb4] sm:$0xf0] }
 0x69b   :  { %v6774_v51 = vor.u32 %v7770_v50, %v6773_v34  ;;  %3761 = vmatpush.bf16.msrb.mxu0 %v6734_v24  ;;  %v7757_v34 = vld [vmem:[#allocation7 + $0x4c] sm:$0xf0]  ;;  %v7755_v50 = vld [vmem:[#allocation7 + $0x44] sm:$0xf]  ;;  %v6685_v24 = vld [vmem:[#allocation7] sm:$0xf] }
 0x69c   :  { %4931 = vadd.xlane.f32.xlu0 %v4922_v56  ;;  %v6770_v56 = vor.u32 %v7767_v32, %v6767_v41  ;;  %v6743_v32 = vld [vmem:[#allocation7 + $0x78] sm:$0xf0]  ;;  %v6717_v41 = vld [vmem:[#allocation7 + $0x40] sm:$0xf] }
 0x69d   :  { %3785 = vmatpush.bf16.msrb.mxu2 %v6774_v51  ;;  %v6746_v40 = vor.u32 %v7760_v3, %v6743_v32  ;;  %v6719_v51 = vld [vmem:[#allocation7 + $0x50] sm:$0xf0]  ;;  %v6693_v3 = vld [vmem:[#allocation7 + $0x8] sm:$0xf]  ;;  %v7750_v32 = vld [vmem:[#allocation7 + $0x14] sm:$0xf0] }
 0x69e   :  { %3772 = vmatpush.bf16.msra.mxu1 %v6770_v56  ;;  %v6718_v56 = vor.u32 %v7757_v34, %v6717_v41  ;;  %v6722_v31 = vor.u32 %v7755_v50, %v6719_v51  ;;  %v6694_v34 = vor.u32 %v7750_v32, %v6693_v3  ;;  %v6695_v50 = vld [vmem:[#allocation7 + $0x18] sm:$0xf0]  ;;  %v2655_v51 = vadd.f32 %v8570_v33, %v8617_v48 }
 0x69f   :  { %3800 = vmatpush.bf16.msrb.mxu3 %v6746_v40  ;;  %v7748_v40 = vld [vmem:[#allocation7 + $0xc] sm:$0xf] }
 0x6a0   :  { %3762 = vmatpush.bf16.msrb.mxu0 %v6718_v56  ;;  %v6698_v56 = vor.u32 %v7748_v40, %v6695_v50 }
 0x6a1   :  { %3786 = vmatpush.bf16.msrb.mxu2 %v6758_v27  ;;  %v6703_v27 = vld [vmem:[#allocation7 + $0x30] sm:$0xf0] }
 0x6a2   :  { %3773 = vmatpush.bf16.msra.mxu1 %v6754_v26  ;;  %v6702_v26 = vor.u32 %v7753_v44, %v6701_v53  ;;  %v6706_v17 = vor.u32 %v7751_v0, %v6703_v27  ;;  %v2713_v53 = vadd.f32 %v8574_v38, %v8629_v18  ;;  %v2742_v44 = vadd.f32 %v8576_v49, %v8631_v23 }
 0x6a3   :  { %3801 = vmatpush.bf16.msrb.mxu3 %v6730_v7 }
 0x6a4   :  { %3763 = vmatpush.bf16.msrb.mxu0 %v6702_v26 }
 0x6a5   :  { %3787 = vmatpush.bf16.msrb.mxu2 %v6742_v63  ;;  %v6686_v63 = vor.u32 %v7749_v37, %v6685_v24 }
 0x6a6   :  { %3774 = vmatpush.bf16.msra.mxu1 %v6738_v59  ;;  %v6687_v59 = vld [vmem:[#allocation7 + $0x10] sm:$0xf0] }
 0x6a7   :  { %v6690_v41 = vor.u32 %v7747_v6, %v6687_v59  ;;  %3802 = vmatpush.bf16.msrb.mxu3 %v6714_v5 }
 0x6a8   :  { %3764 = vmatpush.bf16.msrb.mxu0 %v6686_v63 }
 0x6a9   :  { %3788 = vmatpush.bf16.msrb.mxu2 %v6726_v46 }
 0x6aa   :  { %3775 = vmatpush.bf16.msra.mxu1 %v6722_v31 }
 0x6ab   :  { %3803 = vmatpush.bf16.msrb.mxu3 %v6698_v56 }
 0x6ad   :  { %3789 = vmatpush.bf16.msrb.mxu2 %v6710_v9 }
 0x6ae   :  { %3776 = vmatpush.bf16.msra.mxu1 %v6706_v17 }
 0x6b1   :  { %3790 = vmatpush.bf16.msrb.mxu2 %v6694_v34 }
 0x6b2   :  { %3777 = vmatpush.bf16.msra.mxu1 %v6690_v41 }
 0x712   :  { %v3498_v55 = vpop.f32.mrf.mxu0  ;;  %v3511_v31 = vpop.f32.mrf.mxu1 }
 0x713   :  { %v3541_v46 = vadd.f32 %v3498_v55, %v2655_v51  ;;  %v3542_v30 = vadd.f32 %v3511_v31, %v2684_v19  ;;  %v6925_v51 = vld [vmem:[#allocation7 + $0xe0] sm:$0xf]  ;;  %v7809_v19 = vld [vmem:[#allocation7 + $0xec] sm:$0xf0]  ;;  %v7807_v55 = vld [vmem:[#allocation7 + $0xe4] sm:$0xf] }
 0x714   :  { %v6926_v31 = vor.u32 %v7809_v19, %v6925_v51  ;;  %v6877_v51 = vld [vmem:[#allocation7 + $0x80] sm:$0xf]  ;;  %v7797_v19 = vld [vmem:[#allocation7 + $0x8c] sm:$0xf0] }
 0x715   :  { %v3545_v15 = vmul.f32 0.5, %v3541_v46  ;;  %v3546_v7 = vmul.f32 0.5, %v3542_v30  ;;  %v6927_v46 = vld [vmem:[#allocation7 + $0xf0] sm:$0xf0]  ;;  %v6933_v30 = vld [vmem:[#allocation7 + $0xe8] sm:$0xf] }
 0x716   :  { %4025 = vmatpush.bf16.msra.mxu0 %v6926_v31  ;;  %v6878_v31 = vor.u32 %v7797_v19, %v6877_v51  ;;  %v6829_v51 = vld [vmem:[#allocation7 + $0x20] sm:$0xf]  ;;  %v7785_v19 = vld [vmem:[#allocation7 + $0x2c] sm:$0xf0] }
 0x717   :  { %8026 = vtanh.f32 %v3545_v15  ;;  %v7810_v15 = vld [vmem:[#allocation7 + $0xf4] sm:$0xf0] }
 0x718   :  { %8028 = vtanh.f32 %v3546_v7  ;;  %v6930_v7 = vor.u32 %v7807_v55, %v6927_v46  ;;  %v7795_v55 = vld [vmem:[#allocation7 + $0x84] sm:$0xf]  ;;  %v6879_v46 = vld [vmem:[#allocation7 + $0x90] sm:$0xf0] }
 0x719   :  { %v3524_v0 = vpop.f32.mrf.mxu2  ;;  %v3537_v33 = vpop.f32.mrf.mxu3 }
 0x71a   :  { %v3543_v26 = vadd.f32 %v3524_v0, %v2713_v53  ;;  %v3544_v27 = vadd.f32 %v3537_v33, %v2742_v44  ;;  %v3500_v21 = vpop.f32.mrf.mxu0  ;;  %v3513_v61 = vpop.f32.mrf.mxu1  ;;  %v6934_v53 = vor.u32 %v7810_v15, %v6933_v30  ;;  %v7808_v44 = vld [vmem:[#allocation7 + $0xec] sm:$0xf]  ;;  %v6935_v0 = vld [vmem:[#allocation7 + $0xf8] sm:$0xf0]  ;;  %4038 = vmatpush.bf16.msrb.mxu1 %v6930_v7  ;;  %v6885_v30 = vld [vmem:[#allocation7 + $0x88] sm:$0xf]  ;;  %v6882_v7 = vor.u32 %v7795_v55, %v6879_v46 }
 0x71b   :  { %v6938_v33 = vor.u32 %v7808_v44, %v6935_v0  ;;  %v7803_v21 = vld [vmem:[#allocation7 + $0xc4] sm:$0xf]  ;;  %v6911_v61 = vld [vmem:[#allocation7 + $0xd0] sm:$0xf0]  ;;  %v7798_v15 = vld [vmem:[#allocation7 + $0x94] sm:$0xf0] }
 0x71c   :  { %v3547_v2 = vmul.f32 0.5, %v3543_v26  ;;  %8030 = vtanh.f32 %v3544_v27  ;;  %4051 = vmatpush.bf16.msra.mxu2 %v6934_v53  ;;  %v6909_v26 = vld [vmem:[#allocation7 + $0xc0] sm:$0xf]  ;;  %v7805_v27 = vld [vmem:[#allocation7 + $0xcc] sm:$0xf0]  ;;  %v6886_v53 = vor.u32 %v7798_v15, %v6885_v30 }
 0x71d   :  { %v8027_v17 = vpop.eup %8026  ;;  %4064 = vmatpush.bf16.msra.mxu3 %v6938_v33  ;;  %v7796_v44 = vld [vmem:[#allocation7 + $0x8c] sm:$0xf]  ;;  %v6887_v0 = vld [vmem:[#allocation7 + $0x98] sm:$0xf0]  ;;  %v7783_v55 = vld [vmem:[#allocation7 + $0x24] sm:$0xf] }
 0x71e   :  { %v8029_v9 = vpop.eup %8028  ;;  %v3551_v25 = vmul.f32 0.5, %v8027_v17  ;;  %8032 = vtanh.f32 %v3547_v2  ;;  %v6917_v2 = vld [vmem:[#allocation7 + $0xc8] sm:$0xf]  ;;  %v7806_v17 = vld [vmem:[#allocation7 + $0xd4] sm:$0xf0]  ;;  %v6890_v33 = vor.u32 %v7796_v44, %v6887_v0 }
 0x71f   :  { %v3552_v42 = vmul.f32 0.5, %v8029_v9  ;;  %v6914_v9 = vor.u32 %v7803_v21, %v6911_v61  ;;  %v7791_v21 = vld [vmem:[#allocation7 + $0x64] sm:$0xf]  ;;  %v6863_v61 = vld [vmem:[#allocation7 + $0x70] sm:$0xf0] }
 0x720   :  { %v3554_v24 = vadd.f32 0.5, %v3551_v25  ;;  %v6918_v25 = vor.u32 %v7806_v17, %v6917_v2  ;;  %v6869_v2 = vld [vmem:[#allocation7 + $0x68] sm:$0xf]  ;;  %v7794_v17 = vld [vmem:[#allocation7 + $0x74] sm:$0xf0] }
 0x721   :  { %v3555_v5 = vadd.f32 0.5, %v3552_v42  ;;  %v3526_v38 = vpop.f32.mrf.mxu2  ;;  %v3539_v37 = vpop.f32.mrf.mxu3  ;;  %v7804_v42 = vld [vmem:[#allocation7 + $0xcc] sm:$0xf]  ;;  %4039 = vmatpush.bf16.msrb.mxu1 %v6914_v9  ;;  %v6866_v9 = vor.u32 %v7791_v21, %v6863_v61  ;;  %v6831_v46 = vld [vmem:[#allocation7 + $0x30] sm:$0xf0] }
 0x722   :  { %v8031_v6 = vpop.eup %8030  ;;  %4052 = vmatpush.bf16.msra.mxu2 %v6918_v25  ;;  %v6893_v38 = vld [vmem:[#allocation7 + $0xa0] sm:$0xf]  ;;  %v7801_v37 = vld [vmem:[#allocation7 + $0xac] sm:$0xf0]  ;;  %v6870_v25 = vor.u32 %v7794_v17, %v6869_v2  ;;  %v6837_v30 = vld [vmem:[#allocation7 + $0x28] sm:$0xf] }
 0x723   :  { %v3558_v49 = vmul.f32 %v3555_v5, %v8663_v11  ;;  %v3559_v59 = vmul.f32 %v8031_v6, %v3554_v24  ;;  %v6919_v24 = vld [vmem:[#allocation7 + $0xd8] sm:$0xf0]  ;;  %v7799_v6 = vld [vmem:[#allocation7 + $0xa4] sm:$0xf]  ;;  %v7786_v15 = vld [vmem:[#allocation7 + $0x34] sm:$0xf0] }
 0x724   :  { %v8033_v63 = vpop.eup %8032  ;;  %v6922_v5 = vor.u32 %v7804_v42, %v6919_v24  ;;  %v7792_v42 = vld [vmem:[#allocation7 + $0x6c] sm:$0xf]  ;;  %v6871_v24 = vld [vmem:[#allocation7 + $0x78] sm:$0xf0]  ;;  %v7779_v21 = vld [vmem:[#allocation7 + $0x4] sm:$0xf] }
 0x725   :  { %v8681_v3 = vadd.f32 %v3559_v59, %v3558_v49  ;;  %v3553_v32 = vmul.f32 0.5, %v8033_v63  ;;  %v6894_v49 = vor.u32 %v7801_v37, %v6893_v38  ;;  %v6895_v59 = vld [vmem:[#allocation7 + $0xb0] sm:$0xf0]  ;;  %v6901_v63 = vld [vmem:[#allocation7 + $0xa8] sm:$0xf] }
 0x726   :  { %4065 = vmatpush.bf16.msra.mxu3 %v6922_v5  ;;  %v6874_v5 = vor.u32 %v7792_v42, %v6871_v24  ;;  %v6845_v38 = vld [vmem:[#allocation7 + $0x40] sm:$0xf]  ;;  %v7789_v37 = vld [vmem:[#allocation7 + $0x4c] sm:$0xf0]  ;;  %v7784_v44 = vld [vmem:[#allocation7 + $0x2c] sm:$0xf] }
 0x727   :  { %8034 = vtanh.f32 %v8681_v3  ;;  %v3556_v40 = vadd.f32 0.5, %v3553_v32  ;;  %v7802_v32 = vld [vmem:[#allocation7 + $0xb4] sm:$0xf0]  ;;  %v6839_v0 = vld [vmem:[#allocation7 + $0x38] sm:$0xf0] }
 0x728   :  { %v6821_v2 = vld [vmem:[#allocation7 + $0x8] sm:$0xf]  ;;  %v7782_v17 = vld [vmem:[#allocation7 + $0x14] sm:$0xf0]  ;;  %v6823_v24 = vld [vmem:[#allocation7 + $0x18] sm:$0xf0] }
 0x729   :  { %v6822_v42 = vor.u32 %v7782_v17, %v6821_v2 }
 0x72d   :  { %v8035_v41 = vpop.eup %8034 }
 0x72e   :  { %v8684_v34 = vmul.f32 %v8035_v41, %v3556_v40  ;;  %v6898_v40 = vor.u32 %v7799_v6, %v6895_v59  ;;  %v6902_v41 = vor.u32 %v7802_v32, %v6901_v63  ;;  %v7787_v6 = vld [vmem:[#allocation7 + $0x44] sm:$0xf]  ;;  %v6847_v59 = vld [vmem:[#allocation7 + $0x50] sm:$0xf0]  ;;  %v6853_v63 = vld [vmem:[#allocation7 + $0x48] sm:$0xf] }
 0x72f   :  { %v7790_v32 = vld [vmem:[#allocation7 + $0x54] sm:$0xf0] }
 0x730   :  { %v3564_v50 = vpack.c.bf16 %v8684_v34, %v8684_v34  ;;  %8036 = vtanh.f32 %v8684_v34  ;;  %4040 = vmatpush.bf16.msrb.mxu1 %v6898_v40  ;;  %4053 = vmatpush.bf16.msra.mxu2 %v6902_v41  ;;  %v6850_v40 = vor.u32 %v7787_v6, %v6847_v59  ;;  %v6854_v41 = vor.u32 %v7790_v32, %v6853_v63 }
 0x732   :  { %3765 = vmatmul.bf16.vlgmr.msrb.gmra.mxu0 %v3564_v50  ;;  %3778 = vmatmul.bf16.vlgmr.msra.gmra.mxu1 %v3564_v50 }
 0x733   :  { %3791 = vmatmul.bf16.vlgmr.msrb.gmra.mxu2 %v3564_v50  ;;  %3804 = vmatmul.bf16.vlgmr.msrb.gmra.mxu3 %v3564_v50  ;;  %v7800_v50 = vld [vmem:[#allocation7 + $0xac] sm:$0xf] }
 0x734   :  { %4041 = vmatpush.bf16.msrb.mxu1 %v6882_v7  ;;  %4054 = vmatpush.bf16.msra.mxu2 %v6886_v53  ;;  %v6834_v7 = vor.u32 %v7783_v55, %v6831_v46  ;;  %v6838_v53 = vor.u32 %v7786_v15, %v6837_v30 }
 0x736   :  { %v8037_v11 = vpop.eup %8036 }
 0x737   :  { %v4923_v56 = vmul.f32 %v8037_v11, %v8651_v22  ;;  %v6910_v22 = vor.u32 %v7805_v27, %v6909_v26  ;;  %v6903_v11 = vld [vmem:[#allocation7 + $0xb8] sm:$0xf0]  ;;  %v6861_v26 = vld [vmem:[#allocation7 + $0x60] sm:$0xf]  ;;  %v7793_v27 = vld [vmem:[#allocation7 + $0x6c] sm:$0xf0] }
 0x738   :  { %4042 = vmatpush.bf16.msrb.mxu1 %v6866_v9  ;;  %4055 = vmatpush.bf16.msra.mxu2 %v6870_v25  ;;  %v7780_v9 = vld [vmem:[#allocation7 + $0xc] sm:$0xf] }
 0x739   :  { %4933 = vadd.xlane.f32.xlu1 %v4923_v56  ;;  %4026 = vmatpush.bf16.msra.mxu0 %v6910_v22  ;;  %v6906_v56 = vor.u32 %v7800_v50, %v6903_v11  ;;  %v6862_v22 = vor.u32 %v7793_v27, %v6861_v26  ;;  %v7788_v50 = vld [vmem:[#allocation7 + $0x4c] sm:$0xf]  ;;  %v6855_v11 = vld [vmem:[#allocation7 + $0x58] sm:$0xf0]  ;;  %v6842_v26 = vor.u32 %v7784_v44, %v6839_v0  ;;  %v7781_v27 = vld [vmem:[#allocation7 + $0xc] sm:$0xf0] }
 0x73b   :  { %4066 = vmatpush.bf16.msra.mxu3 %v6906_v56  ;;  %v6858_v56 = vor.u32 %v7788_v50, %v6855_v11  ;;  %v2744_v50 = vadd.f32 %v8584_v35, %v8631_v23 }
 0x73c   :  { %4043 = vmatpush.bf16.msrb.mxu1 %v6850_v40  ;;  %4056 = vmatpush.bf16.msra.mxu2 %v6854_v41  ;;  %v2715_v41 = vadd.f32 %v8582_v28, %v8629_v18 }
 0x73d   :  { %4027 = vmatpush.bf16.msra.mxu0 %v6894_v49  ;;  %v6846_v49 = vor.u32 %v7789_v37, %v6845_v38  ;;  %v2657_v38 = vadd.f32 %v8578_v60, %v8617_v48  ;;  %v2686_v37 = vadd.f32 %v8580_v13, %v8619_v62 }
 0x73f   :  { %4067 = vmatpush.bf16.msra.mxu3 %v6890_v33  ;;  %v6813_v33 = vld [vmem:[#allocation7] sm:$0xf] }
 0x740   :  { %v6814_v61 = vor.u32 %v7781_v27, %v6813_v33  ;;  %4044 = vmatpush.bf16.msrb.mxu1 %v6834_v7  ;;  %4057 = vmatpush.bf16.msra.mxu2 %v6838_v53 }
 0x741   :  { %4028 = vmatpush.bf16.msra.mxu0 %v6878_v31  ;;  %v6830_v31 = vor.u32 %v7785_v19, %v6829_v51 }
 0x743   :  { %4068 = vmatpush.bf16.msra.mxu3 %v6874_v5  ;;  %v6826_v5 = vor.u32 %v7780_v9, %v6823_v24  ;;  %v8710_v9 = vld [vmem:[%s8818_s3] sm:$0xff]  ;;  %v7841_v24 = vld [vmem:[#allocation7 + $0xec] sm:$0xf0] }
 0x744   :  { %4058 = vmatpush.bf16.msra.mxu2 %v6822_v42  ;;  %v7053_v42 = vld [vmem:[#allocation7 + $0xe0] sm:$0xf] }
 0x745   :  { %4029 = vmatpush.bf16.msra.mxu0 %v6862_v22  ;;  %v6815_v22 = vld [vmem:[#allocation7 + $0x10] sm:$0xf0] }
 0x746   :  { %v6818_v25 = vor.u32 %v7779_v21, %v6815_v22 }
 0x747   :  { %4069 = vmatpush.bf16.msra.mxu3 %v6858_v56 }
 0x748   :  { %4045 = vmatpush.bf16.msrb.mxu1 %v6818_v25 }
 0x749   :  { %4030 = vmatpush.bf16.msra.mxu0 %v6846_v49 }
 0x74b   :  { %4070 = vmatpush.bf16.msra.mxu3 %v6842_v26 }
 0x74d   :  { %4031 = vmatpush.bf16.msra.mxu0 %v6830_v31 }
 0x74f   :  { %4071 = vmatpush.bf16.msra.mxu3 %v6826_v5  ;;  %v7839_v5 = vld [vmem:[#allocation7 + $0xe4] sm:$0xf] }
 0x751   :  { %4032 = vmatpush.bf16.msra.mxu0 %v6814_v61 }
 0x7af   :  { %v3766_v6 = vpop.f32.mrf.mxu0  ;;  %v3779_v49 = vpop.f32.mrf.mxu1 }
 0x7b0   :  { %v3809_v59 = vadd.f32 %v3766_v6, %v2657_v38  ;;  %v3810_v63 = vadd.f32 %v3779_v49, %v2686_v37  ;;  %v7054_v38 = vor.u32 %v7841_v24, %v7053_v42  ;;  %v7055_v37 = vld [vmem:[#allocation7 + $0xf0] sm:$0xf0]  ;;  %v7061_v6 = vld [vmem:[#allocation7 + $0xe8] sm:$0xf]  ;;  %v7842_v49 = vld [vmem:[#allocation7 + $0xf4] sm:$0xf0] }
 0x7b1   :  { %v7827_v42 = vld [vmem:[#allocation7 + $0x84] sm:$0xf] }
 0x7b2   :  { %v3813_v32 = vmul.f32 0.5, %v3809_v59  ;;  %v3814_v40 = vmul.f32 0.5, %v3810_v63  ;;  %v7058_v59 = vor.u32 %v7839_v5, %v7055_v37  ;;  %v7062_v63 = vor.u32 %v7842_v49, %v7061_v6  ;;  %4293 = vmatpush.bf16.msrb.mxu0 %v7054_v38  ;;  %v7007_v5 = vld [vmem:[#allocation7 + $0x90] sm:$0xf0]  ;;  %v7013_v38 = vld [vmem:[#allocation7 + $0x88] sm:$0xf] }
 0x7b3   :  { %v7830_v37 = vld [vmem:[#allocation7 + $0x94] sm:$0xf0]  ;;  %v7010_v6 = vor.u32 %v7827_v42, %v7007_v5  ;;  %v6959_v42 = vld [vmem:[#allocation7 + $0x30] sm:$0xf0] }
 0x7b4   :  { %8038 = vtanh.f32 %v3813_v32  ;;  %v7840_v32 = vld [vmem:[#allocation7 + $0xec] sm:$0xf]  ;;  %4306 = vmatpush.bf16.msra.mxu1 %v7058_v59  ;;  %4319 = vmatpush.bf16.msrb.mxu2 %v7062_v63  ;;  %v7014_v49 = vor.u32 %v7830_v37, %v7013_v38  ;;  %v7015_v63 = vld [vmem:[#allocation7 + $0x98] sm:$0xf0]  ;;  %v7818_v5 = vld [vmem:[#allocation7 + $0x34] sm:$0xf0] }
 0x7b5   :  { %8040 = vtanh.f32 %v3814_v40  ;;  %v7063_v40 = vld [vmem:[#allocation7 + $0xf8] sm:$0xf0]  ;;  %v7828_v59 = vld [vmem:[#allocation7 + $0x8c] sm:$0xf] }
 0x7b6   :  { %v3792_v11 = vpop.f32.mrf.mxu2  ;;  %v3805_v60 = vpop.f32.mrf.mxu3 }
 0x7b7   :  { %v3811_v56 = vadd.f32 %v3792_v11, %v2715_v41  ;;  %v3812_v51 = vadd.f32 %v3805_v60, %v2744_v50  ;;  %v3768_v13 = vpop.f32.mrf.mxu0  ;;  %v3781_v19 = vpop.f32.mrf.mxu1  ;;  %v7066_v41 = vor.u32 %v7840_v32, %v7063_v40  ;;  %v7037_v50 = vld [vmem:[#allocation7 + $0xc0] sm:$0xf]  ;;  %v7837_v11 = vld [vmem:[#allocation7 + $0xcc] sm:$0xf0]  ;;  %v7835_v60 = vld [vmem:[#allocation7 + $0xc4] sm:$0xf]  ;;  %v7018_v32 = vor.u32 %v7828_v59, %v7015_v63 }
 0x7b8   :  { %v7045_v13 = vld [vmem:[#allocation7 + $0xc8] sm:$0xf]  ;;  %v7838_v19 = vld [vmem:[#allocation7 + $0xd4] sm:$0xf0]  ;;  %v6989_v40 = vld [vmem:[#allocation7 + $0x60] sm:$0xf] }
 0x7b9   :  { %v3815_v55 = vmul.f32 0.5, %v3811_v56  ;;  %8042 = vtanh.f32 %v3812_v51  ;;  %4332 = vmatpush.bf16.msrb.mxu3 %v7066_v41  ;;  %v7038_v56 = vor.u32 %v7837_v11, %v7037_v50  ;;  %v7039_v51 = vld [vmem:[#allocation7 + $0xd0] sm:$0xf0]  ;;  %v7825_v41 = vld [vmem:[#allocation7 + $0x6c] sm:$0xf0] }
 0x7ba   :  { %v8039_v31 = vpop.eup %8038  ;;  %v7823_v50 = vld [vmem:[#allocation7 + $0x64] sm:$0xf]  ;;  %v6990_v11 = vor.u32 %v7825_v41, %v6989_v40  ;;  %v6941_v59 = vld [vmem:[#allocation7] sm:$0xf]  ;;  %v6943_v41 = vld [vmem:[#allocation7 + $0x10] sm:$0xf0] }
 0x7bb   :  { %v8041_v46 = vpop.eup %8040  ;;  %v3819_v30 = vmul.f32 0.5, %v8039_v31  ;;  %8044 = vtanh.f32 %v3815_v55  ;;  %v7042_v55 = vor.u32 %v7835_v60, %v7039_v51  ;;  %v7046_v31 = vor.u32 %v7838_v19, %v7045_v13  ;;  %4294 = vmatpush.bf16.msrb.mxu0 %v7038_v56  ;;  %v6991_v60 = vld [vmem:[#allocation7 + $0x70] sm:$0xf0]  ;;  %v6997_v56 = vld [vmem:[#allocation7 + $0x68] sm:$0xf] }
 0x7bc   :  { %v3820_v15 = vmul.f32 0.5, %v8041_v46  ;;  %v7836_v46 = vld [vmem:[#allocation7 + $0xcc] sm:$0xf]  ;;  %v7826_v51 = vld [vmem:[#allocation7 + $0x74] sm:$0xf0]  ;;  %v6994_v13 = vor.u32 %v7823_v50, %v6991_v60 }
 0x7bd   :  { %v3822_v7 = vadd.f32 0.5, %v3819_v30  ;;  %v7047_v30 = vld [vmem:[#allocation7 + $0xd8] sm:$0xf0]  ;;  %4307 = vmatpush.bf16.msra.mxu1 %v7042_v55  ;;  %4320 = vmatpush.bf16.msrb.mxu2 %v7046_v31  ;;  %v6998_v19 = vor.u32 %v7826_v51, %v6997_v56  ;;  %v7824_v55 = vld [vmem:[#allocation7 + $0x6c] sm:$0xf] }
 0x7be   :  { %v3823_v53 = vadd.f32 0.5, %v3820_v15  ;;  %v3794_v28 = vpop.f32.mrf.mxu2  ;;  %v3807_v44 = vpop.f32.mrf.mxu3  ;;  %v7050_v15 = vor.u32 %v7836_v46, %v7047_v30  ;;  %v6999_v31 = vld [vmem:[#allocation7 + $0x78] sm:$0xf0]  ;;  %v6973_v30 = vld [vmem:[#allocation7 + $0x40] sm:$0xf] }
 0x7bf   :  { %v8043_v0 = vpop.eup %8042  ;;  %v7831_v28 = vld [vmem:[#allocation7 + $0xa4] sm:$0xf]  ;;  %v7002_v46 = vor.u32 %v7824_v55, %v6999_v31  ;;  %v7814_v60 = vld [vmem:[#allocation7 + $0x14] sm:$0xf0]  ;;  %v7812_v56 = vld [vmem:[#allocation7 + $0xc] sm:$0xf]  ;;  %v2660_v31 = vadd.f32 %v8586_v36, %v8617_v48 }
 0x7c0   :  { %v3826_v35 = vmul.f32 %v3823_v53, %v8681_v3  ;;  %v3827_v33 = vmul.f32 %v8043_v0, %v3822_v7  ;;  %v7021_v7 = vld [vmem:[#allocation7 + $0xa0] sm:$0xf]  ;;  %v7833_v53 = vld [vmem:[#allocation7 + $0xac] sm:$0xf0]  ;;  %4333 = vmatpush.bf16.msrb.mxu3 %v7050_v15  ;;  %v7023_v0 = vld [vmem:[#allocation7 + $0xb0] sm:$0xf0] }
 0x7c1   :  { %v8045_v26 = vpop.eup %8044  ;;  %v7022_v44 = vor.u32 %v7833_v53, %v7021_v7  ;;  %v7821_v15 = vld [vmem:[#allocation7 + $0x4c] sm:$0xf0]  ;;  %v7819_v7 = vld [vmem:[#allocation7 + $0x44] sm:$0xf] }
 0x7c2   :  { %v8699_v27 = vadd.f32 %v3827_v33, %v3826_v35  ;;  %v3821_v21 = vmul.f32 0.5, %v8045_v26  ;;  %v7029_v35 = vld [vmem:[#allocation7 + $0xa8] sm:$0xf]  ;;  %v7834_v33 = vld [vmem:[#allocation7 + $0xb4] sm:$0xf0]  ;;  %v7026_v26 = vor.u32 %v7831_v28, %v7023_v0  ;;  %v6974_v53 = vor.u32 %v7821_v15, %v6973_v30 }
 0x7c3   :  { %4295 = vmatpush.bf16.msrb.mxu0 %v7022_v44  ;;  %v6975_v28 = vld [vmem:[#allocation7 + $0x50] sm:$0xf0]  ;;  %v6981_v44 = vld [vmem:[#allocation7 + $0x48] sm:$0xf]  ;;  %v7822_v0 = vld [vmem:[#allocation7 + $0x54] sm:$0xf0] }
 0x7c4   :  { %8046 = vtanh.f32 %v8699_v27  ;;  %v3824_v22 = vadd.f32 0.5, %v3821_v21  ;;  %v7030_v21 = vor.u32 %v7834_v33, %v7029_v35  ;;  %4308 = vmatpush.bf16.msra.mxu1 %v7026_v26  ;;  %v6978_v35 = vor.u32 %v7819_v7, %v6975_v28  ;;  %v7820_v26 = vld [vmem:[#allocation7 + $0x4c] sm:$0xf]  ;;  %v7811_v40 = vld [vmem:[#allocation7 + $0x4] sm:$0xf] }
 0x7c5   :  { %v6982_v33 = vor.u32 %v7822_v0, %v6981_v44  ;;  %v6946_v51 = vor.u32 %v7811_v40, %v6943_v41  ;;  %v2718_v0 = vadd.f32 %v8590_v1, %v8629_v18 }
 0x7c6   :  { %4321 = vmatpush.bf16.msrb.mxu2 %v7030_v21  ;;  %v6983_v21 = vld [vmem:[#allocation7 + $0x58] sm:$0xf0] }
 0x7c8   :  { %4309 = vmatpush.bf16.msra.mxu1 %v7010_v6  ;;  %v7816_v6 = vld [vmem:[#allocation7 + $0x2c] sm:$0xf] }
 0x7ca   :  { %v8047_v61 = vpop.eup %8046  ;;  %4322 = vmatpush.bf16.msrb.mxu2 %v7014_v49  ;;  %v6967_v49 = vld [vmem:[#allocation7 + $0x38] sm:$0xf0] }
 0x7cb   :  { %v8702_v2 = vmul.f32 %v8047_v61, %v3824_v22  ;;  %v7832_v22 = vld [vmem:[#allocation7 + $0xac] sm:$0xf]  ;;  %v7031_v61 = vld [vmem:[#allocation7 + $0xb8] sm:$0xf0]  ;;  %v6970_v63 = vor.u32 %v7816_v6, %v6967_v49 }
 0x7cc   :  { %4310 = vmatpush.bf16.msra.mxu1 %v6994_v13 }
 0x7cd   :  { %v3832_v17 = vpack.c.bf16 %v8702_v2, %v8702_v2  ;;  %8048 = vtanh.f32 %v8702_v2 }
 0x7ce   :  { %4323 = vmatpush.bf16.msrb.mxu2 %v6998_v19  ;;  %v6951_v19 = vld [vmem:[#allocation7 + $0x18] sm:$0xf0] }
 0x7cf   :  { %4033 = vmatmul.bf16.vlgmr.msra.gmra.mxu0 %v3832_v17  ;;  %4046 = vmatmul.bf16.vlgmr.msrb.gmra.mxu1 %v3832_v17  ;;  %v6954_v55 = vor.u32 %v7812_v56, %v6951_v19  ;;  %v7873_v56 = vld [vmem:[#allocation7 + $0xec] sm:$0xf0]  ;;  %v7183_v19 = vld [vmem:[#allocation7 + $0xf0] sm:$0xf0] }
 0x7d0   :  { %4059 = vmatmul.bf16.vlgmr.msra.gmra.mxu2 %v3832_v17  ;;  %4072 = vmatmul.bf16.vlgmr.msra.gmra.mxu3 %v3832_v17  ;;  %v7034_v17 = vor.u32 %v7832_v22, %v7031_v61  ;;  %v6986_v22 = vor.u32 %v7820_v26, %v6983_v21  ;;  %v6957_v61 = vld [vmem:[#allocation7 + $0x20] sm:$0xf] }
 0x7d1   :  { %4311 = vmatpush.bf16.msra.mxu1 %v6978_v35  ;;  %v2747_v35 = vadd.f32 %v8592_v54, %v8631_v23 }
 0x7d2   :  { %4334 = vmatpush.bf16.msrb.mxu3 %v7034_v17  ;;  %v7817_v17 = vld [vmem:[#allocation7 + $0x2c] sm:$0xf0]  ;;  %4324 = vmatpush.bf16.msrb.mxu2 %v6982_v33 }
 0x7d3   :  { %v8049_v3 = vpop.eup %8048 }
 0x7d4   :  { %v4924_v25 = vmul.f32 %v8710_v9, %v8049_v3  ;;  %v7005_v3 = vld [vmem:[#allocation7 + $0x80] sm:$0xf] }
 0x7d6   :  { %4935 = vadd.xlane.f32.xlu1 %v4924_v25  ;;  %v7829_v25 = vld [vmem:[#allocation7 + $0x8c] sm:$0xf0]  ;;  %4335 = vmatpush.bf16.msrb.mxu3 %v7018_v32 }
 0x7d7   :  { %v7006_v24 = vor.u32 %v7829_v25, %v7005_v3  ;;  %v7815_v3 = vld [vmem:[#allocation7 + $0x24] sm:$0xf]  ;;  %v6958_v25 = vor.u32 %v7817_v17, %v6957_v61  ;;  %v7813_v32 = vld [vmem:[#allocation7 + $0xc] sm:$0xf0] }
 0x7d8   :  { %v6962_v38 = vor.u32 %v7815_v3, %v6959_v42  ;;  %v6942_v50 = vor.u32 %v7813_v32, %v6941_v59 }
 0x7d9   :  { %4296 = vmatpush.bf16.msrb.mxu0 %v7006_v24  ;;  %v6965_v24 = vld [vmem:[#allocation7 + $0x28] sm:$0xf] }
 0x7da   :  { %4336 = vmatpush.bf16.msrb.mxu3 %v7002_v46  ;;  %v6966_v37 = vor.u32 %v7818_v5, %v6965_v24  ;;  %4312 = vmatpush.bf16.msra.mxu1 %v6962_v38  ;;  %v2689_v46 = vadd.f32 %v8588_v52, %v8619_v62 }
 0x7dc   :  { %4325 = vmatpush.bf16.msrb.mxu2 %v6966_v37 }
 0x7dd   :  { %4297 = vmatpush.bf16.msrb.mxu0 %v6990_v11  ;;  %v6949_v11 = vld [vmem:[#allocation7 + $0x8] sm:$0xf] }
 0x7de   :  { %4337 = vmatpush.bf16.msrb.mxu3 %v6986_v22  ;;  %v6950_v13 = vor.u32 %v7814_v60, %v6949_v11  ;;  %4313 = vmatpush.bf16.msra.mxu1 %v6946_v51  ;;  %v7181_v60 = vld [vmem:[#allocation7 + $0xe0] sm:$0xf]  ;;  %v7871_v51 = vld [vmem:[#allocation7 + $0xe4] sm:$0xf] }
 0x7e0   :  { %4326 = vmatpush.bf16.msrb.mxu2 %v6950_v13  ;;  %v7182_v13 = vor.u32 %v7873_v56, %v7181_v60  ;;  %v7141_v60 = vld [vmem:[#allocation7 + $0x88] sm:$0xf]  ;;  %v7862_v56 = vld [vmem:[#allocation7 + $0x94] sm:$0xf0] }
 0x7e1   :  { %4298 = vmatpush.bf16.msrb.mxu0 %v6974_v53 }
 0x7e2   :  { %4338 = vmatpush.bf16.msrb.mxu3 %v6970_v63 }
 0x7e5   :  { %4299 = vmatpush.bf16.msrb.mxu0 %v6958_v25 }
 0x7e6   :  { %4339 = vmatpush.bf16.msrb.mxu3 %v6954_v55  ;;  %v7189_v55 = vld [vmem:[#allocation7 + $0xe8] sm:$0xf] }
 0x7e9   :  { %4300 = vmatpush.bf16.msrb.mxu0 %v6942_v50 }
 0x7ed   :  { %4561 = vmatpush.bf16.msra.mxu0 %v7182_v13  ;;  %v7142_v13 = vor.u32 %v7862_v56, %v7141_v60  ;;  %v7095_v60 = vld [vmem:[#allocation7 + $0x38] sm:$0xf0]  ;;  %v7069_v56 = vld [vmem:[#allocation7] sm:$0xf] }
 0x84c   :  { %v4034_v30 = vpop.f32.mrf.mxu0  ;;  %v4047_v15 = vpop.f32.mrf.mxu1 }
 0x84d   :  { %v4077_v7 = vadd.f32 %v4034_v30, %v2660_v31  ;;  %v4078_v53 = vadd.f32 %v4047_v15, %v2689_v46  ;;  %v7874_v31 = vld [vmem:[#allocation7 + $0xf4] sm:$0xf0]  ;;  %v7186_v46 = vor.u32 %v7871_v51, %v7183_v19  ;;  %v7872_v15 = vld [vmem:[#allocation7 + $0xec] sm:$0xf] }
 0x84e   :  { %v7190_v30 = vor.u32 %v7874_v31, %v7189_v55  ;;  %v7860_v19 = vld [vmem:[#allocation7 + $0x8c] sm:$0xf]  ;;  %v7143_v55 = vld [vmem:[#allocation7 + $0x98] sm:$0xf0] }
 0x84f   :  { %v4081_v28 = vmul.f32 0.5, %v4077_v7  ;;  %v4082_v44 = vmul.f32 0.5, %v4078_v53  ;;  %v7191_v7 = vld [vmem:[#allocation7 + $0xf8] sm:$0xf0]  ;;  %4574 = vmatpush.bf16.msrb.mxu1 %v7186_v46  ;;  %v7146_v31 = vor.u32 %v7860_v19, %v7143_v55  ;;  %v7117_v46 = vld [vmem:[#allocation7 + $0x60] sm:$0xf] }
 0x850   :  { %v7194_v53 = vor.u32 %v7872_v15, %v7191_v7  ;;  %4587 = vmatpush.bf16.msra.mxu2 %v7190_v30  ;;  %v7857_v30 = vld [vmem:[#allocation7 + $0x6c] sm:$0xf0]  ;;  %v7855_v15 = vld [vmem:[#allocation7 + $0x64] sm:$0xf]  ;;  %v7071_v55 = vld [vmem:[#allocation7 + $0x10] sm:$0xf0] }
 0x851   :  { %8050 = vtanh.f32 %v4081_v28  ;;  %v7165_v28 = vld [vmem:[#allocation7 + $0xc0] sm:$0xf]  ;;  %v7118_v7 = vor.u32 %v7857_v30, %v7117_v46  ;;  %v7843_v19 = vld [vmem:[#allocation7 + $0x4] sm:$0xf]  ;;  %v7077_v46 = vld [vmem:[#allocation7 + $0x8] sm:$0xf] }
 0x852   :  { %8052 = vtanh.f32 %v4082_v44  ;;  %v7869_v44 = vld [vmem:[#allocation7 + $0xcc] sm:$0xf0]  ;;  %4600 = vmatpush.bf16.msra.mxu3 %v7194_v53  ;;  %v7119_v53 = vld [vmem:[#allocation7 + $0x70] sm:$0xf0]  ;;  %v7846_v30 = vld [vmem:[#allocation7 + $0x14] sm:$0xf0] }
 0x853   :  { %v4060_v33 = vpop.f32.mrf.mxu2  ;;  %v4073_v36 = vpop.f32.mrf.mxu3 }
 0x854   :  { %v4079_v26 = vadd.f32 %v4060_v33, %v2718_v0  ;;  %v4080_v21 = vadd.f32 %v4073_v36, %v2747_v35  ;;  %v4036_v52 = vpop.f32.mrf.mxu0  ;;  %v4049_v22 = vpop.f32.mrf.mxu1  ;;  %v7867_v0 = vld [vmem:[#allocation7 + $0xc4] sm:$0xf]  ;;  %v7166_v35 = vor.u32 %v7869_v44, %v7165_v28  ;;  %v7167_v33 = vld [vmem:[#allocation7 + $0xd0] sm:$0xf0]  ;;  %v7173_v36 = vld [vmem:[#allocation7 + $0xc8] sm:$0xf] }
 0x855   :  { %v7868_v22 = vld [vmem:[#allocation7 + $0xcc] sm:$0xf]  ;;  %v7125_v28 = vld [vmem:[#allocation7 + $0x68] sm:$0xf]  ;;  %v7858_v44 = vld [vmem:[#allocation7 + $0x74] sm:$0xf0] }
 0x856   :  { %v4083_v61 = vmul.f32 0.5, %v4079_v26  ;;  %8054 = vtanh.f32 %v4080_v21  ;;  %v7870_v26 = vld [vmem:[#allocation7 + $0xd4] sm:$0xf0]  ;;  %v7170_v21 = vor.u32 %v7867_v0, %v7167_v33  ;;  %4562 = vmatpush.bf16.msra.mxu0 %v7166_v35  ;;  %v7122_v0 = vor.u32 %v7855_v15, %v7119_v53  ;;  %v7856_v33 = vld [vmem:[#allocation7 + $0x6c] sm:$0xf] }
 0x857   :  { %v8051_v17 = vpop.eup %8050  ;;  %v7174_v52 = vor.u32 %v7870_v26, %v7173_v36  ;;  %v7126_v35 = vor.u32 %v7858_v44, %v7125_v28  ;;  %v7127_v36 = vld [vmem:[#allocation7 + $0x78] sm:$0xf0]  ;;  %v7844_v15 = vld [vmem:[#allocation7 + $0xc] sm:$0xf]  ;;  %v7078_v53 = vor.u32 %v7846_v30, %v7077_v46  ;;  %v7903_v46 = vld [vmem:[#allocation7 + $0xe4] sm:$0xf] }
 0x858   :  { %v8053_v3 = vpop.eup %8052  ;;  %v4087_v25 = vmul.f32 0.5, %v8051_v17  ;;  %8056 = vtanh.f32 %v4083_v61  ;;  %v7175_v61 = vld [vmem:[#allocation7 + $0xd8] sm:$0xf0]  ;;  %4575 = vmatpush.bf16.msrb.mxu1 %v7170_v21  ;;  %v7130_v26 = vor.u32 %v7856_v33, %v7127_v36  ;;  %v7101_v21 = vld [vmem:[#allocation7 + $0x40] sm:$0xf] }
 0x859   :  { %v4088_v42 = vmul.f32 0.5, %v8053_v3  ;;  %v7178_v17 = vor.u32 %v7868_v22, %v7175_v61  ;;  %4588 = vmatpush.bf16.msra.mxu2 %v7174_v52  ;;  %v7149_v3 = vld [vmem:[#allocation7 + $0xa0] sm:$0xf]  ;;  %v7853_v52 = vld [vmem:[#allocation7 + $0x4c] sm:$0xf0] }
 0x85a   :  { %v4090_v24 = vadd.f32 0.5, %v4087_v25  ;;  %v7865_v25 = vld [vmem:[#allocation7 + $0xac] sm:$0xf0]  ;;  %v7851_v22 = vld [vmem:[#allocation7 + $0x44] sm:$0xf]  ;;  %v7102_v61 = vor.u32 %v7853_v52, %v7101_v21 }
 0x85b   :  { %v4091_v5 = vadd.f32 0.5, %v4088_v42  ;;  %v4062_v1 = vpop.f32.mrf.mxu2  ;;  %v4075_v38 = vpop.f32.mrf.mxu3  ;;  %v7863_v42 = vld [vmem:[#allocation7 + $0xa4] sm:$0xf]  ;;  %4601 = vmatpush.bf16.msra.mxu3 %v7178_v17  ;;  %v7103_v17 = vld [vmem:[#allocation7 + $0x50] sm:$0xf0] }
 0x85c   :  { %v8055_v37 = vpop.eup %8054  ;;  %v7157_v1 = vld [vmem:[#allocation7 + $0xa8] sm:$0xf]  ;;  %v7866_v38 = vld [vmem:[#allocation7 + $0xb4] sm:$0xf0]  ;;  %v7079_v28 = vld [vmem:[#allocation7 + $0x18] sm:$0xf0] }
 0x85d   :  { %v4094_v54 = vmul.f32 %v4091_v5, %v8699_v27  ;;  %v4095_v6 = vmul.f32 %v8055_v37, %v4090_v24  ;;  %v7150_v24 = vor.u32 %v7865_v25, %v7149_v3  ;;  %v7151_v5 = vld [vmem:[#allocation7 + $0xb0] sm:$0xf0]  ;;  %v7109_v3 = vld [vmem:[#allocation7 + $0x48] sm:$0xf]  ;;  %v7854_v25 = vld [vmem:[#allocation7 + $0x54] sm:$0xf0]  ;;  %v7082_v44 = vor.u32 %v7844_v15, %v7079_v28 }
 0x85e   :  { %v8057_v49 = vpop.eup %8056  ;;  %v7154_v37 = vor.u32 %v7863_v42, %v7151_v5  ;;  %v7106_v42 = vor.u32 %v7851_v22, %v7103_v17  ;;  %v7852_v5 = vld [vmem:[#allocation7 + $0x4c] sm:$0xf]  ;;  %v2749_v17 = vadd.f32 %v8600_v12, %v8631_v23  ;;  %v7311_v15 = vld [vmem:[#allocation7 + $0xf0] sm:$0xf0] }
 0x85f   :  { %v8722_v59 = vadd.f32 %v4095_v6, %v4094_v54  ;;  %v4089_v63 = vmul.f32 0.5, %v8057_v49  ;;  %v7158_v54 = vor.u32 %v7866_v38, %v7157_v1  ;;  %v7864_v6 = vld [vmem:[#allocation7 + $0xac] sm:$0xf]  ;;  %v7159_v49 = vld [vmem:[#allocation7 + $0xb8] sm:$0xf0]  ;;  %4563 = vmatpush.bf16.msra.mxu0 %v7150_v24  ;;  %v7110_v24 = vor.u32 %v7854_v25, %v7109_v3 }
 0x860   :  { %4576 = vmatpush.bf16.msrb.mxu1 %v7154_v37  ;;  %v7111_v1 = vld [vmem:[#allocation7 + $0x58] sm:$0xf0]  ;;  %v7085_v37 = vld [vmem:[#allocation7 + $0x20] sm:$0xf]  ;;  %v7314_v28 = vor.u32 %v7903_v46, %v7311_v15  ;;  %v7889_v15 = vld [vmem:[#allocation7 + $0x6c] sm:$0xf0] }
 0x861   :  { %8058 = vtanh.f32 %v8722_v59  ;;  %v4092_v32 = vadd.f32 0.5, %v4089_v63  ;;  %v7162_v63 = vor.u32 %v7864_v6, %v7159_v49  ;;  %4589 = vmatpush.bf16.msra.mxu2 %v7158_v54  ;;  %v7114_v38 = vor.u32 %v7852_v5, %v7111_v1  ;;  %v7849_v54 = vld [vmem:[#allocation7 + $0x2c] sm:$0xf0]  ;;  %v7847_v6 = vld [vmem:[#allocation7 + $0x24] sm:$0xf] }
 0x862   :  { %v7086_v49 = vor.u32 %v7849_v54, %v7085_v37 }
 0x863   :  { %4602 = vmatpush.bf16.msra.mxu3 %v7162_v63  ;;  %v7087_v63 = vld [vmem:[#allocation7 + $0x30] sm:$0xf0] }
 0x865   :  { %4590 = vmatpush.bf16.msra.mxu2 %v7142_v13  ;;  %v7845_v13 = vld [vmem:[#allocation7 + $0xc] sm:$0xf0] }
 0x867   :  { %v8059_v40 = vpop.eup %8058  ;;  %4603 = vmatpush.bf16.msra.mxu3 %v7146_v31  ;;  %v7070_v31 = vor.u32 %v7845_v13, %v7069_v56 }
 0x868   :  { %v8725_v41 = vmul.f32 %v8059_v40, %v4092_v32  ;;  %v7133_v32 = vld [vmem:[#allocation7 + $0x80] sm:$0xf]  ;;  %v7861_v40 = vld [vmem:[#allocation7 + $0x8c] sm:$0xf0] }
 0x869   :  { %4591 = vmatpush.bf16.msra.mxu2 %v7126_v35  ;;  %v2691_v35 = vadd.f32 %v8596_v16, %v8619_v62 }
 0x86a   :  { %v4100_v50 = vpack.c.bf16 %v8725_v41, %v8725_v41  ;;  %8060 = vtanh.f32 %v8725_v41 }
 0x86b   :  { %4604 = vmatpush.bf16.msra.mxu3 %v7130_v26 }
 0x86c   :  { %4301 = vmatmul.bf16.vlgmr.msrb.gmra.mxu0 %v4100_v50  ;;  %4314 = vmatmul.bf16.vlgmr.msra.gmra.mxu1 %v4100_v50 }
 0x86d   :  { %4327 = vmatmul.bf16.vlgmr.msrb.gmra.mxu2 %v4100_v50  ;;  %4340 = vmatmul.bf16.vlgmr.msrb.gmra.mxu3 %v4100_v50  ;;  %v7859_v50 = vld [vmem:[#allocation7 + $0x84] sm:$0xf] }
 0x86e   :  { %4592 = vmatpush.bf16.msra.mxu2 %v7110_v24 }
 0x86f   :  { %4605 = vmatpush.bf16.msra.mxu3 %v7114_v38 }
 0x870   :  { %v8061_v27 = vpop.eup %8060 }
 0x871   :  { %v4925_v11 = vmul.f32 %v8710_v9, %v8061_v27  ;;  %v7134_v27 = vor.u32 %v7861_v40, %v7133_v32  ;;  %v7093_v32 = vld [vmem:[#allocation7 + $0x28] sm:$0xf]  ;;  %v7850_v40 = vld [vmem:[#allocation7 + $0x34] sm:$0xf0] }
 0x873   :  { %4937 = vadd.xlane.f32.xlu2 %v4925_v11  ;;  %v7135_v11 = vld [vmem:[#allocation7 + $0x90] sm:$0xf0]  ;;  %4564 = vmatpush.bf16.msra.mxu0 %v7134_v27  ;;  %v7094_v27 = vor.u32 %v7850_v40, %v7093_v32 }
 0x874   :  { %v7138_v51 = vor.u32 %v7859_v50, %v7135_v11  ;;  %v7090_v50 = vor.u32 %v7847_v6, %v7087_v63  ;;  %v7848_v11 = vld [vmem:[#allocation7 + $0x2c] sm:$0xf] }
 0x875   :  { %4593 = vmatpush.bf16.msra.mxu2 %v7094_v27 }
 0x876   :  { %4577 = vmatpush.bf16.msrb.mxu1 %v7138_v51  ;;  %v7098_v51 = vor.u32 %v7848_v11, %v7095_v60 }
 0x877   :  { %4565 = vmatpush.bf16.msra.mxu0 %v7118_v7  ;;  %v7074_v7 = vor.u32 %v7843_v19, %v7071_v55  ;;  %v7309_v55 = vld [vmem:[#allocation7 + $0xe0] sm:$0xf] }
 0x878   :  { %4606 = vmatpush.bf16.msra.mxu3 %v7098_v51 }
 0x879   :  { %4594 = vmatpush.bf16.msra.mxu2 %v7078_v53  ;;  %v7906_v53 = vld [vmem:[#allocation7 + $0xf4] sm:$0xf0] }
 0x87a   :  { %4578 = vmatpush.bf16.msrb.mxu1 %v7122_v0  ;;  %v2662_v0 = vadd.f32 %v8594_v10, %v8617_v48 }
 0x87b   :  { %4566 = vmatpush.bf16.msra.mxu0 %v7102_v61  ;;  %v2720_v61 = vadd.f32 %v8598_v45, %v8629_v18 }
 0x87c   :  { %4607 = vmatpush.bf16.msra.mxu3 %v7082_v44 }
 0x87e   :  { %4579 = vmatpush.bf16.msrb.mxu1 %v7106_v42 }
 0x87f   :  { %4567 = vmatpush.bf16.msra.mxu0 %v7086_v49 }
 0x882   :  { %4580 = vmatpush.bf16.msrb.mxu1 %v7090_v50 }
 0x883   :  { %4568 = vmatpush.bf16.msra.mxu0 %v7070_v31  ;;  %v7905_v31 = vld [vmem:[#allocation7 + $0xec] sm:$0xf0] }
 0x884   :  { %v7310_v30 = vor.u32 %v7905_v31, %v7309_v55  ;;  %v7892_v55 = vld [vmem:[#allocation7 + $0x8c] sm:$0xf]  ;;  %v7271_v31 = vld [vmem:[#allocation7 + $0x98] sm:$0xf0] }
 0x885   :  { %v7274_v46 = vor.u32 %v7892_v55, %v7271_v31  ;;  %v7878_v55 = vld [vmem:[#allocation7 + $0x14] sm:$0xf0]  ;;  %v7876_v31 = vld [vmem:[#allocation7 + $0xc] sm:$0xf] }
 0x886   :  { %4581 = vmatpush.bf16.msrb.mxu1 %v7074_v7  ;;  %v7317_v7 = vld [vmem:[#allocation7 + $0xe8] sm:$0xf] }
 0x887   :  { %v7318_v44 = vor.u32 %v7906_v53, %v7317_v7  ;;  %4829 = vmatpush.bf16.msrb.mxu0 %v7310_v30  ;;  %v7245_v30 = vld [vmem:[#allocation7 + $0x60] sm:$0xf]  ;;  %v7887_v7 = vld [vmem:[#allocation7 + $0x64] sm:$0xf] }
 0x888   :  { %v7246_v53 = vor.u32 %v7889_v15, %v7245_v30  ;;  %v7207_v15 = vld [vmem:[#allocation7 + $0x18] sm:$0xf0] }
 0x889   :  { %4855 = vmatpush.bf16.msrb.mxu2 %v7318_v44  ;;  %v7253_v44 = vld [vmem:[#allocation7 + $0x68] sm:$0xf] }
 0x88a   :  { %4842 = vmatpush.bf16.msra.mxu1 %v7314_v28  ;;  %v7247_v28 = vld [vmem:[#allocation7 + $0x70] sm:$0xf0] }
 0x8e9   :  { %v4302_v33 = vpop.f32.mrf.mxu0  ;;  %v4315_v36 = vpop.f32.mrf.mxu1 }
 0x8ea   :  { %v4345_v26 = vadd.f32 %v4302_v33, %v2662_v0  ;;  %v4346_v21 = vadd.f32 %v4315_v36, %v2691_v35  ;;  %v7904_v0 = vld [vmem:[#allocation7 + $0xec] sm:$0xf]  ;;  %v7319_v35 = vld [vmem:[#allocation7 + $0xf8] sm:$0xf0]  ;;  %v7293_v36 = vld [vmem:[#allocation7 + $0xc0] sm:$0xf] }
 0x8eb   :  { %v7322_v33 = vor.u32 %v7904_v0, %v7319_v35  ;;  %v7890_v0 = vld [vmem:[#allocation7 + $0x74] sm:$0xf0]  ;;  %v7250_v35 = vor.u32 %v7887_v7, %v7247_v28  ;;  %v7210_v7 = vor.u32 %v7876_v31, %v7207_v15  ;;  %v2694_v28 = vadd.f32 %v8604_v29, %v8619_v62 }
 0x8ec   :  { %v4349_v52 = vmul.f32 0.5, %v4345_v26  ;;  %v4350_v22 = vmul.f32 0.5, %v4346_v21  ;;  %v7901_v26 = vld [vmem:[#allocation7 + $0xcc] sm:$0xf0]  ;;  %v7899_v21 = vld [vmem:[#allocation7 + $0xc4] sm:$0xf] }
 0x8ed   :  { %4868 = vmatpush.bf16.msrb.mxu3 %v7322_v33  ;;  %v7254_v33 = vor.u32 %v7890_v0, %v7253_v44 }
 0x8ee   :  { %8062 = vtanh.f32 %v4349_v52  ;;  %v7295_v52 = vld [vmem:[#allocation7 + $0xd0] sm:$0xf0] }
 0x8ef   :  { %8064 = vtanh.f32 %v4350_v22  ;;  %v7301_v22 = vld [vmem:[#allocation7 + $0xc8] sm:$0xf] }
 0x8f0   :  { %v4328_v3 = vpop.f32.mrf.mxu2  ;;  %v4341_v10 = vpop.f32.mrf.mxu3 }
 0x8f1   :  { %v4347_v25 = vadd.f32 %v4328_v3, %v2720_v61  ;;  %v4348_v42 = vadd.f32 %v4341_v10, %v2749_v17  ;;  %v4304_v16 = vpop.f32.mrf.mxu0  ;;  %v4317_v24 = vpop.f32.mrf.mxu1  ;;  %v7902_v61 = vld [vmem:[#allocation7 + $0xd4] sm:$0xf0]  ;;  %v7298_v17 = vor.u32 %v7899_v21, %v7295_v52  ;;  %v7900_v10 = vld [vmem:[#allocation7 + $0xcc] sm:$0xf]  ;;  %v7885_v52 = vld [vmem:[#allocation7 + $0x4c] sm:$0xf0] }
 0x8f2   :  { %v7302_v3 = vor.u32 %v7902_v61, %v7301_v22  ;;  %v7277_v16 = vld [vmem:[#allocation7 + $0xa0] sm:$0xf]  ;;  %v7897_v24 = vld [vmem:[#allocation7 + $0xac] sm:$0xf0]  ;;  %v7883_v22 = vld [vmem:[#allocation7 + $0x44] sm:$0xf] }
 0x8f3   :  { %v4351_v5 = vmul.f32 0.5, %v4347_v25  ;;  %8066 = vtanh.f32 %v4348_v42  ;;  %v7303_v25 = vld [vmem:[#allocation7 + $0xd8] sm:$0xf0]  ;;  %4843 = vmatpush.bf16.msra.mxu1 %v7298_v17  ;;  %v7231_v17 = vld [vmem:[#allocation7 + $0x50] sm:$0xf0] }
 0x8f4   :  { %v8063_v1 = vpop.eup %8062  ;;  %v7306_v42 = vor.u32 %v7900_v10, %v7303_v25  ;;  %4856 = vmatpush.bf16.msrb.mxu2 %v7302_v3  ;;  %v7237_v3 = vld [vmem:[#allocation7 + $0x48] sm:$0xf]  ;;  %v7886_v10 = vld [vmem:[#allocation7 + $0x54] sm:$0xf0]  ;;  %v7234_v25 = vor.u32 %v7883_v22, %v7231_v17 }
 0x8f5   :  { %v8065_v38 = vpop.eup %8064  ;;  %v4355_v37 = vmul.f32 0.5, %v8063_v1  ;;  %8068 = vtanh.f32 %v4351_v5  ;;  %v7895_v5 = vld [vmem:[#allocation7 + $0xa4] sm:$0xf]  ;;  %v7278_v1 = vor.u32 %v7897_v24, %v7277_v16  ;;  %v7884_v16 = vld [vmem:[#allocation7 + $0x4c] sm:$0xf] }
 0x8f6   :  { %v4356_v54 = vmul.f32 0.5, %v8065_v38  ;;  %4869 = vmatpush.bf16.msrb.mxu3 %v7306_v42  ;;  %v7279_v38 = vld [vmem:[#allocation7 + $0xb0] sm:$0xf0]  ;;  %v7238_v42 = vor.u32 %v7886_v10, %v7237_v3  ;;  %v7239_v24 = vld [vmem:[#allocation7 + $0x58] sm:$0xf0] }
 0x8f7   :  { %v4358_v6 = vadd.f32 0.5, %v4355_v37  ;;  %v7285_v37 = vld [vmem:[#allocation7 + $0xa8] sm:$0xf] }
 0x8f8   :  { %v4359_v49 = vadd.f32 0.5, %v4356_v54  ;;  %v4330_v45 = vpop.f32.mrf.mxu2  ;;  %v4343_v63 = vpop.f32.mrf.mxu3  ;;  %v7898_v54 = vld [vmem:[#allocation7 + $0xb4] sm:$0xf0] }
 0x8f9   :  { %v8067_v32 = vpop.eup %8066  ;;  %v7896_v45 = vld [vmem:[#allocation7 + $0xac] sm:$0xf]  ;;  %v7287_v63 = vld [vmem:[#allocation7 + $0xb8] sm:$0xf0] }
 0x8fa   :  { %v4362_v12 = vmul.f32 %v4359_v49, %v8722_v59  ;;  %v4363_v40 = vmul.f32 %v8067_v32, %v4358_v6  ;;  %v7282_v6 = vor.u32 %v7895_v5, %v7279_v38  ;;  %v7286_v49 = vor.u32 %v7898_v54, %v7285_v37  ;;  %v7881_v38 = vld [vmem:[#allocation7 + $0x2c] sm:$0xf0]  ;;  %v7879_v37 = vld [vmem:[#allocation7 + $0x24] sm:$0xf] }
 0x8fb   :  { %v8069_v50 = vpop.eup %8068  ;;  %v7290_v32 = vor.u32 %v7896_v45, %v7287_v63  ;;  %v7242_v5 = vor.u32 %v7884_v16, %v7239_v24  ;;  %v7882_v45 = vld [vmem:[#allocation7 + $0x34] sm:$0xf0] }
 0x8fc   :  { %v8740_v27 = vadd.f32 %v4363_v40, %v4362_v12  ;;  %v4357_v11 = vmul.f32 0.5, %v8069_v50  ;;  %4844 = vmatpush.bf16.msra.mxu1 %v7282_v6  ;;  %4857 = vmatpush.bf16.msrb.mxu2 %v7286_v49  ;;  %v7261_v12 = vld [vmem:[#allocation7 + $0x80] sm:$0xf]  ;;  %v7893_v40 = vld [vmem:[#allocation7 + $0x8c] sm:$0xf0] }
 0x8fd   :  { %v7891_v50 = vld [vmem:[#allocation7 + $0x84] sm:$0xf]  ;;  %4870 = vmatpush.bf16.msrb.mxu3 %v7290_v32  ;;  %v7215_v6 = vld [vmem:[#allocation7 + $0x30] sm:$0xf0]  ;;  %v7221_v49 = vld [vmem:[#allocation7 + $0x28] sm:$0xf] }
 0x8fe   :  { %8070 = vtanh.f32 %v8740_v27  ;;  %v4360_v60 = vadd.f32 0.5, %v4357_v11  ;;  %v7262_v11 = vor.u32 %v7893_v40, %v7261_v12  ;;  %v7218_v63 = vor.u32 %v7879_v37, %v7215_v6  ;;  %v7880_v12 = vld [vmem:[#allocation7 + $0x2c] sm:$0xf]  ;;  %v7223_v40 = vld [vmem:[#allocation7 + $0x38] sm:$0xf0] }
 0x8ff   :  { %v7222_v32 = vor.u32 %v7882_v45, %v7221_v49 }
 0x901   :  { %4871 = vmatpush.bf16.msrb.mxu3 %v7274_v46 }
 0x904   :  { %v8071_v56 = vpop.eup %8070 }
 0x905   :  { %v8743_v51 = vmul.f32 %v8071_v56, %v4360_v60  ;;  %v7263_v60 = vld [vmem:[#allocation7 + $0x90] sm:$0xf0]  ;;  %v7269_v56 = vld [vmem:[#allocation7 + $0x88] sm:$0xf] }
 0x907   :  { %v4368_v13 = vpack.c.bf16 %v8743_v51, %v8743_v51  ;;  %8072 = vtanh.f32 %v8743_v51 }
 0x909   :  { %4569 = vmatmul.bf16.vlgmr.msra.gmra.mxu0 %v4368_v13  ;;  %4582 = vmatmul.bf16.vlgmr.msrb.gmra.mxu1 %v4368_v13 }
 0x90a   :  { %4595 = vmatmul.bf16.vlgmr.msra.gmra.mxu2 %v4368_v13  ;;  %4608 = vmatmul.bf16.vlgmr.msra.gmra.mxu3 %v4368_v13  ;;  %v7894_v13 = vld [vmem:[#allocation7 + $0x94] sm:$0xf0] }
 0x90d   :  { %v8073_v59 = vpop.eup %8072 }
 0x90e   :  { %v4926_v19 = vmul.f32 %v8710_v9, %v8073_v59  ;;  %v7294_v9 = vor.u32 %v7901_v26, %v7293_v36  ;;  %v7266_v59 = vor.u32 %v7891_v50, %v7263_v60  ;;  %v7888_v36 = vld [vmem:[#allocation7 + $0x6c] sm:$0xf]  ;;  %v7255_v26 = vld [vmem:[#allocation7 + $0x78] sm:$0xf0]  ;;  %v7197_v50 = vld [vmem:[#allocation7] sm:$0xf] }
 0x90f   :  { %v7258_v21 = vor.u32 %v7888_v36, %v7255_v26  ;;  %v7877_v60 = vld [vmem:[#allocation7 + $0xc] sm:$0xf0] }
 0x910   :  { %4939 = vadd.xlane.f32.xlu2 %v4926_v19  ;;  %4830 = vmatpush.bf16.msrb.mxu0 %v7294_v9  ;;  %v7270_v19 = vor.u32 %v7894_v13, %v7269_v56  ;;  %v7229_v9 = vld [vmem:[#allocation7 + $0x40] sm:$0xf]  ;;  %v7875_v56 = vld [vmem:[#allocation7 + $0x4] sm:$0xf]  ;;  %v7199_v13 = vld [vmem:[#allocation7 + $0x10] sm:$0xf0] }
 0x911   :  { %4845 = vmatpush.bf16.msra.mxu1 %v7266_v59  ;;  %4872 = vmatpush.bf16.msrb.mxu3 %v7258_v21  ;;  %v7230_v61 = vor.u32 %v7885_v52, %v7229_v9  ;;  %v7198_v59 = vor.u32 %v7877_v60, %v7197_v50  ;;  %v7202_v46 = vor.u32 %v7875_v56, %v7199_v13 }
 0x912   :  { %4858 = vmatpush.bf16.msrb.mxu2 %v7270_v19  ;;  %v7205_v19 = vld [vmem:[#allocation7 + $0x8] sm:$0xf]  ;;  %v2723_v21 = vadd.f32 %v8609_v58, %v8629_v18  ;;  %v2752_v9 = vadd.f32 %v8611_v39, %v8631_v23  ;;  %v2696_v60 = vadd.f32 %v8615_v57, %v8619_v62 }
 0x913   :  { %v7206_v30 = vor.u32 %v7878_v55, %v7205_v19 }
 0x914   :  { %4831 = vmatpush.bf16.msrb.mxu0 %v7278_v1  ;;  %v7213_v1 = vld [vmem:[#allocation7 + $0x20] sm:$0xf] }
 0x915   :  { %4846 = vmatpush.bf16.msra.mxu1 %v7250_v35  ;;  %v7214_v54 = vor.u32 %v7881_v38, %v7213_v1  ;;  %4873 = vmatpush.bf16.msrb.mxu3 %v7242_v5 }
 0x916   :  { %4859 = vmatpush.bf16.msrb.mxu2 %v7254_v33 }
 0x918   :  { %4832 = vmatpush.bf16.msrb.mxu0 %v7262_v11  ;;  %v7226_v11 = vor.u32 %v7880_v12, %v7223_v40 }
 0x919   :  { %4847 = vmatpush.bf16.msra.mxu1 %v7234_v25 }
 0x91a   :  { %4860 = vmatpush.bf16.msrb.mxu2 %v7238_v42  ;;  %4874 = vmatpush.bf16.msrb.mxu3 %v7226_v11  ;;  %v2667_v11 = vadd.f32 %v8613_v43, %v8617_v48 }
 0x91c   :  { %4833 = vmatpush.bf16.msrb.mxu0 %v7246_v53  ;;  %v2665_v53 = vadd.f32 %v8602_v14, %v8617_v48 }
 0x91d   :  { %4848 = vmatpush.bf16.msra.mxu1 %v7218_v63 }
 0x91e   :  { %4861 = vmatpush.bf16.msrb.mxu2 %v7222_v32  ;;  %4875 = vmatpush.bf16.msrb.mxu3 %v7210_v7 }
 0x920   :  { %4834 = vmatpush.bf16.msrb.mxu0 %v7230_v61 }
 0x921   :  { %4849 = vmatpush.bf16.msra.mxu1 %v7202_v46  ;;  %v2725_v46 = vadd.f32 %v8625_v20, %v8629_v18 }
 0x922   :  { %4862 = vmatpush.bf16.msrb.mxu2 %v7206_v30  ;;  %v2754_v30 = vadd.f32 %v8627_v4, %v8631_v23 }
 0x924   :  { %4835 = vmatpush.bf16.msrb.mxu0 %v7214_v54 }
 0x928   :  { %4836 = vmatpush.bf16.msrb.mxu0 %v7198_v59 }
 0x986   :  { %v4570_v44 = vpop.f32.mrf.mxu0  ;;  %v4583_v0 = vpop.f32.mrf.mxu1 }
 0x987   :  { %v4613_v35 = vadd.f32 %v4570_v44, %v2665_v53  ;;  %v4614_v33 = vadd.f32 %v4583_v0, %v2694_v28 }
 0x989   :  { %v4617_v36 = vmul.f32 0.5, %v4613_v35  ;;  %v4618_v26 = vmul.f32 0.5, %v4614_v33 }
 0x98b   :  { %8074 = vtanh.f32 %v4617_v36 }
 0x98c   :  { %8076 = vtanh.f32 %v4618_v26 }
 0x98d   :  { %v4596_v52 = vpop.f32.mrf.mxu2  ;;  %v4609_v14 = vpop.f32.mrf.mxu3 }
 0x98e   :  { %v4615_v22 = vadd.f32 %v4596_v52, %v2723_v21  ;;  %v4616_v61 = vadd.f32 %v4609_v14, %v2752_v9  ;;  %v4572_v29 = vpop.f32.mrf.mxu0  ;;  %v4585_v17 = vpop.f32.mrf.mxu1 }
 0x990   :  { %v4619_v3 = vmul.f32 0.5, %v4615_v22  ;;  %8078 = vtanh.f32 %v4616_v61 }
 0x991   :  { %v8075_v10 = vpop.eup %8074 }
 0x992   :  { %v8077_v25 = vpop.eup %8076  ;;  %v4623_v42 = vmul.f32 0.5, %v8075_v10  ;;  %8080 = vtanh.f32 %v4619_v3  ;;  %v4930_v3 = vpop.xlane.xlu0 %4929 }
 0x993   :  { %v4624_v16 = vmul.f32 0.5, %v8077_v25  ;;  %v4934_v10 = vpop.xlane.xlu1 %4933  ;;  %v4938_v25 = vpop.xlane.xlu2 %4937 }
 0x994   :  { %v4626_v24 = vadd.f32 0.5, %v4623_v42 }
 0x995   :  { %v4627_v5 = vadd.f32 0.5, %v4624_v16  ;;  %v4598_v58 = vpop.f32.mrf.mxu2  ;;  %v4611_v1 = vpop.f32.mrf.mxu3 }
 0x996   :  { %v8079_v38 = vpop.eup %8078 }
 0x997   :  { %v4630_v39 = vmul.f32 %v4627_v5, %v8740_v27  ;;  %v4631_v37 = vmul.f32 %v8079_v38, %v4626_v24  ;;  %v8117_v27 = vld [vmem:[%s8818_s3] sm:$0xff]  ;;  %v4945_v38 = vmax.f32 %v4930_v3, %v4938_v25 }
 0x998   :  { %v8081_v54 = vpop.eup %8080 }
 0x999   :  { %v4632_v6 = vadd.f32 %v4631_v37, %v4630_v39  ;;  %v4625_v49 = vmul.f32 0.5, %v8081_v54  ;;  %v7914_v54 = vld [vmem:[%s8825_s10 + $0x38] sm:$0xff] }
 0x99a   :  { %v4932_v42 = vpop.xlane.xlu0 %4931  ;;  %5076 = vmatpush.bf16.msra.mxu0 %v7914_v54 }
 0x99b   :  { %8082 = vtanh.f32 %v4632_v6  ;;  %v4628_v45 = vadd.f32 0.5, %v4625_v49  ;;  %v4936_v16 = vpop.xlane.xlu1 %4935  ;;  %v4940_v24 = vpop.xlane.xlu2 %4939 }
 0x99c   :  { %v4946_v58 = vmax.f32 %v4932_v42, %v4940_v24 }
 0x9a1   :  { %v8083_v63 = vpop.eup %8082 }
 0x9a2   :  { %v8758_v32 = vmul.f32 %v8083_v63, %v4628_v45  ;;  %v7913_v63 = vld [vmem:[%s8825_s10 + $0x30] sm:$0xff] }
 0x9a3   :  { %5077 = vmatpush.bf16.msra.mxu0 %v7913_v63 }
 0x9a4   :  { %v4636_v12 = vpack.c.bf16 %v8758_v32, %v8758_v32  ;;  %8084 = vtanh.f32 %v8758_v32 }
 0x9a6   :  { %4837 = vmatmul.bf16.vlgmr.msrb.gmra.mxu0 %v4636_v12  ;;  %4850 = vmatmul.bf16.vlgmr.msra.gmra.mxu1 %v4636_v12 }
 0x9a7   :  { %4863 = vmatmul.bf16.vlgmr.msrb.gmra.mxu2 %v4636_v12  ;;  %4876 = vmatmul.bf16.vlgmr.msrb.gmra.mxu3 %v4636_v12 }
 0x9aa   :  { %v8085_v40 = vpop.eup %8084 }
 0x9ab   :  { %v4927_v50 = vmul.f32 %v8117_v27, %v8085_v40 }
 0x9ad   :  { %4941 = vadd.xlane.f32.xlu0 %v4927_v50 }
 0xa20   :  { %v4942_v5 = vpop.xlane.xlu0 %4941 }
 0xa21   :  { %v4947_v39 = vmax.f32 %v4934_v10, %v4942_v5 }
 0xa23   :  { %v4838_v56 = vpop.f32.mrf.mxu0  ;;  %v4851_v13 = vpop.f32.mrf.mxu1 }
 0xa24   :  { %v4881_v59 = vadd.f32 %v4838_v56, %v2667_v11  ;;  %v4882_v19 = vadd.f32 %v4851_v13, %v2696_v60 }
 0xa26   :  { %v4885_v55 = vmul.f32 0.5, %v4881_v59  ;;  %v4886_v31 = vmul.f32 0.5, %v4882_v19  ;;  %v7912_v59 = vld [vmem:[%s8825_s10 + $0x28] sm:$0xff] }
 0xa27   :  { %5078 = vmatpush.bf16.msra.mxu0 %v7912_v59 }
 0xa28   :  { %8086 = vtanh.f32 %v4885_v55 }
 0xa29   :  { %8088 = vtanh.f32 %v4886_v31  ;;  %v7911_v31 = vld [vmem:[%s8825_s10 + $0x20] sm:$0xff] }
 0xa2a   :  { %v4864_v15 = vpop.f32.mrf.mxu2  ;;  %v4877_v7 = vpop.f32.mrf.mxu3 }
 0xa2b   :  { %v4883_v43 = vadd.f32 %v4864_v15, %v2725_v46  ;;  %v4884_v48 = vadd.f32 %v4877_v7, %v2754_v30  ;;  %v4840_v53 = vpop.f32.mrf.mxu0  ;;  %v4853_v57 = vpop.f32.mrf.mxu1  ;;  %5079 = vmatpush.bf16.msra.mxu0 %v7911_v31 }
 0xa2d   :  { %v4887_v62 = vmul.f32 0.5, %v4883_v43  ;;  %8090 = vtanh.f32 %v4884_v48  ;;  %v7910_v48 = vld [vmem:[%s8825_s10 + $0x18] sm:$0xff] }
 0xa2e   :  { %v8087_v28 = vpop.eup %8086 }
 0xa2f   :  { %v8089_v44 = vpop.eup %8088  ;;  %v4891_v0 = vmul.f32 0.5, %v8087_v28  ;;  %8092 = vtanh.f32 %v4887_v62  ;;  %5080 = vmatpush.bf16.msra.mxu0 %v7910_v48 }
 0xa30   :  { %v4892_v35 = vmul.f32 0.5, %v8089_v44 }
 0xa31   :  { %v4894_v33 = vadd.f32 0.5, %v4891_v0 }
 0xa32   :  { %v4895_v36 = vadd.f32 0.5, %v4892_v35  ;;  %v4866_v20 = vpop.f32.mrf.mxu2  ;;  %v4879_v18 = vpop.f32.mrf.mxu3  ;;  %v7909_v35 = vld [vmem:[%s8825_s10 + $0x10] sm:$0xff] }
 0xa33   :  { %v8091_v26 = vpop.eup %8090  ;;  %5081 = vmatpush.bf16.msra.mxu0 %v7909_v35 }
 0xa34   :  { %v4898_v4 = vmul.f32 %v4895_v36, %v4632_v6  ;;  %v4899_v23 = vmul.f32 %v8091_v26, %v4894_v33  ;;  %v4949_v6 = vmax.f32 %v4945_v38, %v4946_v58  ;;  %v7908_v26 = vld [vmem:[%s8825_s10 + $0x8] sm:$0xff] }
 0xa35   :  { %v8093_v21 = vpop.eup %8092 }
 0xa36   :  { %v4900_v9 = vadd.f32 %v4899_v23, %v4898_v4  ;;  %v4893_v52 = vmul.f32 0.5, %v8093_v21 }
 0xa37   :  { %5082 = vmatpush.bf16.msra.mxu0 %v7908_v26 }
 0xa38   :  { %8094 = vtanh.f32 %v4900_v9  ;;  %v4896_v14 = vadd.f32 0.5, %v4893_v52  ;;  %v7907_v52 = vld [vmem:[%s8825_s10] sm:$0xff] }
 0xa3b   :  { %5083 = vmatpush.bf16.msra.mxu0 %v7907_v52 }
 0xa3e   :  { %v8095_v22 = vpop.eup %8094 }
 0xa3f   :  { %v8774_v61 = vmul.f32 %v8095_v22, %v4896_v14 }
 0xa41   :  { %8096 = vtanh.f32 %v8774_v61 }
 0xa47   :  { %v8097_v29 = vpop.eup %8096 }
 0xa48   :  { %v4928_v17 = vmul.f32 %v8117_v27, %v8097_v29 }
 0xa4a   :  { %4943 = vadd.xlane.f32.xlu1 %v4928_v17 }
 0xabd   :  { %v4944_v1 = vpop.xlane.xlu1 %4943 }
 0xabe   :  { %v4948_v37 = vmax.f32 %v4936_v16, %v4944_v1 }
 0xac0   :  { %v4950_v49 = vmax.f32 %v4947_v39, %v4948_v37 }
 0xac2   :  { %v4951_v45 = vmax.f32 %v4949_v6, %v4950_v49 }
 0xac4   :  { %v4952_v12 = vsub.f32 %v4930_v3, %v4951_v45  ;;  %v4953_v40 = vsub.f32 %v4932_v42, %v4951_v45  ;;  %v4954_v27 = vsub.f32 %v4934_v10, %v4951_v45  ;;  %v4955_v50 = vsub.f32 %v4936_v16, %v4951_v45 }
 0xac5   :  { %v4956_v56 = vsub.f32 %v4938_v25, %v4951_v45  ;;  %v4957_v19 = vsub.f32 %v4940_v24, %v4951_v45  ;;  %v4958_v46 = vsub.f32 %v4942_v5, %v4951_v45  ;;  %v4959_v15 = vsub.f32 %v4944_v1, %v4951_v45 }
 0xac6   :  { %v4960_v11 = vmul.f32 1.442695, %v4952_v12  ;;  %v4962_v60 = vmul.f32 1.442695, %v4953_v40  ;;  %v4964_v13 = vmul.f32 1.442695, %v4954_v27 }
 0xac7   :  { %v4966_v55 = vmul.f32 1.442695, %v4955_v50  ;;  %v4968_v30 = vmul.f32 1.442695, %v4956_v56  ;;  %v4970_v7 = vmul.f32 1.442695, %v4957_v19 }
 0xac8   :  { %8098 = vpow2.f32 %v4960_v11  ;;  %v4972_v57 = vmul.f32 1.442695, %v4958_v46  ;;  %v4974_v44 = vmul.f32 1.442695, %v4959_v15 }
 0xac9   :  { %8100 = vpow2.f32 %v4962_v60 }
 0xaca   :  { %8102 = vpow2.f32 %v4964_v13 }
 0xacb   :  { %8104 = vpow2.f32 %v4966_v55 }
 0xacc   :  { %8106 = vpow2.f32 %v4968_v30 }
 0xacd   :  { %8108 = vpow2.f32 %v4970_v7 }
 0xace   :  { %v8099_v43 = vpop.eup %8098  ;;  %8110 = vpow2.f32 %v4972_v57 }
 0xacf   :  { %v8101_v53 = vpop.eup %8100  ;;  %8112 = vpow2.f32 %v4974_v44 }
 0xad0   :  { %v4976_v62 = vadd.f32 %v8101_v53, %v8099_v43  ;;  %v8103_v28 = vpop.eup %8102 }
 0xad1   :  { %v8105_v33 = vpop.eup %8104 }
 0xad2   :  { %v4977_v0 = vadd.f32 %v8103_v28, %v4976_v62  ;;  %v8107_v20 = vpop.eup %8106 }
 0xad3   :  { %v8109_v4 = vpop.eup %8108 }
 0xad4   :  { %v4978_v36 = vadd.f32 %v8105_v33, %v4977_v0  ;;  %v8111_v21 = vpop.eup %8110 }
 0xad5   :  { %v8113_v14 = vpop.eup %8112 }
 0xad6   :  { %v4979_v18 = vadd.f32 %v8107_v20, %v4978_v36 }
 0xad8   :  { %v4980_v23 = vadd.f32 %v8109_v4, %v4979_v18 }
 0xada   :  { %v4981_v9 = vadd.f32 %v8111_v21, %v4980_v23 }
 0xadc   :  { %v4982_v22 = vadd.f32 %v8113_v14, %v4981_v9 }
 0xade   :  { %8114 = vrcp.f32 %v4982_v22 }
 0xae4   :  { %v8115_v29 = vpop.eup %8114 }
 0xae5   :  { %v4984_v17 = vmul.f32 %v8115_v29, %v8099_v43  ;;  %v4985_v3 = vmul.f32 %v8115_v29, %v8101_v53  ;;  %v4986_v10 = vmul.f32 %v8115_v29, %v8103_v28  ;;  %v4987_v25 = vmul.f32 %v8115_v29, %v8105_v33 }
 0xae6   :  { %v4988_v24 = vmul.f32 %v8115_v29, %v8107_v20  ;;  %v4989_v1 = vmul.f32 %v8115_v29, %v8109_v4  ;;  %v4990_v37 = vmul.f32 %v8115_v29, %v8111_v21  ;;  %v4991_v49 = vmul.f32 %v8115_v29, %v8113_v14 }
 0xae7   :  { %v4992_v42 = vmul.f32 %v4984_v17, %v8643_v47  ;;  %v4993_v16 = vmul.f32 %v4985_v3, %v8666_v8  ;;  %v4994_v5 = vmul.f32 %v4986_v10, %v8684_v34  ;;  %v4995_v38 = vmul.f32 %v4987_v25, %v8702_v2  ;;  %v7921_v2 = vld [vmem:[%s8826_s11] ss:$0 sm:$0xff] }
 0xae8   :  { %v4996_v54 = vmul.f32 %v4988_v24, %v8725_v41  ;;  %v4997_v45 = vmul.f32 %v4989_v1, %v8743_v51  ;;  %v4998_v47 = vmul.f32 %v4990_v37, %v8758_v32  ;;  %v4999_v8 = vmul.f32 %v4991_v49, %v8774_v61 }
 0xae9   :  { %v5000_v58 = vadd.f32 %v4993_v16, %v4992_v42 }
 0xaeb   :  { %v5001_v39 = vadd.f32 %v5000_v58, %v4994_v5 }
 0xaed   :  { %v5002_v6 = vadd.f32 %v5001_v39, %v4995_v38 }
 0xaef   :  { %v5003_v63 = vadd.f32 %v5002_v6, %v4996_v54 }
 0xaf1   :  { %v5004_v12 = vadd.f32 %v5003_v63, %v4997_v45 }
 0xaf3   :  { %v5005_v40 = vadd.f32 %v5004_v12, %v4998_v47 }
 0xaf5   :  { %v5006_v34 = vadd.f32 %v5005_v40, %v4999_v8 }
 0xaf7   :  { %v5007_v27 = vpack.c.bf16 %v5006_v34, %v5006_v34 }
 0xaf9   :  { %5084 = vmatmul.bf16.vlgmr.msra.gmra.mxu0 %v5007_v27 }
 0xb76   :  { %v5085_v50 = vpop.f32.mrf.mxu0 }
 0xb77   :  { %v5086_v41 = vadd.f32 %v7921_v2, %v5085_v50 }
 0xb79   :  { %5090 = vst.msk [vmem:[%s8827_s12] sm:$0xff] %vm5089_vm1, %v5086_v41 }
 0xb7e   :  { %v5087_v51 = vpop.f32.mrf.mxu0 }
 0xb7f   :  { %5095 = vsyncpa [#allocation4], 1 }
 0xb80   :  { %5096 = vsyncpa [#allocation6], 1 }

</bundles_post_ra>
